<compile_context>
chip_gen: v6e
topology: v6e:2x2x1
jax: 0.10.0
libtpu: 0.0.40
codegen_flags: <defaults>
</compile_context>

<pallas_src>
import math
from functools import partial

import jax
import jax.numpy as jnp
from jax import lax
from jax.experimental import pallas as pl
from jax.experimental.pallas import tpu as pltpu


# MXU operand dtype (f32 accumulation everywhere).  jnp.float32 -> exact f32 path.
_MXU_DTYPE = jnp.bfloat16


def _round_up(v, m):
    return ((v + m - 1) // m) * m


def _vmem_plan(T, B, Hp, layers):
    """Generation-aware VMEM limit and time-chunk size (any divisor of T)."""
    try:
        cap = int(pltpu.get_tpu_info().vmem_capacity_bytes)
    except Exception:
        cap = 64 * 1024 * 1024                       # conservative (v7x per-core)
    if cap >= 96 * 1024 * 1024:                      # v5e / v6e: 128 MiB VMEM
        vmem_limit = 100 * 1024 * 1024
        chunk_budget = 48 * 1024 * 1024
    else:                                            # v7x: 64 MiB per TensorCore
        vmem_limit = 48 * 1024 * 1024
        chunk_budget = 12 * 1024 * 1024
    wbytes = jnp.finfo(_MXU_DTYPE).bits // 8
    # VMEM-resident weights, worst layer (layer>=1): W_ih (2,2,Hp,4Hp) + W_hh (2,Hp,4Hp)
    fixed = (2 * 2 * Hp * 4 * Hp + 2 * Hp * 4 * Hp) * wbytes
    if layers == 1:
        fixed = (2 * Hp * 4 * Hp + 2 * Hp * 4 * Hp) * wbytes
    # Per-time-step working set, worst case (mid layer), f32:
    #   4 double-buffered input chunks + 2 double-buffered output chunks
    #   + 2 gate scratches (4H wide).
    per_t = B * Hp * 4 * (4 * 2 + 2 * 2 + 2 * 4)
    cap_t = max(1, max(chunk_budget - fixed, per_t) // per_t)
    t_blk = 1
    for d in range(1, T + 1):
        if T % d == 0 and d <= cap_t:
            t_blk = d
    return t_blk, vmem_limit


# ----------------------------------------------------------------------------
# Kernels
# ----------------------------------------------------------------------------
def _lstm_step_loop(gf_sc, gb_sc, whh_ref, yf_ref, yb_ref, hn_ref, cn_ref,
                    *, t_blk, Hp):
    """Serial recurrence over one time chunk, both directions interleaved.

    Forward walks local steps 0..t_blk-1, backward walks t_blk-1..0 (its gate
    chunk / y chunk already correspond to the reversed time chunk).  The final
    (h, c) output refs are the carry (constant block index -> VMEM resident).
    """
    def step(s, _):
        for d in range(2):
            t = s if d == 0 else (t_blk - 1 - s)      # static per-direction expr
            g_sc = gf_sc if d == 0 else gb_sc
            y_ref = yf_ref if d == 0 else yb_ref
            gates = g_sc[t] + jnp.dot(hn_ref[d].astype(_MXU_DTYPE), whh_ref[d],
                                      preferred_element_type=jnp.float32)
            i_g = jax.nn.sigmoid(gates[:, 0 * Hp:1 * Hp])
            f_g = jax.nn.sigmoid(gates[:, 1 * Hp:2 * Hp])
            g_g = jnp.tanh(gates[:, 2 * Hp:3 * Hp])
            o_g = jax.nn.sigmoid(gates[:, 3 * Hp:4 * Hp])
            c_new = f_g * cn_ref[d] + i_g * g_g
            h_new = o_g * jnp.tanh(c_new)
            y_ref[t] = h_new
            hn_ref[d] = h_new
            cn_ref[d] = c_new
        return 0

    lax.fori_loop(0, t_blk, step, 0)


def _layer0_kernel(xf_ref, xb_ref, wih_ref, whh_ref, b_ref,
                   yf_ref, yb_ref, hn_ref, cn_ref, gf_sc, gb_sc,
                   *, t_blk, B, Hp):
    """Layer 0: fused input projection + bidirectional recurrence (one chunk).

    xf_ref/xb_ref: (t_blk, B, Dp) time-major input, forward chunk tc / backward
                   chunk nt-1-tc.
    wih_ref: (2, Dp, 4Hp) bf16   whh_ref: (2, Hp, 4Hp) bf16   b_ref: (2, 1, 4Hp)
    yf_ref/yb_ref: (t_blk, B, Hp) per-direction hidden outputs (own chunk each).
    hn_ref/cn_ref: (2, B, Hp) final states, used directly as the carry.
    gf_sc/gb_sc: (t_blk, B, 4Hp) f32 gate pre-activation scratch.
    """
    @pl.when(pl.program_id(0) == 0)
    def _init():
        hn_ref[...] = jnp.zeros_like(hn_ref)
        cn_ref[...] = jnp.zeros_like(cn_ref)

    # Bulk input projection for this chunk (one MXU matmul per direction).
    for d in range(2):
        x_src = xf_ref if d == 0 else xb_ref
        g_sc = gf_sc if d == 0 else gb_sc
        xm = x_src[...].reshape(t_blk * B, -1).astype(_MXU_DTYPE)
        g = jnp.dot(xm, wih_ref[d], preferred_element_type=jnp.float32) + b_ref[d]
        g_sc[...] = g.reshape(t_blk, B, 4 * Hp)

    _lstm_step_loop(gf_sc, gb_sc, whh_ref, yf_ref, yb_ref, hn_ref, cn_ref,
                    t_blk=t_blk, Hp=Hp)


def _layer_mid_kernel(yfa_ref, yba_ref, yfr_ref, ybr_ref, wih_ref, whh_ref, b_ref,
                      yf_ref, yb_ref, hn_ref, cn_ref, gf_sc, gb_sc,
                      *, t_blk, B, Hp):
    """Layer >= 1: same as layer 0 but the input is both halves of the previous
    layer's output; forward stream consumes chunk tc, backward chunk nt-1-tc.

    yfa/yba: prev y_fwd / y_bwd at chunk tc;  yfr/ybr: same at chunk nt-1-tc.
    wih_ref: (2, 2, Hp, 4Hp) bf16  [direction, prev-direction-half, Hp, 4Hp]
    """
    @pl.when(pl.program_id(0) == 0)
    def _init():
        hn_ref[...] = jnp.zeros_like(hn_ref)
        cn_ref[...] = jnp.zeros_like(cn_ref)

    for d in range(2):
        yf_in = (yfa_ref if d == 0 else yfr_ref)[...].reshape(t_blk * B, Hp)
        yb_in = (yba_ref if d == 0 else ybr_ref)[...].reshape(t_blk * B, Hp)
        g_sc = gf_sc if d == 0 else gb_sc
        g = (jnp.dot(yf_in.astype(_MXU_DTYPE), wih_ref[d, 0],
                     preferred_element_type=jnp.float32)
             + jnp.dot(yb_in.astype(_MXU_DTYPE), wih_ref[d, 1],
                       preferred_element_type=jnp.float32)
             + b_ref[d])
        g_sc[...] = g.reshape(t_blk, B, 4 * Hp)

    _lstm_step_loop(gf_sc, gb_sc, whh_ref, yf_ref, yb_ref, hn_ref, cn_ref,
                    t_blk=t_blk, Hp=Hp)


def _linear_kernel(yf_ref, yb_ref, w_ref, b_ref, o_ref, *, t_blk, B, Hp):
    """Final Linear(2H -> H), time-major in / time-major out, bulk dense store."""
    yf = yf_ref[...].reshape(t_blk * B, Hp).astype(_MXU_DTYPE)
    yb = yb_ref[...].reshape(t_blk * B, Hp).astype(_MXU_DTYPE)
    o = (jnp.dot(yf, w_ref[0], preferred_element_type=jnp.float32)
         + jnp.dot(yb, w_ref[1], preferred_element_type=jnp.float32)
         + b_ref[...])
    o_ref[...] = o.reshape(t_blk, B, Hp)


# ----------------------------------------------------------------------------
# pallas_call wrappers
# ----------------------------------------------------------------------------
def _run_layer0(xt, wih, whh, b, Hp, t_blk, vmem_limit):
    """xt: (T, B, Dp) time-major -> (y_f, y_b (T,B,Hp), h_n, c_n (2,B,Hp))."""
    T, B, Dp = xt.shape
    nt = T // t_blk
    G4 = 4 * Hp
    kernel = partial(_layer0_kernel, t_blk=t_blk, B=B, Hp=Hp)
    return pl.pallas_call(
        kernel,
        out_shape=(
            jax.ShapeDtypeStruct((T, B, Hp), jnp.float32),
            jax.ShapeDtypeStruct((T, B, Hp), jnp.float32),
            jax.ShapeDtypeStruct((2, B, Hp), jnp.float32),
            jax.ShapeDtypeStruct((2, B, Hp), jnp.float32),
        ),
        grid_spec=pltpu.PrefetchScalarGridSpec(
            num_scalar_prefetch=0,
            grid=(nt,),
            in_specs=[
                pl.BlockSpec((t_blk, B, Dp), lambda tc: (tc, 0, 0)),
                pl.BlockSpec((t_blk, B, Dp), lambda tc: (nt - 1 - tc, 0, 0)),
                pl.BlockSpec((2, Dp, G4), lambda tc: (0, 0, 0)),
                pl.BlockSpec((2, Hp, G4), lambda tc: (0, 0, 0)),
                pl.BlockSpec((2, 1, G4), lambda tc: (0, 0, 0)),
            ],
            out_specs=(
                pl.BlockSpec((t_blk, B, Hp), lambda tc: (tc, 0, 0)),
                pl.BlockSpec((t_blk, B, Hp), lambda tc: (nt - 1 - tc, 0, 0)),
                pl.BlockSpec((2, B, Hp), lambda tc: (0, 0, 0)),
                pl.BlockSpec((2, B, Hp), lambda tc: (0, 0, 0)),
            ),
            scratch_shapes=[pltpu.VMEM((t_blk, B, G4), jnp.float32),
                            pltpu.VMEM((t_blk, B, G4), jnp.float32)],
        ),
        compiler_params=pltpu.CompilerParams(
            dimension_semantics=("arbitrary",),
            vmem_limit_bytes=vmem_limit),
    )(xt, xt, wih, whh, b)


def _run_layer_mid(yf_prev, yb_prev, wih, whh, b, Hp, t_blk, vmem_limit):
    """yf_prev/yb_prev: (T, B, Hp) -> (y_f, y_b, h_n, c_n)."""
    T, B, _ = yf_prev.shape
    nt = T // t_blk
    G4 = 4 * Hp
    kernel = partial(_layer_mid_kernel, t_blk=t_blk, B=B, Hp=Hp)
    return pl.pallas_call(
        kernel,
        out_shape=(
            jax.ShapeDtypeStruct((T, B, Hp), jnp.float32),
            jax.ShapeDtypeStruct((T, B, Hp), jnp.float32),
            jax.ShapeDtypeStruct((2, B, Hp), jnp.float32),
            jax.ShapeDtypeStruct((2, B, Hp), jnp.float32),
        ),
        grid_spec=pltpu.PrefetchScalarGridSpec(
            num_scalar_prefetch=0,
            grid=(nt,),
            in_specs=[
                pl.BlockSpec((t_blk, B, Hp), lambda tc: (tc, 0, 0)),
                pl.BlockSpec((t_blk, B, Hp), lambda tc: (tc, 0, 0)),
                pl.BlockSpec((t_blk, B, Hp), lambda tc: (nt - 1 - tc, 0, 0)),
                pl.BlockSpec((t_blk, B, Hp), lambda tc: (nt - 1 - tc, 0, 0)),
                pl.BlockSpec((2, 2, Hp, G4), lambda tc: (0, 0, 0, 0)),
                pl.BlockSpec((2, Hp, G4), lambda tc: (0, 0, 0)),
                pl.BlockSpec((2, 1, G4), lambda tc: (0, 0, 0)),
            ],
            out_specs=(
                pl.BlockSpec((t_blk, B, Hp), lambda tc: (tc, 0, 0)),
                pl.BlockSpec((t_blk, B, Hp), lambda tc: (nt - 1 - tc, 0, 0)),
                pl.BlockSpec((2, B, Hp), lambda tc: (0, 0, 0)),
                pl.BlockSpec((2, B, Hp), lambda tc: (0, 0, 0)),
            ),
            scratch_shapes=[pltpu.VMEM((t_blk, B, G4), jnp.float32),
                            pltpu.VMEM((t_blk, B, G4), jnp.float32)],
        ),
        compiler_params=pltpu.CompilerParams(
            dimension_semantics=("arbitrary",),
            vmem_limit_bytes=vmem_limit),
    )(yf_prev, yb_prev, yf_prev, yb_prev, wih, whh, b)


def _run_linear(yf, yb, w, b, Hp, t_blk, vmem_limit):
    """yf, yb: (T, B, Hp) -> out: (T, B, Hp) time-major."""
    T, B, _ = yf.shape
    nt = T // t_blk
    kernel = partial(_linear_kernel, t_blk=t_blk, B=B, Hp=Hp)
    return pl.pallas_call(
        kernel,
        out_shape=jax.ShapeDtypeStruct((T, B, Hp), jnp.float32),
        grid_spec=pltpu.PrefetchScalarGridSpec(
            num_scalar_prefetch=0,
            grid=(nt,),
            in_specs=[
                pl.BlockSpec((t_blk, B, Hp), lambda tc: (tc, 0, 0)),
                pl.BlockSpec((t_blk, B, Hp), lambda tc: (tc, 0, 0)),
                pl.BlockSpec((2, Hp, Hp), lambda tc: (0, 0, 0)),
                pl.BlockSpec((1, Hp), lambda tc: (0, 0)),
            ],
            out_specs=pl.BlockSpec((t_blk, B, Hp), lambda tc: (tc, 0, 0)),
        ),
        compiler_params=pltpu.CompilerParams(
            dimension_semantics=("parallel",),
            vmem_limit_bytes=vmem_limit),
    )(yf, yb, w, b)


# ----------------------------------------------------------------------------
# Parameters
# ----------------------------------------------------------------------------
def init_blstm_params(key, dim, layers=2):
    """Raw PyTorch-layout parameters, uniform(-1/sqrt(H), 1/sqrt(H)) init."""
    H = dim
    stdv = 1.0 / math.sqrt(H)
    lstm = []
    for layer in range(layers):
        d_in = dim if layer == 0 else 2 * dim
        w_ih, w_hh, b_ih, b_hh = [], [], [], []
        for _ in range(2):
            key, k1, k2, k3, k4 = jax.random.split(key, 5)
            w_ih.append(jax.random.uniform(k1, (4 * H, d_in), jnp.float32, -stdv, stdv))
            w_hh.append(jax.random.uniform(k2, (4 * H, H), jnp.float32, -stdv, stdv))
            b_ih.append(jax.random.uniform(k3, (4 * H,), jnp.float32, -stdv, stdv))
            b_hh.append(jax.random.uniform(k4, (4 * H,), jnp.float32, -stdv, stdv))
        lstm.append({"w_ih": jnp.stack(w_ih), "w_hh": jnp.stack(w_hh),
                     "b_ih": jnp.stack(b_ih), "b_hh": jnp.stack(b_hh)})
    stdv_l = 1.0 / math.sqrt(2 * H)
    key, k1, k2 = jax.random.split(key, 3)
    w = jax.random.uniform(k1, (H, 2 * H), jnp.float32, -stdv_l, stdv_l)
    b = jax.random.uniform(k2, (H,), jnp.float32, -stdv_l, stdv_l)
    return {"lstm": lstm, "linear": {"w": w, "b": b}}


def _pad_gate_cols(w_t, H, Hp):
    """(..., 4H) -> (..., 4Hp): zero-pad each of the 4 gate blocks to Hp lanes."""
    if Hp == H:
        return w_t
    lead = w_t.shape[:-1]
    w4 = w_t.reshape(lead + (4, H))
    pad = [(0, 0)] * (w4.ndim - 1) + [(0, Hp - H)]
    return jnp.pad(w4, pad).reshape(lead + (4 * Hp,))


def prepare_blstm_params(params, dim):
    """Pad H to a multiple of 128, transpose to (in, 4Hp) layout, cast weights."""
    H = dim
    Hp = _round_up(H, 128)
    prep = {"lstm": [], "linear": {}}
    for layer, lp in enumerate(params["lstm"]):
        wih_t = jnp.swapaxes(lp["w_ih"], 1, 2)                    # (2, d_in, 4H)
        wih_t = _pad_gate_cols(wih_t, H, Hp)                      # (2, d_in, 4Hp)
        whh_t = _pad_gate_cols(jnp.swapaxes(lp["w_hh"], 1, 2), H, Hp)
        whh_t = jnp.pad(whh_t, ((0, 0), (0, Hp - H), (0, 0)))     # (2, Hp, 4Hp)
        bias = _pad_gate_cols(lp["b_ih"] + lp["b_hh"], H, Hp).reshape(2, 1, 4 * Hp)
        entry = {"whh": whh_t.astype(_MXU_DTYPE), "b": bias.astype(jnp.float32)}
        if layer == 0:
            wih0 = jnp.pad(wih_t, ((0, 0), (0, Hp - H), (0, 0)))  # (2, Hp, 4Hp)
            entry["wih"] = wih0.astype(_MXU_DTYPE)
        else:
            w = wih_t.reshape(2, 2, H, 4 * Hp)                    # rows: [fwd H, bwd H]
            w = jnp.pad(w, ((0, 0), (0, 0), (0, Hp - H), (0, 0))) # (2, 2, Hp, 4Hp)
            entry["wih"] = w.astype(_MXU_DTYPE)
        prep["lstm"].append(entry)
    wl = params["linear"]["w"].T.reshape(2, H, H)                 # halves [fwd, bwd]
    wl = jnp.pad(wl, ((0, 0), (0, Hp - H), (0, Hp - H)))          # (2, Hp, Hp)
    bl = jnp.pad(params["linear"]["b"], (0, Hp - H)).reshape(1, Hp)
    prep["linear"] = {"w": wl.astype(_MXU_DTYPE), "b": bl.astype(jnp.float32)}
    return prep


# ----------------------------------------------------------------------------
# BLSTM forward
# ----------------------------------------------------------------------------
def blstm_forward(x, prep, dim, layers=2):
    """x: (B, T, dim) f32 -> (y (B, T, dim), (h_n, c_n) each (2*layers, B, dim))."""
    x = x.astype(jnp.float32)
    B0, T, D = x.shape
    assert D == dim
    H = dim
    Hp = prep["lstm"][0]["whh"].shape[1]            # lane-padded hidden dim
    B = _round_up(B0, 8)                            # sublane-padded batch

    # Batch-major -> time-major once (smallest tensor), pad batch + feature dims.
    xt = jnp.transpose(x, (1, 0, 2))                # (T, B0, D)
    xt = jnp.pad(xt, ((0, 0), (0, B - B0), (0, Hp - D)))

    t_blk, vmem_limit = _vmem_plan(T, B, Hp, layers)

    yf = yb = None
    h_list, c_list = [], []
    for layer in range(layers):
        lp = prep["lstm"][layer]
        if layer == 0:
            yf, yb, hn, cn = _run_layer0(xt, lp["wih"], lp["whh"], lp["b"],
                                         Hp, t_blk, vmem_limit)
        else:
            yf, yb, hn, cn = _run_layer_mid(yf, yb, lp["wih"], lp["whh"], lp["b"],
                                            Hp, t_blk, vmem_limit)
        h_list.append(hn)
        c_list.append(cn)

    out_tm = _run_linear(yf, yb, prep["linear"]["w"], prep["linear"]["b"],
                         Hp, t_blk, vmem_limit)                    # (T, B, Hp)
    out = jnp.transpose(out_tm, (1, 0, 2))[:B0, :, :H]             # (B0, T, H)
    h_n = jnp.concatenate(h_list, axis=0)[:, :B0, :H]              # (2*layers, B0, H)
    c_n = jnp.concatenate(c_list, axis=0)[:, :B0, :H]
    return out, (h_n, c_n)


# ----------------------------------------------------------------------------
# Pure-JAX reference (same matmul-operand precision; for correctness check)
# ----------------------------------------------------------------------------
def blstm_reference(x, params, dim, layers=2):
    H = dim
    md = _MXU_DTYPE
    B, T, D = x.shape
    cur = jnp.transpose(x, (1, 0, 2)).astype(jnp.float32)          # (T, B, feat)
    h_all, c_all = [], []
    for layer in range(layers):
        lp = params["lstm"][layer]
        outs = []
        for d in range(2):
            w_ih = lp["w_ih"][d]
            w_hh = lp["w_hh"][d]
            bias = lp["b_ih"][d] + lp["b_hh"][d]
            seq = cur if d == 0 else cur[::-1]
            g = jnp.einsum("tbf,gf->tbg", seq.astype(md), w_ih.astype(md),
                           preferred_element_type=jnp.float32) + bias

            def step(carry, g_t, w_hh=w_hh):
                h, c = carry
                gates = g_t + jnp.dot(h.astype(md), w_hh.T.astype(md),
                                      preferred_element_type=jnp.float32)
                i = jax.nn.sigmoid(gates[:, :H])
                f = jax.nn.sigmoid(gates[:, H:2 * H])
                gg = jnp.tanh(gates[:, 2 * H:3 * H])
                o = jax.nn.sigmoid(gates[:, 3 * H:])
                c2 = f * c + i * gg
                h2 = o * jnp.tanh(c2)
                return (h2, c2), h2

            init = (jnp.zeros((B, H), jnp.float32), jnp.zeros((B, H), jnp.float32))
            (hT, cT), ys = lax.scan(step, init, g)
            if d == 1:
                ys = ys[::-1]
            outs.append(ys)
            h_all.append(hT)
            c_all.append(cT)
        cur = jnp.concatenate(outs, axis=-1)                        # (T, B, 2H)
    w = params["linear"]["w"]
    b = params["linear"]["b"]
    out = jnp.einsum("tbf,gf->tbg", cur.astype(md), w.astype(md),
                     preferred_element_type=jnp.float32) + b
    return jnp.transpose(out, (1, 0, 2)), (jnp.stack(h_all, 0), jnp.stack(c_all, 0))


# ----------------------------------------------------------------------------
if __name__ == "__main__":
    B, T, DIM, LAYERS = 2, 8, 32, 2

    key = jax.random.PRNGKey(0)
    key, kx, kp = jax.random.split(key, 3)
    x = jax.random.normal(kx, (B, T, DIM), jnp.float32)
    raw_params = init_blstm_params(kp, DIM, LAYERS)
    prep_params = prepare_blstm_params(raw_params, DIM)

    fwd = jax.jit(partial(blstm_forward, dim=DIM, layers=LAYERS))
    y, (h_n, c_n) = fwd(x, prep_params)
    jax.block_until_ready((y, h_n, c_n))

    # Shape checks (match PyTorch BLSTM output conventions).
    assert y.shape == (B, T, DIM)
    assert h_n.shape == (2 * LAYERS, B, DIM)
    assert c_n.shape == (2 * LAYERS, B, DIM)

    # Numerical check against a pure-JAX reference of the same math / precision.
    y_ref, (h_ref, c_ref) = blstm_reference(x, raw_params, DIM, LAYERS)
    assert jnp.allclose(y, y_ref, atol=2e-3, rtol=2e-3), \
        float(jnp.max(jnp.abs(y - y_ref)))
    assert jnp.allclose(h_n, h_ref, atol=2e-3, rtol=2e-3)
    assert jnp.allclose(c_n, c_ref, atol=2e-3, rtol=2e-3)

    print("KERNEL_OK")
</pallas_src>

<mosaic_0001>
module attributes {stable_mosaic.version = 11 : i64} {
  func.func @_layer0_kernel(%arg0: i32, %arg1: memref<8x8x128xf32, #tpu.memory_space<vmem>>, %arg2: memref<8x8x128xf32, #tpu.memory_space<vmem>>, %arg3: memref<2x128x512xbf16, #tpu.memory_space<vmem>>, %arg4: memref<2x128x512xbf16, #tpu.memory_space<vmem>>, %arg5: memref<2x1x512xf32, #tpu.memory_space<vmem>>, %arg6: memref<8x8x128xf32, #tpu.memory_space<vmem>>, %arg7: memref<8x8x128xf32, #tpu.memory_space<vmem>>, %arg8: memref<2x8x128xf32, #tpu.memory_space<vmem>>, %arg9: memref<2x8x128xf32, #tpu.memory_space<vmem>>, %arg10: memref<8x8x512xf32, #tpu.memory_space<vmem>>, %arg11: memref<8x8x512xf32, #tpu.memory_space<vmem>>) attributes {dimension_semantics = [#tpu.dimension_semantics<arbitrary>], iteration_bounds = array<i64: 1>, scalar_prefetch = 0 : i64, scratch_operands = 2 : i64, tpu.core_type = #tpu.core_type<tc>, window_params = [{transform_indices = @transform_0, window_bounds = array<i64: 8, 8, 128>}, {transform_indices = @transform_1, window_bounds = array<i64: 8, 8, 128>}, {pipeline_mode = #tpu.pipeline_mode<synchronous>, transform_indices = @transform_2, window_bounds = array<i64: 2, 128, 512>}, {pipeline_mode = #tpu.pipeline_mode<synchronous>, transform_indices = @transform_3, window_bounds = array<i64: 2, 128, 512>}, {pipeline_mode = #tpu.pipeline_mode<synchronous>, transform_indices = @transform_4, window_bounds = array<i64: 2, 1, 512>}, {transform_indices = @transform_5, window_bounds = array<i64: 8, 8, 128>}, {transform_indices = @transform_6, window_bounds = array<i64: 8, 8, 128>}, {pipeline_mode = #tpu.pipeline_mode<synchronous>, transform_indices = @transform_7, window_bounds = array<i64: 2, 8, 128>}, {pipeline_mode = #tpu.pipeline_mode<synchronous>, transform_indices = @transform_8, window_bounds = array<i64: 2, 8, 128>}]} {
    %c0_i32 = arith.constant 0 : i32
    %0 = arith.cmpi eq, %arg0, %c0_i32 : i32
    %1 = arith.extui %0 : i1 to i32
    %c0_i32_0 = arith.constant 0 : i32
    %2 = arith.cmpi ne, %1, %c0_i32_0 : i32
    scf.if %2 {
      %cst_26 = arith.constant 0.000000e+00 : f32
      %28 = vector.broadcast %cst_26 : f32 to vector<2x8x128xf32>
      %c0_27 = arith.constant 0 : index
      %c0_28 = arith.constant 0 : index
      %c0_29 = arith.constant 0 : index
      %29 = vector.load %arg8[%c0_27, %c0_28, %c0_29] : memref<2x8x128xf32, #tpu.memory_space<vmem>>, vector<2x8x128xf32>
      tpu.vector_store %arg8[%c0_27, %c0_28, %c0_29], %28 {strides = array<i32>} : memref<2x8x128xf32, #tpu.memory_space<vmem>>, vector<2x8x128xf32>,
      %cst_30 = arith.constant 0.000000e+00 : f32
      %30 = vector.broadcast %cst_30 : f32 to vector<2x8x128xf32>
      %c0_31 = arith.constant 0 : index
      %c0_32 = arith.constant 0 : index
      %c0_33 = arith.constant 0 : index
      %31 = vector.load %arg9[%c0_31, %c0_32, %c0_33] : memref<2x8x128xf32, #tpu.memory_space<vmem>>, vector<2x8x128xf32>
      tpu.vector_store %arg9[%c0_31, %c0_32, %c0_33], %30 {strides = array<i32>} : memref<2x8x128xf32, #tpu.memory_space<vmem>>, vector<2x8x128xf32>,
    } else {
    }
    %c0 = arith.constant 0 : index
    %c0_1 = arith.constant 0 : index
    %c0_2 = arith.constant 0 : index
    %3 = vector.load %arg1[%c0, %c0_1, %c0_2] : memref<8x8x128xf32, #tpu.memory_space<vmem>>, vector<8x8x128xf32>
    %4 = vector.shape_cast %3 : vector<8x8x128xf32> to vector<64x128xf32>
    %5 = arith.truncf %4 : vector<64x128xf32> to vector<64x128xbf16>
    %c0_3 = arith.constant 0 : index
    %c0_4 = arith.constant 0 : index
    %c0_5 = arith.constant 0 : index
    %6 = vector.load %arg3[%c0_3, %c0_4, %c0_5] : memref<2x128x512xbf16, #tpu.memory_space<vmem>>, vector<1x128x512xbf16>
    %7 = vector.shape_cast %6 : vector<1x128x512xbf16> to vector<128x512xbf16>
    %cst = arith.constant dense<0.000000e+00> : vector<64x512xf32>
    %8 = tpu.matmul %5, %7, %cst {dimension_numbers = #tpu.dot_dimension_numbers<[1], [0], [0], [1], [0, 0, 1, 1], [], []>} : vector<64x128xbf16>, vector<128x512xbf16>, vector<64x512xf32> -> vector<64x512xf32>
    %c0_6 = arith.constant 0 : index
    %c0_7 = arith.constant 0 : index
    %c0_8 = arith.constant 0 : index
    %9 = vector.load %arg5[%c0_6, %c0_7, %c0_8] : memref<2x1x512xf32, #tpu.memory_space<vmem>>, vector<1x1x512xf32>
    %10 = vector.shape_cast %9 : vector<1x1x512xf32> to vector<1x512xf32>
    %11 = vector.broadcast %10 : vector<1x512xf32> to vector<64x512xf32>
    %12 = arith.addf %8, %11 : vector<64x512xf32>
    %13 = vector.shape_cast %12 : vector<64x512xf32> to vector<8x8x512xf32>
    %c0_9 = arith.constant 0 : index
    %c0_10 = arith.constant 0 : index
    %c0_11 = arith.constant 0 : index
    %14 = vector.load %arg10[%c0_9, %c0_10, %c0_11] : memref<8x8x512xf32, #tpu.memory_space<vmem>>, vector<8x8x512xf32>
    tpu.vector_store %arg10[%c0_9, %c0_10, %c0_11], %13 {strides = array<i32>} : memref<8x8x512xf32, #tpu.memory_space<vmem>>, vector<8x8x512xf32>,
    %c0_12 = arith.constant 0 : index
    %c0_13 = arith.constant 0 : index
    %c0_14 = arith.constant 0 : index
    %15 = vector.load %arg2[%c0_12, %c0_13, %c0_14] : memref<8x8x128xf32, #tpu.memory_space<vmem>>, vector<8x8x128xf32>
    %16 = vector.shape_cast %15 : vector<8x8x128xf32> to vector<64x128xf32>
    %17 = arith.truncf %16 : vector<64x128xf32> to vector<64x128xbf16>
    %c1 = arith.constant 1 : index
    %c0_15 = arith.constant 0 : index
    %c0_16 = arith.constant 0 : index
    %18 = vector.load %arg3[%c1, %c0_15, %c0_16] : memref<2x128x512xbf16, #tpu.memory_space<vmem>>, vector<1x128x512xbf16>
    %19 = vector.shape_cast %18 : vector<1x128x512xbf16> to vector<128x512xbf16>
    %cst_17 = arith.constant dense<0.000000e+00> : vector<64x512xf32>
    %20 = tpu.matmul %17, %19, %cst_17 {dimension_numbers = #tpu.dot_dimension_numbers<[1], [0], [0], [1], [0, 0, 1, 1], [], []>} : vector<64x128xbf16>, vector<128x512xbf16>, vector<64x512xf32> -> vector<64x512xf32>
    %c1_18 = arith.constant 1 : index
    %c0_19 = arith.constant 0 : index
    %c0_20 = arith.constant 0 : index
    %21 = vector.load %arg5[%c1_18, %c0_19, %c0_20] : memref<2x1x512xf32, #tpu.memory_space<vmem>>, vector<1x1x512xf32>
    %22 = vector.shape_cast %21 : vector<1x1x512xf32> to vector<1x512xf32>
    %23 = vector.broadcast %22 : vector<1x512xf32> to vector<64x512xf32>
    %24 = arith.addf %20, %23 : vector<64x512xf32>
    %25 = vector.shape_cast %24 : vector<64x512xf32> to vector<8x8x512xf32>
    %c0_21 = arith.constant 0 : index
    %c0_22 = arith.constant 0 : index
    %c0_23 = arith.constant 0 : index
    %26 = vector.load %arg11[%c0_21, %c0_22, %c0_23] : memref<8x8x512xf32, #tpu.memory_space<vmem>>, vector<8x8x512xf32>
    tpu.vector_store %arg11[%c0_21, %c0_22, %c0_23], %25 {strides = array<i32>} : memref<8x8x512xf32, #tpu.memory_space<vmem>>, vector<8x8x512xf32>,
    %c0_i32_24 = arith.constant 0 : i32
    %c8_i32 = arith.constant 8 : i32
    %27 = arith.addi %c0_i32_24, %c8_i32 : i32
    %c1_i32 = arith.constant 1 : i32
    scf.for %arg12 = %c0_i32_24 to %27 step %c1_i32  : i32 {
      %28 = arith.index_cast %arg12 : i32 to index
      %c0_26 = arith.constant 0 : index
      %c0_27 = arith.constant 0 : index
      %29 = vector.load %arg10[%28, %c0_26, %c0_27] : memref<8x8x512xf32, #tpu.memory_space<vmem>>, vector<1x8x512xf32>
      %30 = vector.shape_cast %29 : vector<1x8x512xf32> to vector<8x512xf32>
      %c0_28 = arith.constant 0 : index
      %c0_29 = arith.constant 0 : index
      %c0_30 = arith.constant 0 : index
      %31 = vector.load %arg8[%c0_28, %c0_29, %c0_30] : memref<2x8x128xf32, #tpu.memory_space<vmem>>, vector<1x8x128xf32>
      %32 = vector.shape_cast %31 : vector<1x8x128xf32> to vector<8x128xf32>
      %33 = arith.truncf %32 : vector<8x128xf32> to vector<8x128xbf16>
      %c0_31 = arith.constant 0 : index
      %c0_32 = arith.constant 0 : index
      %c0_33 = arith.constant 0 : index
      %34 = vector.load %arg4[%c0_31, %c0_32, %c0_33] : memref<2x128x512xbf16, #tpu.memory_space<vmem>>, vector<1x128x512xbf16>
      %35 = vector.shape_cast %34 : vector<1x128x512xbf16> to vector<128x512xbf16>
      %cst_34 = arith.constant dense<0.000000e+00> : vector<8x512xf32>
      %36 = tpu.matmul %33, %35, %cst_34 {dimension_numbers = #tpu.dot_dimension_numbers<[1], [0], [0], [1], [0, 0, 1, 1], [], []>} : vector<8x128xbf16>, vector<128x512xbf16>, vector<8x512xf32> -> vector<8x512xf32>
      %37 = arith.addf %30, %36 : vector<8x512xf32>
      %38 = vector.extract_strided_slice %37 {offsets = [0, 0], sizes = [8, 128], strides = [1, 1]} : vector<8x512xf32> to vector<8x128xf32>
      %39 = arith.negf %38 : vector<8x128xf32>
      %40 = math.exp %39 : vector<8x128xf32>
      %cst_35 = arith.constant 1.000000e+00 : f32
      %41 = vector.broadcast %cst_35 : f32 to vector<8x128xf32>
      %42 = arith.addf %41, %40 : vector<8x128xf32>
      %43 = arith.divf %41, %42 : vector<8x128xf32>
      %44 = vector.extract_strided_slice %37 {offsets = [0, 128], sizes = [8, 128], strides = [1, 1]} : vector<8x512xf32> to vector<8x128xf32>
      %45 = arith.negf %44 : vector<8x128xf32>
      %46 = math.exp %45 : vector<8x128xf32>
      %cst_36 = arith.constant 1.000000e+00 : f32
      %47 = vector.broadcast %cst_36 : f32 to vector<8x128xf32>
      %48 = arith.addf %47, %46 : vector<8x128xf32>
      %49 = arith.divf %47, %48 : vector<8x128xf32>
      %50 = vector.extract_strided_slice %37 {offsets = [0, 256], sizes = [8, 128], strides = [1, 1]} : vector<8x512xf32> to vector<8x128xf32>
      %51 = math.tanh %50 : vector<8x128xf32>
      %52 = vector.extract_strided_slice %37 {offsets = [0, 384], sizes = [8, 128], strides = [1, 1]} : vector<8x512xf32> to vector<8x128xf32>
      %53 = arith.negf %52 : vector<8x128xf32>
      %54 = math.exp %53 : vector<8x128xf32>
      %cst_37 = arith.constant 1.000000e+00 : f32
      %55 = vector.broadcast %cst_37 : f32 to vector<8x128xf32>
      %56 = arith.addf %55, %54 : vector<8x128xf32>
      %57 = arith.divf %55, %56 : vector<8x128xf32>
      %c0_38 = arith.constant 0 : index
      %c0_39 = arith.constant 0 : index
      %c0_40 = arith.constant 0 : index
      %58 = vector.load %arg9[%c0_38, %c0_39, %c0_40] : memref<2x8x128xf32, #tpu.memory_space<vmem>>, vector<1x8x128xf32>
      %59 = vector.shape_cast %58 : vector<1x8x128xf32> to vector<8x128xf32>
      %60 = arith.mulf %49, %59 : vector<8x128xf32>
      %61 = arith.mulf %43, %51 : vector<8x128xf32>
      %62 = arith.addf %60, %61 : vector<8x128xf32>
      %63 = math.tanh %62 : vector<8x128xf32>
      %64 = arith.mulf %57, %63 : vector<8x128xf32>
      %65 = arith.index_cast %arg12 : i32 to index
      %c0_41 = arith.constant 0 : index
      %c0_42 = arith.constant 0 : index
      %66 = vector.load %arg6[%65, %c0_41, %c0_42] : memref<8x8x128xf32, #tpu.memory_space<vmem>>, vector<1x8x128xf32>
      %67 = vector.shape_cast %66 : vector<1x8x128xf32> to vector<8x128xf32>
      %68 = vector.shape_cast %64 : vector<8x128xf32> to vector<1x8x128xf32>
      tpu.vector_store %arg6[%65, %c0_41, %c0_42], %68 {strides = array<i32>} : memref<8x8x128xf32, #tpu.memory_space<vmem>>, vector<1x8x128xf32>,
      %c0_43 = arith.constant 0 : index
      %c0_44 = arith.constant 0 : index
      %c0_45 = arith.constant 0 : index
      %69 = vector.load %arg8[%c0_43, %c0_44, %c0_45] : memref<2x8x128xf32, #tpu.memory_space<vmem>>, vector<1x8x128xf32>
      %70 = vector.shape_cast %69 : vector<1x8x128xf32> to vector<8x128xf32>
      %71 = vector.shape_cast %64 : vector<8x128xf32> to vector<1x8x128xf32>
      tpu.vector_store %arg8[%c0_43, %c0_44, %c0_45], %71 {strides = array<i32>} : memref<2x8x128xf32, #tpu.memory_space<vmem>>, vector<1x8x128xf32>,
      %c0_46 = arith.constant 0 : index
      %c0_47 = arith.constant 0 : index
      %c0_48 = arith.constant 0 : index
      %72 = vector.load %arg9[%c0_46, %c0_47, %c0_48] : memref<2x8x128xf32, #tpu.memory_space<vmem>>, vector<1x8x128xf32>
      %73 = vector.shape_cast %72 : vector<1x8x128xf32> to vector<8x128xf32>
      %74 = vector.shape_cast %62 : vector<8x128xf32> to vector<1x8x128xf32>
      tpu.vector_store %arg9[%c0_46, %c0_47, %c0_48], %74 {strides = array<i32>} : memref<2x8x128xf32, #tpu.memory_space<vmem>>, vector<1x8x128xf32>,
      %c7_i32 = arith.constant 7 : i32
      %75 = arith.subi %c7_i32, %arg12 : i32
      %76 = arith.index_cast %75 : i32 to index
      %c0_49 = arith.constant 0 : index
      %c0_50 = arith.constant 0 : index
      %77 = vector.load %arg11[%76, %c0_49, %c0_50] : memref<8x8x512xf32, #tpu.memory_space<vmem>>, vector<1x8x512xf32>
      %78 = vector.shape_cast %77 : vector<1x8x512xf32> to vector<8x512xf32>
      %c1_51 = arith.constant 1 : index
      %c0_52 = arith.constant 0 : index
      %c0_53 = arith.constant 0 : index
      %79 = vector.load %arg8[%c1_51, %c0_52, %c0_53] : memref<2x8x128xf32, #tpu.memory_space<vmem>>, vector<1x8x128xf32>
      %80 = vector.shape_cast %79 : vector<1x8x128xf32> to vector<8x128xf32>
      %81 = arith.truncf %80 : vector<8x128xf32> to vector<8x128xbf16>
      %c1_54 = arith.constant 1 : index
      %c0_55 = arith.constant 0 : index
      %c0_56 = arith.constant 0 : index
      %82 = vector.load %arg4[%c1_54, %c0_55, %c0_56] : memref<2x128x512xbf16, #tpu.memory_space<vmem>>, vector<1x128x512xbf16>
      %83 = vector.shape_cast %82 : vector<1x128x512xbf16> to vector<128x512xbf16>
      %cst_57 = arith.constant dense<0.000000e+00> : vector<8x512xf32>
      %84 = tpu.matmul %81, %83, %cst_57 {dimension_numbers = #tpu.dot_dimension_numbers<[1], [0], [0], [1], [0, 0, 1, 1], [], []>} : vector<8x128xbf16>, vector<128x512xbf16>, vector<8x512xf32> -> vector<8x512xf32>
      %85 = arith.addf %78, %84 : vector<8x512xf32>
      %86 = vector.extract_strided_slice %85 {offsets = [0, 0], sizes = [8, 128], strides = [1, 1]} : vector<8x512xf32> to vector<8x128xf32>
      %87 = arith.negf %86 : vector<8x128xf32>
      %88 = math.exp %87 : vector<8x128xf32>
      %cst_58 = arith.constant 1.000000e+00 : f32
      %89 = vector.broadcast %cst_58 : f32 to vector<8x128xf32>
      %90 = arith.addf %89, %88 : vector<8x128xf32>
      %91 = arith.divf %89, %90 : vector<8x128xf32>
      %92 = vector.extract_strided_slice %85 {offsets = [0, 128], sizes = [8, 128], strides = [1, 1]} : vector<8x512xf32> to vector<8x128xf32>
      %93 = arith.negf %92 : vector<8x128xf32>
      %94 = math.exp %93 : vector<8x128xf32>
      %cst_59 = arith.constant 1.000000e+00 : f32
      %95 = vector.broadcast %cst_59 : f32 to vector<8x128xf32>
      %96 = arith.addf %95, %94 : vector<8x128xf32>
      %97 = arith.divf %95, %96 : vector<8x128xf32>
      %98 = vector.extract_strided_slice %85 {offsets = [0, 256], sizes = [8, 128], strides = [1, 1]} : vector<8x512xf32> to vector<8x128xf32>
      %99 = math.tanh %98 : vector<8x128xf32>
      %100 = vector.extract_strided_slice %85 {offsets = [0, 384], sizes = [8, 128], strides = [1, 1]} : vector<8x512xf32> to vector<8x128xf32>
      %101 = arith.negf %100 : vector<8x128xf32>
      %102 = math.exp %101 : vector<8x128xf32>
      %cst_60 = arith.constant 1.000000e+00 : f32
      %103 = vector.broadcast %cst_60 : f32 to vector<8x128xf32>
      %104 = arith.addf %103, %102 : vector<8x128xf32>
      %105 = arith.divf %103, %104 : vector<8x128xf32>
      %c1_61 = arith.constant 1 : index
      %c0_62 = arith.constant 0 : index
      %c0_63 = arith.constant 0 : index
      %106 = vector.load %arg9[%c1_61, %c0_62, %c0_63] : memref<2x8x128xf32, #tpu.memory_space<vmem>>, vector<1x8x128xf32>
      %107 = vector.shape_cast %106 : vector<1x8x128xf32> to vector<8x128xf32>
      %108 = arith.mulf %97, %107 : vector<8x128xf32>
      %109 = arith.mulf %91, %99 : vector<8x128xf32>
      %110 = arith.addf %108, %109 : vector<8x128xf32>
      %111 = math.tanh %110 : vector<8x128xf32>
      %112 = arith.mulf %105, %111 : vector<8x128xf32>
      %113 = arith.index_cast %75 : i32 to index
      %c0_64 = arith.constant 0 : index
      %c0_65 = arith.constant 0 : index
      %114 = vector.load %arg7[%113, %c0_64, %c0_65] : memref<8x8x128xf32, #tpu.memory_space<vmem>>, vector<1x8x128xf32>
      %115 = vector.shape_cast %114 : vector<1x8x128xf32> to vector<8x128xf32>
      %116 = vector.shape_cast %112 : vector<8x128xf32> to vector<1x8x128xf32>
      tpu.vector_store %arg7[%113, %c0_64, %c0_65], %116 {strides = array<i32>} : memref<8x8x128xf32, #tpu.memory_space<vmem>>, vector<1x8x128xf32>,
      %c1_66 = arith.constant 1 : index
      %c0_67 = arith.constant 0 : index
      %c0_68 = arith.constant 0 : index
      %117 = vector.load %arg8[%c1_66, %c0_67, %c0_68] : memref<2x8x128xf32, #tpu.memory_space<vmem>>, vector<1x8x128xf32>
      %118 = vector.shape_cast %117 : vector<1x8x128xf32> to vector<8x128xf32>
      %119 = vector.shape_cast %112 : vector<8x128xf32> to vector<1x8x128xf32>
      tpu.vector_store %arg8[%c1_66, %c0_67, %c0_68], %119 {strides = array<i32>} : memref<2x8x128xf32, #tpu.memory_space<vmem>>, vector<1x8x128xf32>,
      %c1_69 = arith.constant 1 : index
      %c0_70 = arith.constant 0 : index
      %c0_71 = arith.constant 0 : index
      %120 = vector.load %arg9[%c1_69, %c0_70, %c0_71] : memref<2x8x128xf32, #tpu.memory_space<vmem>>, vector<1x8x128xf32>
      %121 = vector.shape_cast %120 : vector<1x8x128xf32> to vector<8x128xf32>
      %122 = vector.shape_cast %110 : vector<8x128xf32> to vector<1x8x128xf32>
      tpu.vector_store %arg9[%c1_69, %c0_70, %c0_71], %122 {strides = array<i32>} : memref<2x8x128xf32, #tpu.memory_space<vmem>>, vector<1x8x128xf32>,
    }
    %c8_i32_25 = arith.constant 8 : i32
    return
  }
  func.func @transform_0(%arg0: i32) -> (i32, i32, i32) {
    %c0_i32 = arith.constant 0 : i32
    %c0_i32_0 = arith.constant 0 : i32
    %c0_i32_1 = arith.constant 0 : i32
    return %arg0, %c0_i32, %c0_i32_0 : i32, i32, i32
  }
  func.func @transform_1(%arg0: i32) -> (i32, i32, i32) {
    %c0_i32 = arith.constant 0 : i32
    %0 = arith.subi %c0_i32, %arg0 : i32
    %c0_i32_0 = arith.constant 0 : i32
    %c0_i32_1 = arith.constant 0 : i32
    %c0_i32_2 = arith.constant 0 : i32
    return %0, %c0_i32_0, %c0_i32_1 : i32, i32, i32
  }
  func.func @transform_2(%arg0: i32) -> (i32, i32, i32) {
    %c0_i32 = arith.constant 0 : i32
    %c0_i32_0 = arith.constant 0 : i32
    %c0_i32_1 = arith.constant 0 : i32
    %c0_i32_2 = arith.constant 0 : i32
    return %c0_i32, %c0_i32_0, %c0_i32_1 : i32, i32, i32
  }
  func.func @transform_3(%arg0: i32) -> (i32, i32, i32) {
    %c0_i32 = arith.constant 0 : i32
    %c0_i32_0 = arith.constant 0 : i32
    %c0_i32_1 = arith.constant 0 : i32
    %c0_i32_2 = arith.constant 0 : i32
    return %c0_i32, %c0_i32_0, %c0_i32_1 : i32, i32, i32
  }
  func.func @transform_4(%arg0: i32) -> (i32, i32, i32) {
    %c0_i32 = arith.constant 0 : i32
    %c0_i32_0 = arith.constant 0 : i32
    %c0_i32_1 = arith.constant 0 : i32
    %c0_i32_2 = arith.constant 0 : i32
    return %c0_i32, %c0_i32_0, %c0_i32_1 : i32, i32, i32
  }
  func.func @transform_5(%arg0: i32) -> (i32, i32, i32) {
    %c0_i32 = arith.constant 0 : i32
    %c0_i32_0 = arith.constant 0 : i32
    %c0_i32_1 = arith.constant 0 : i32
    return %arg0, %c0_i32, %c0_i32_0 : i32, i32, i32
  }
  func.func @transform_6(%arg0: i32) -> (i32, i32, i32) {
    %c0_i32 = arith.constant 0 : i32
    %0 = arith.subi %c0_i32, %arg0 : i32
    %c0_i32_0 = arith.constant 0 : i32
    %c0_i32_1 = arith.constant 0 : i32
    %c0_i32_2 = arith.constant 0 : i32
    return %0, %c0_i32_0, %c0_i32_1 : i32, i32, i32
  }
  func.func @transform_7(%arg0: i32) -> (i32, i32, i32) {
    %c0_i32 = arith.constant 0 : i32
    %c0_i32_0 = arith.constant 0 : i32
    %c0_i32_1 = arith.constant 0 : i32
    %c0_i32_2 = arith.constant 0 : i32
    return %c0_i32, %c0_i32_0, %c0_i32_1 : i32, i32, i32
  }
  func.func @transform_8(%arg0: i32) -> (i32, i32, i32) {
    %c0_i32 = arith.constant 0 : i32
    %c0_i32_0 = arith.constant 0 : i32
    %c0_i32_1 = arith.constant 0 : i32
    %c0_i32_2 = arith.constant 0 : i32
    return %c0_i32, %c0_i32_0, %c0_i32_1 : i32, i32, i32
  }
}

module attributes {stable_mosaic.version = 11 : i64} {
  func.func @_layer_mid_kernel(%arg0: i32, %arg1: memref<8x8x128xf32, #tpu.memory_space<vmem>>, %arg2: memref<8x8x128xf32, #tpu.memory_space<vmem>>, %arg3: memref<8x8x128xf32, #tpu.memory_space<vmem>>, %arg4: memref<8x8x128xf32, #tpu.memory_space<vmem>>, %arg5: memref<2x2x128x512xbf16, #tpu.memory_space<vmem>>, %arg6: memref<2x128x512xbf16, #tpu.memory_space<vmem>>, %arg7: memref<2x1x512xf32, #tpu.memory_space<vmem>>, %arg8: memref<8x8x128xf32, #tpu.memory_space<vmem>>, %arg9: memref<8x8x128xf32, #tpu.memory_space<vmem>>, %arg10: memref<2x8x128xf32, #tpu.memory_space<vmem>>, %arg11: memref<2x8x128xf32, #tpu.memory_space<vmem>>, %arg12: memref<8x8x512xf32, #tpu.memory_space<vmem>>, %arg13: memref<8x8x512xf32, #tpu.memory_space<vmem>>) attributes {dimension_semantics = [#tpu.dimension_semantics<arbitrary>], iteration_bounds = array<i64: 1>, scalar_prefetch = 0 : i64, scratch_operands = 2 : i64, tpu.core_type = #tpu.core_type<tc>, window_params = [{transform_indices = @transform_0, window_bounds = array<i64: 8, 8, 128>}, {transform_indices = @transform_1, window_bounds = array<i64: 8, 8, 128>}, {transform_indices = @transform_2, window_bounds = array<i64: 8, 8, 128>}, {transform_indices = @transform_3, window_bounds = array<i64: 8, 8, 128>}, {pipeline_mode = #tpu.pipeline_mode<synchronous>, transform_indices = @transform_4, window_bounds = array<i64: 2, 2, 128, 512>}, {pipeline_mode = #tpu.pipeline_mode<synchronous>, transform_indices = @transform_5, window_bounds = array<i64: 2, 128, 512>}, {pipeline_mode = #tpu.pipeline_mode<synchronous>, transform_indices = @transform_6, window_bounds = array<i64: 2, 1, 512>}, {transform_indices = @transform_7, window_bounds = array<i64: 8, 8, 128>}, {transform_indices = @transform_8, window_bounds = array<i64: 8, 8, 128>}, {pipeline_mode = #tpu.pipeline_mode<synchronous>, transform_indices = @transform_9, window_bounds = array<i64: 2, 8, 128>}, {pipeline_mode = #tpu.pipeline_mode<synchronous>, transform_indices = @transform_10, window_bounds = array<i64: 2, 8, 128>}]} {
    %c0_i32 = arith.constant 0 : i32
    %0 = arith.cmpi eq, %arg0, %c0_i32 : i32
    %1 = arith.extui %0 : i1 to i32
    %c0_i32_0 = arith.constant 0 : i32
    %2 = arith.cmpi ne, %1, %c0_i32_0 : i32
    scf.if %2 {
      %cst_44 = arith.constant 0.000000e+00 : f32
      %42 = vector.broadcast %cst_44 : f32 to vector<2x8x128xf32>
      %c0_45 = arith.constant 0 : index
      %c0_46 = arith.constant 0 : index
      %c0_47 = arith.constant 0 : index
      %43 = vector.load %arg10[%c0_45, %c0_46, %c0_47] : memref<2x8x128xf32, #tpu.memory_space<vmem>>, vector<2x8x128xf32>
      tpu.vector_store %arg10[%c0_45, %c0_46, %c0_47], %42 {strides = array<i32>} : memref<2x8x128xf32, #tpu.memory_space<vmem>>, vector<2x8x128xf32>,
      %cst_48 = arith.constant 0.000000e+00 : f32
      %44 = vector.broadcast %cst_48 : f32 to vector<2x8x128xf32>
      %c0_49 = arith.constant 0 : index
      %c0_50 = arith.constant 0 : index
      %c0_51 = arith.constant 0 : index
      %45 = vector.load %arg11[%c0_49, %c0_50, %c0_51] : memref<2x8x128xf32, #tpu.memory_space<vmem>>, vector<2x8x128xf32>
      tpu.vector_store %arg11[%c0_49, %c0_50, %c0_51], %44 {strides = array<i32>} : memref<2x8x128xf32, #tpu.memory_space<vmem>>, vector<2x8x128xf32>,
    } else {
    }
    %c0 = arith.constant 0 : index
    %c0_1 = arith.constant 0 : index
    %c0_2 = arith.constant 0 : index
    %3 = vector.load %arg1[%c0, %c0_1, %c0_2] : memref<8x8x128xf32, #tpu.memory_space<vmem>>, vector<8x8x128xf32>
    %4 = vector.shape_cast %3 : vector<8x8x128xf32> to vector<64x128xf32>
    %c0_3 = arith.constant 0 : index
    %c0_4 = arith.constant 0 : index
    %c0_5 = arith.constant 0 : index
    %5 = vector.load %arg2[%c0_3, %c0_4, %c0_5] : memref<8x8x128xf32, #tpu.memory_space<vmem>>, vector<8x8x128xf32>
    %6 = vector.shape_cast %5 : vector<8x8x128xf32> to vector<64x128xf32>
    %7 = arith.truncf %4 : vector<64x128xf32> to vector<64x128xbf16>
    %c0_6 = arith.constant 0 : index
    %c0_7 = arith.constant 0 : index
    %c0_8 = arith.constant 0 : index
    %c0_9 = arith.constant 0 : index
    %8 = vector.load %arg5[%c0_6, %c0_7, %c0_8, %c0_9] : memref<2x2x128x512xbf16, #tpu.memory_space<vmem>>, vector<1x1x128x512xbf16>
    %9 = vector.shape_cast %8 : vector<1x1x128x512xbf16> to vector<128x512xbf16>
    %cst = arith.constant dense<0.000000e+00> : vector<64x512xf32>
    %10 = tpu.matmul %7, %9, %cst {dimension_numbers = #tpu.dot_dimension_numbers<[1], [0], [0], [1], [0, 0, 1, 1], [], []>} : vector<64x128xbf16>, vector<128x512xbf16>, vector<64x512xf32> -> vector<64x512xf32>
    %11 = arith.truncf %6 : vector<64x128xf32> to vector<64x128xbf16>
    %c0_10 = arith.constant 0 : index
    %c1 = arith.constant 1 : index
    %c0_11 = arith.constant 0 : index
    %c0_12 = arith.constant 0 : index
    %12 = vector.load %arg5[%c0_10, %c1, %c0_11, %c0_12] : memref<2x2x128x512xbf16, #tpu.memory_space<vmem>>, vector<1x1x128x512xbf16>
    %13 = vector.shape_cast %12 : vector<1x1x128x512xbf16> to vector<128x512xbf16>
    %cst_13 = arith.constant dense<0.000000e+00> : vector<64x512xf32>
    %14 = tpu.matmul %11, %13, %cst_13 {dimension_numbers = #tpu.dot_dimension_numbers<[1], [0], [0], [1], [0, 0, 1, 1], [], []>} : vector<64x128xbf16>, vector<128x512xbf16>, vector<64x512xf32> -> vector<64x512xf32>
    %15 = arith.addf %10, %14 : vector<64x512xf32>
    %c0_14 = arith.constant 0 : index
    %c0_15 = arith.constant 0 : index
    %c0_16 = arith.constant 0 : index
    %16 = vector.load %arg7[%c0_14, %c0_15, %c0_16] : memref<2x1x512xf32, #tpu.memory_space<vmem>>, vector<1x1x512xf32>
    %17 = vector.shape_cast %16 : vector<1x1x512xf32> to vector<1x512xf32>
    %18 = vector.broadcast %17 : vector<1x512xf32> to vector<64x512xf32>
    %19 = arith.addf %15, %18 : vector<64x512xf32>
    %20 = vector.shape_cast %19 : vector<64x512xf32> to vector<8x8x512xf32>
    %c0_17 = arith.constant 0 : index
    %c0_18 = arith.constant 0 : index
    %c0_19 = arith.constant 0 : index
    %21 = vector.load %arg12[%c0_17, %c0_18, %c0_19] : memref<8x8x512xf32, #tpu.memory_space<vmem>>, vector<8x8x512xf32>
    tpu.vector_store %arg12[%c0_17, %c0_18, %c0_19], %20 {strides = array<i32>} : memref<8x8x512xf32, #tpu.memory_space<vmem>>, vector<8x8x512xf32>,
    %c0_20 = arith.constant 0 : index
    %c0_21 = arith.constant 0 : index
    %c0_22 = arith.constant 0 : index
    %22 = vector.load %arg3[%c0_20, %c0_21, %c0_22] : memref<8x8x128xf32, #tpu.memory_space<vmem>>, vector<8x8x128xf32>
    %23 = vector.shape_cast %22 : vector<8x8x128xf32> to vector<64x128xf32>
    %c0_23 = arith.constant 0 : index
    %c0_24 = arith.constant 0 : index
    %c0_25 = arith.constant 0 : index
    %24 = vector.load %arg4[%c0_23, %c0_24, %c0_25] : memref<8x8x128xf32, #tpu.memory_space<vmem>>, vector<8x8x128xf32>
    %25 = vector.shape_cast %24 : vector<8x8x128xf32> to vector<64x128xf32>
    %26 = arith.truncf %23 : vector<64x128xf32> to vector<64x128xbf16>
    %c1_26 = arith.constant 1 : index
    %c0_27 = arith.constant 0 : index
    %c0_28 = arith.constant 0 : index
    %c0_29 = arith.constant 0 : index
    %27 = vector.load %arg5[%c1_26, %c0_27, %c0_28, %c0_29] : memref<2x2x128x512xbf16, #tpu.memory_space<vmem>>, vector<1x1x128x512xbf16>
    %28 = vector.shape_cast %27 : vector<1x1x128x512xbf16> to vector<128x512xbf16>
    %cst_30 = arith.constant dense<0.000000e+00> : vector<64x512xf32>
    %29 = tpu.matmul %26, %28, %cst_30 {dimension_numbers = #tpu.dot_dimension_numbers<[1], [0], [0], [1], [0, 0, 1, 1], [], []>} : vector<64x128xbf16>, vector<128x512xbf16>, vector<64x512xf32> -> vector<64x512xf32>
    %30 = arith.truncf %25 : vector<64x128xf32> to vector<64x128xbf16>
    %c1_31 = arith.constant 1 : index
    %c1_32 = arith.constant 1 : index
    %c0_33 = arith.constant 0 : index
    %c0_34 = arith.constant 0 : index
    %31 = vector.load %arg5[%c1_31, %c1_32, %c0_33, %c0_34] : memref<2x2x128x512xbf16, #tpu.memory_space<vmem>>, vector<1x1x128x512xbf16>
    %32 = vector.shape_cast %31 : vector<1x1x128x512xbf16> to vector<128x512xbf16>
    %cst_35 = arith.constant dense<0.000000e+00> : vector<64x512xf32>
    %33 = tpu.matmul %30, %32, %cst_35 {dimension_numbers = #tpu.dot_dimension_numbers<[1], [0], [0], [1], [0, 0, 1, 1], [], []>} : vector<64x128xbf16>, vector<128x512xbf16>, vector<64x512xf32> -> vector<64x512xf32>
    %34 = arith.addf %29, %33 : vector<64x512xf32>
    %c1_36 = arith.constant 1 : index
    %c0_37 = arith.constant 0 : index
    %c0_38 = arith.constant 0 : index
    %35 = vector.load %arg7[%c1_36, %c0_37, %c0_38] : memref<2x1x512xf32, #tpu.memory_space<vmem>>, vector<1x1x512xf32>
    %36 = vector.shape_cast %35 : vector<1x1x512xf32> to vector<1x512xf32>
    %37 = vector.broadcast %36 : vector<1x512xf32> to vector<64x512xf32>
    %38 = arith.addf %34, %37 : vector<64x512xf32>
    %39 = vector.shape_cast %38 : vector<64x512xf32> to vector<8x8x512xf32>
    %c0_39 = arith.constant 0 : index
    %c0_40 = arith.constant 0 : index
    %c0_41 = arith.constant 0 : index
    %40 = vector.load %arg13[%c0_39, %c0_40, %c0_41] : memref<8x8x512xf32, #tpu.memory_space<vmem>>, vector<8x8x512xf32>
    tpu.vector_store %arg13[%c0_39, %c0_40, %c0_41], %39 {strides = array<i32>} : memref<8x8x512xf32, #tpu.memory_space<vmem>>, vector<8x8x512xf32>,
    %c0_i32_42 = arith.constant 0 : i32
    %c8_i32 = arith.constant 8 : i32
    %41 = arith.addi %c0_i32_42, %c8_i32 : i32
    %c1_i32 = arith.constant 1 : i32
    scf.for %arg14 = %c0_i32_42 to %41 step %c1_i32  : i32 {
      %42 = arith.index_cast %arg14 : i32 to index
      %c0_44 = arith.constant 0 : index
      %c0_45 = arith.constant 0 : index
      %43 = vector.load %arg12[%42, %c0_44, %c0_45] : memref<8x8x512xf32, #tpu.memory_space<vmem>>, vector<1x8x512xf32>
      %44 = vector.shape_cast %43 : vector<1x8x512xf32> to vector<8x512xf32>
      %c0_46 = arith.constant 0 : index
      %c0_47 = arith.constant 0 : index
      %c0_48 = arith.constant 0 : index
      %45 = vector.load %arg10[%c0_46, %c0_47, %c0_48] : memref<2x8x128xf32, #tpu.memory_space<vmem>>, vector<1x8x128xf32>
      %46 = vector.shape_cast %45 : vector<1x8x128xf32> to vector<8x128xf32>
      %47 = arith.truncf %46 : vector<8x128xf32> to vector<8x128xbf16>
      %c0_49 = arith.constant 0 : index
      %c0_50 = arith.constant 0 : index
      %c0_51 = arith.constant 0 : index
      %48 = vector.load %arg6[%c0_49, %c0_50, %c0_51] : memref<2x128x512xbf16, #tpu.memory_space<vmem>>, vector<1x128x512xbf16>
      %49 = vector.shape_cast %48 : vector<1x128x512xbf16> to vector<128x512xbf16>
      %cst_52 = arith.constant dense<0.000000e+00> : vector<8x512xf32>
      %50 = tpu.matmul %47, %49, %cst_52 {dimension_numbers = #tpu.dot_dimension_numbers<[1], [0], [0], [1], [0, 0, 1, 1], [], []>} : vector<8x128xbf16>, vector<128x512xbf16>, vector<8x512xf32> -> vector<8x512xf32>
      %51 = arith.addf %44, %50 : vector<8x512xf32>
      %52 = vector.extract_strided_slice %51 {offsets = [0, 0], sizes = [8, 128], strides = [1, 1]} : vector<8x512xf32> to vector<8x128xf32>
      %53 = arith.negf %52 : vector<8x128xf32>
      %54 = math.exp %53 : vector<8x128xf32>
      %cst_53 = arith.constant 1.000000e+00 : f32
      %55 = vector.broadcast %cst_53 : f32 to vector<8x128xf32>
      %56 = arith.addf %55, %54 : vector<8x128xf32>
      %57 = arith.divf %55, %56 : vector<8x128xf32>
      %58 = vector.extract_strided_slice %51 {offsets = [0, 128], sizes = [8, 128], strides = [1, 1]} : vector<8x512xf32> to vector<8x128xf32>
      %59 = arith.negf %58 : vector<8x128xf32>
      %60 = math.exp %59 : vector<8x128xf32>
      %cst_54 = arith.constant 1.000000e+00 : f32
      %61 = vector.broadcast %cst_54 : f32 to vector<8x128xf32>
      %62 = arith.addf %61, %60 : vector<8x128xf32>
      %63 = arith.divf %61, %62 : vector<8x128xf32>
      %64 = vector.extract_strided_slice %51 {offsets = [0, 256], sizes = [8, 128], strides = [1, 1]} : vector<8x512xf32> to vector<8x128xf32>
      %65 = math.tanh %64 : vector<8x128xf32>
      %66 = vector.extract_strided_slice %51 {offsets = [0, 384], sizes = [8, 128], strides = [1, 1]} : vector<8x512xf32> to vector<8x128xf32>
      %67 = arith.negf %66 : vector<8x128xf32>
      %68 = math.exp %67 : vector<8x128xf32>
      %cst_55 = arith.constant 1.000000e+00 : f32
      %69 = vector.broadcast %cst_55 : f32 to vector<8x128xf32>
      %70 = arith.addf %69, %68 : vector<8x128xf32>
      %71 = arith.divf %69, %70 : vector<8x128xf32>
      %c0_56 = arith.constant 0 : index
      %c0_57 = arith.constant 0 : index
      %c0_58 = arith.constant 0 : index
      %72 = vector.load %arg11[%c0_56, %c0_57, %c0_58] : memref<2x8x128xf32, #tpu.memory_space<vmem>>, vector<1x8x128xf32>
      %73 = vector.shape_cast %72 : vector<1x8x128xf32> to vector<8x128xf32>
      %74 = arith.mulf %63, %73 : vector<8x128xf32>
      %75 = arith.mulf %57, %65 : vector<8x128xf32>
      %76 = arith.addf %74, %75 : vector<8x128xf32>
      %77 = math.tanh %76 : vector<8x128xf32>
      %78 = arith.mulf %71, %77 : vector<8x128xf32>
      %79 = arith.index_cast %arg14 : i32 to index
      %c0_59 = arith.constant 0 : index
      %c0_60 = arith.constant 0 : index
      %80 = vector.load %arg8[%79, %c0_59, %c0_60] : memref<8x8x128xf32, #tpu.memory_space<vmem>>, vector<1x8x128xf32>
      %81 = vector.shape_cast %80 : vector<1x8x128xf32> to vector<8x128xf32>
      %82 = vector.shape_cast %78 : vector<8x128xf32> to vector<1x8x128xf32>
      tpu.vector_store %arg8[%79, %c0_59, %c0_60], %82 {strides = array<i32>} : memref<8x8x128xf32, #tpu.memory_space<vmem>>, vector<1x8x128xf32>,
      %c0_61 = arith.constant 0 : index
      %c0_62 = arith.constant 0 : index
      %c0_63 = arith.constant 0 : index
      %83 = vector.load %arg10[%c0_61, %c0_62, %c0_63] : memref<2x8x128xf32, #tpu.memory_space<vmem>>, vector<1x8x128xf32>
      %84 = vector.shape_cast %83 : vector<1x8x128xf32> to vector<8x128xf32>
      %85 = vector.shape_cast %78 : vector<8x128xf32> to vector<1x8x128xf32>
      tpu.vector_store %arg10[%c0_61, %c0_62, %c0_63], %85 {strides = array<i32>} : memref<2x8x128xf32, #tpu.memory_space<vmem>>, vector<1x8x128xf32>,
      %c0_64 = arith.constant 0 : index
      %c0_65 = arith.constant 0 : index
      %c0_66 = arith.constant 0 : index
      %86 = vector.load %arg11[%c0_64, %c0_65, %c0_66] : memref<2x8x128xf32, #tpu.memory_space<vmem>>, vector<1x8x128xf32>
      %87 = vector.shape_cast %86 : vector<1x8x128xf32> to vector<8x128xf32>
      %88 = vector.shape_cast %76 : vector<8x128xf32> to vector<1x8x128xf32>
      tpu.vector_store %arg11[%c0_64, %c0_65, %c0_66], %88 {strides = array<i32>} : memref<2x8x128xf32, #tpu.memory_space<vmem>>, vector<1x8x128xf32>,
      %c7_i32 = arith.constant 7 : i32
      %89 = arith.subi %c7_i32, %arg14 : i32
      %90 = arith.index_cast %89 : i32 to index
      %c0_67 = arith.constant 0 : index
      %c0_68 = arith.constant 0 : index
      %91 = vector.load %arg13[%90, %c0_67, %c0_68] : memref<8x8x512xf32, #tpu.memory_space<vmem>>, vector<1x8x512xf32>
      %92 = vector.shape_cast %91 : vector<1x8x512xf32> to vector<8x512xf32>
      %c1_69 = arith.constant 1 : index
      %c0_70 = arith.constant 0 : index
      %c0_71 = arith.constant 0 : index
      %93 = vector.load %arg10[%c1_69, %c0_70, %c0_71] : memref<2x8x128xf32, #tpu.memory_space<vmem>>, vector<1x8x128xf32>
      %94 = vector.shape_cast %93 : vector<1x8x128xf32> to vector<8x128xf32>
      %95 = arith.truncf %94 : vector<8x128xf32> to vector<8x128xbf16>
      %c1_72 = arith.constant 1 : index
      %c0_73 = arith.constant 0 : index
      %c0_74 = arith.constant 0 : index
      %96 = vector.load %arg6[%c1_72, %c0_73, %c0_74] : memref<2x128x512xbf16, #tpu.memory_space<vmem>>, vector<1x128x512xbf16>
      %97 = vector.shape_cast %96 : vector<1x128x512xbf16> to vector<128x512xbf16>
      %cst_75 = arith.constant dense<0.000000e+00> : vector<8x512xf32>
      %98 = tpu.matmul %95, %97, %cst_75 {dimension_numbers = #tpu.dot_dimension_numbers<[1], [0], [0], [1], [0, 0, 1, 1], [], []>} : vector<8x128xbf16>, vector<128x512xbf16>, vector<8x512xf32> -> vector<8x512xf32>
      %99 = arith.addf %92, %98 : vector<8x512xf32>
      %100 = vector.extract_strided_slice %99 {offsets = [0, 0], sizes = [8, 128], strides = [1, 1]} : vector<8x512xf32> to vector<8x128xf32>
      %101 = arith.negf %100 : vector<8x128xf32>
      %102 = math.exp %101 : vector<8x128xf32>
      %cst_76 = arith.constant 1.000000e+00 : f32
      %103 = vector.broadcast %cst_76 : f32 to vector<8x128xf32>
      %104 = arith.addf %103, %102 : vector<8x128xf32>
      %105 = arith.divf %103, %104 : vector<8x128xf32>
      %106 = vector.extract_strided_slice %99 {offsets = [0, 128], sizes = [8, 128], strides = [1, 1]} : vector<8x512xf32> to vector<8x128xf32>
      %107 = arith.negf %106 : vector<8x128xf32>
      %108 = math.exp %107 : vector<8x128xf32>
      %cst_77 = arith.constant 1.000000e+00 : f32
      %109 = vector.broadcast %cst_77 : f32 to vector<8x128xf32>
      %110 = arith.addf %109, %108 : vector<8x128xf32>
      %111 = arith.divf %109, %110 : vector<8x128xf32>
      %112 = vector.extract_strided_slice %99 {offsets = [0, 256], sizes = [8, 128], strides = [1, 1]} : vector<8x512xf32> to vector<8x128xf32>
      %113 = math.tanh %112 : vector<8x128xf32>
      %114 = vector.extract_strided_slice %99 {offsets = [0, 384], sizes = [8, 128], strides = [1, 1]} : vector<8x512xf32> to vector<8x128xf32>
      %115 = arith.negf %114 : vector<8x128xf32>
      %116 = math.exp %115 : vector<8x128xf32>
      %cst_78 = arith.constant 1.000000e+00 : f32
      %117 = vector.broadcast %cst_78 : f32 to vector<8x128xf32>
      %118 = arith.addf %117, %116 : vector<8x128xf32>
      %119 = arith.divf %117, %118 : vector<8x128xf32>
      %c1_79 = arith.constant 1 : index
      %c0_80 = arith.constant 0 : index
      %c0_81 = arith.constant 0 : index
      %120 = vector.load %arg11[%c1_79, %c0_80, %c0_81] : memref<2x8x128xf32, #tpu.memory_space<vmem>>, vector<1x8x128xf32>
      %121 = vector.shape_cast %120 : vector<1x8x128xf32> to vector<8x128xf32>
      %122 = arith.mulf %111, %121 : vector<8x128xf32>
      %123 = arith.mulf %105, %113 : vector<8x128xf32>
      %124 = arith.addf %122, %123 : vector<8x128xf32>
      %125 = math.tanh %124 : vector<8x128xf32>
      %126 = arith.mulf %119, %125 : vector<8x128xf32>
      %127 = arith.index_cast %89 : i32 to index
      %c0_82 = arith.constant 0 : index
      %c0_83 = arith.constant 0 : index
      %128 = vector.load %arg9[%127, %c0_82, %c0_83] : memref<8x8x128xf32, #tpu.memory_space<vmem>>, vector<1x8x128xf32>
      %129 = vector.shape_cast %128 : vector<1x8x128xf32> to vector<8x128xf32>
      %130 = vector.shape_cast %126 : vector<8x128xf32> to vector<1x8x128xf32>
      tpu.vector_store %arg9[%127, %c0_82, %c0_83], %130 {strides = array<i32>} : memref<8x8x128xf32, #tpu.memory_space<vmem>>, vector<1x8x128xf32>,
      %c1_84 = arith.constant 1 : index
      %c0_85 = arith.constant 0 : index
      %c0_86 = arith.constant 0 : index
      %131 = vector.load %arg10[%c1_84, %c0_85, %c0_86] : memref<2x8x128xf32, #tpu.memory_space<vmem>>, vector<1x8x128xf32>
      %132 = vector.shape_cast %131 : vector<1x8x128xf32> to vector<8x128xf32>
      %133 = vector.shape_cast %126 : vector<8x128xf32> to vector<1x8x128xf32>
      tpu.vector_store %arg10[%c1_84, %c0_85, %c0_86], %133 {strides = array<i32>} : memref<2x8x128xf32, #tpu.memory_space<vmem>>, vector<1x8x128xf32>,
      %c1_87 = arith.constant 1 : index
      %c0_88 = arith.constant 0 : index
      %c0_89 = arith.constant 0 : index
      %134 = vector.load %arg11[%c1_87, %c0_88, %c0_89] : memref<2x8x128xf32, #tpu.memory_space<vmem>>, vector<1x8x128xf32>
      %135 = vector.shape_cast %134 : vector<1x8x128xf32> to vector<8x128xf32>
      %136 = vector.shape_cast %124 : vector<8x128xf32> to vector<1x8x128xf32>
      tpu.vector_store %arg11[%c1_87, %c0_88, %c0_89], %136 {strides = array<i32>} : memref<2x8x128xf32, #tpu.memory_space<vmem>>, vector<1x8x128xf32>,
    }
    %c8_i32_43 = arith.constant 8 : i32
    return
  }
  func.func @transform_0(%arg0: i32) -> (i32, i32, i32) {
    %c0_i32 = arith.constant 0 : i32
    %c0_i32_0 = arith.constant 0 : i32
    %c0_i32_1 = arith.constant 0 : i32
    return %arg0, %c0_i32, %c0_i32_0 : i32, i32, i32
  }
  func.func @transform_1(%arg0: i32) -> (i32, i32, i32) {
    %c0_i32 = arith.constant 0 : i32
    %c0_i32_0 = arith.constant 0 : i32
    %c0_i32_1 = arith.constant 0 : i32
    return %arg0, %c0_i32, %c0_i32_0 : i32, i32, i32
  }
  func.func @transform_2(%arg0: i32) -> (i32, i32, i32) {
    %c0_i32 = arith.constant 0 : i32
    %0 = arith.subi %c0_i32, %arg0 : i32
    %c0_i32_0 = arith.constant 0 : i32
    %c0_i32_1 = arith.constant 0 : i32
    %c0_i32_2 = arith.constant 0 : i32
    return %0, %c0_i32_0, %c0_i32_1 : i32, i32, i32
  }
  func.func @transform_3(%arg0: i32) -> (i32, i32, i32) {
    %c0_i32 = arith.constant 0 : i32
    %0 = arith.subi %c0_i32, %arg0 : i32
    %c0_i32_0 = arith.constant 0 : i32
    %c0_i32_1 = arith.constant 0 : i32
    %c0_i32_2 = arith.constant 0 : i32
    return %0, %c0_i32_0, %c0_i32_1 : i32, i32, i32
  }
  func.func @transform_4(%arg0: i32) -> (i32, i32, i32, i32) {
    %c0_i32 = arith.constant 0 : i32
    %c0_i32_0 = arith.constant 0 : i32
    %c0_i32_1 = arith.constant 0 : i32
    %c0_i32_2 = arith.constant 0 : i32
    %c0_i32_3 = arith.constant 0 : i32
    return %c0_i32, %c0_i32_0, %c0_i32_1, %c0_i32_2 : i32, i32, i32, i32
  }
  func.func @transform_5(%arg0: i32) -> (i32, i32, i32) {
    %c0_i32 = arith.constant 0 : i32
    %c0_i32_0 = arith.constant 0 : i32
    %c0_i32_1 = arith.constant 0 : i32
    %c0_i32_2 = arith.constant 0 : i32
    return %c0_i32, %c0_i32_0, %c0_i32_1 : i32, i32, i32
  }
  func.func @transform_6(%arg0: i32) -> (i32, i32, i32) {
    %c0_i32 = arith.constant 0 : i32
    %c0_i32_0 = arith.constant 0 : i32
    %c0_i32_1 = arith.constant 0 : i32
    %c0_i32_2 = arith.constant 0 : i32
    return %c0_i32, %c0_i32_0, %c0_i32_1 : i32, i32, i32
  }
  func.func @transform_7(%arg0: i32) -> (i32, i32, i32) {
    %c0_i32 = arith.constant 0 : i32
    %c0_i32_0 = arith.constant 0 : i32
    %c0_i32_1 = arith.constant 0 : i32
    return %arg0, %c0_i32, %c0_i32_0 : i32, i32, i32
  }
  func.func @transform_8(%arg0: i32) -> (i32, i32, i32) {
    %c0_i32 = arith.constant 0 : i32
    %0 = arith.subi %c0_i32, %arg0 : i32
    %c0_i32_0 = arith.constant 0 : i32
    %c0_i32_1 = arith.constant 0 : i32
    %c0_i32_2 = arith.constant 0 : i32
    return %0, %c0_i32_0, %c0_i32_1 : i32, i32, i32
  }
  func.func @transform_9(%arg0: i32) -> (i32, i32, i32) {
    %c0_i32 = arith.constant 0 : i32
    %c0_i32_0 = arith.constant 0 : i32
    %c0_i32_1 = arith.constant 0 : i32
    %c0_i32_2 = arith.constant 0 : i32
    return %c0_i32, %c0_i32_0, %c0_i32_1 : i32, i32, i32
  }
  func.func @transform_10(%arg0: i32) -> (i32, i32, i32) {
    %c0_i32 = arith.constant 0 : i32
    %c0_i32_0 = arith.constant 0 : i32
    %c0_i32_1 = arith.constant 0 : i32
    %c0_i32_2 = arith.constant 0 : i32
    return %c0_i32, %c0_i32_0, %c0_i32_1 : i32, i32, i32
  }
}

module attributes {stable_mosaic.version = 11 : i64} {
  func.func @_linear_kernel(%arg0: i32, %arg1: memref<8x8x128xf32, #tpu.memory_space<vmem>>, %arg2: memref<8x8x128xf32, #tpu.memory_space<vmem>>, %arg3: memref<2x128x128xbf16, #tpu.memory_space<vmem>>, %arg4: memref<1x128xf32, #tpu.memory_space<vmem>>, %arg5: memref<8x8x128xf32, #tpu.memory_space<vmem>>) attributes {dimension_semantics = [#tpu.dimension_semantics<parallel>], iteration_bounds = array<i64: 1>, scalar_prefetch = 0 : i64, scratch_operands = 0 : i64, tpu.core_type = #tpu.core_type<tc>, window_params = [{transform_indices = @transform_0, window_bounds = array<i64: 8, 8, 128>}, {transform_indices = @transform_1, window_bounds = array<i64: 8, 8, 128>}, {pipeline_mode = #tpu.pipeline_mode<synchronous>, transform_indices = @transform_2, window_bounds = array<i64: 2, 128, 128>}, {pipeline_mode = #tpu.pipeline_mode<synchronous>, transform_indices = @transform_3, window_bounds = array<i64: 1, 128>}, {transform_indices = @transform_4, window_bounds = array<i64: 8, 8, 128>}]} {
    %c0 = arith.constant 0 : index
    %c0_0 = arith.constant 0 : index
    %c0_1 = arith.constant 0 : index
    %0 = vector.load %arg1[%c0, %c0_0, %c0_1] : memref<8x8x128xf32, #tpu.memory_space<vmem>>, vector<8x8x128xf32>
    %1 = vector.shape_cast %0 : vector<8x8x128xf32> to vector<64x128xf32>
    %2 = arith.truncf %1 : vector<64x128xf32> to vector<64x128xbf16>
    %c0_2 = arith.constant 0 : index
    %c0_3 = arith.constant 0 : index
    %c0_4 = arith.constant 0 : index
    %3 = vector.load %arg2[%c0_2, %c0_3, %c0_4] : memref<8x8x128xf32, #tpu.memory_space<vmem>>, vector<8x8x128xf32>
    %4 = vector.shape_cast %3 : vector<8x8x128xf32> to vector<64x128xf32>
    %5 = arith.truncf %4 : vector<64x128xf32> to vector<64x128xbf16>
    %c0_5 = arith.constant 0 : index
    %c0_6 = arith.constant 0 : index
    %c0_7 = arith.constant 0 : index
    %6 = vector.load %arg3[%c0_5, %c0_6, %c0_7] : memref<2x128x128xbf16, #tpu.memory_space<vmem>>, vector<1x128x128xbf16>
    %7 = vector.shape_cast %6 : vector<1x128x128xbf16> to vector<128x128xbf16>
    %cst = arith.constant dense<0.000000e+00> : vector<64x128xf32>
    %8 = tpu.matmul %2, %7, %cst {dimension_numbers = #tpu.dot_dimension_numbers<[1], [0], [0], [1], [0, 0, 1, 1], [], []>} : vector<64x128xbf16>, vector<128x128xbf16>, vector<64x128xf32> -> vector<64x128xf32>
    %c1 = arith.constant 1 : index
    %c0_8 = arith.constant 0 : index
    %c0_9 = arith.constant 0 : index
    %9 = vector.load %arg3[%c1, %c0_8, %c0_9] : memref<2x128x128xbf16, #tpu.memory_space<vmem>>, vector<1x128x128xbf16>
    %10 = vector.shape_cast %9 : vector<1x128x128xbf16> to vector<128x128xbf16>
    %cst_10 = arith.constant dense<0.000000e+00> : vector<64x128xf32>
    %11 = tpu.matmul %5, %10, %cst_10 {dimension_numbers = #tpu.dot_dimension_numbers<[1], [0], [0], [1], [0, 0, 1, 1], [], []>} : vector<64x128xbf16>, vector<128x128xbf16>, vector<64x128xf32> -> vector<64x128xf32>
    %12 = arith.addf %8, %11 : vector<64x128xf32>
    %c0_11 = arith.constant 0 : index
    %c0_12 = arith.constant 0 : index
    %13 = vector.load %arg4[%c0_11, %c0_12] : memref<1x128xf32, #tpu.memory_space<vmem>>, vector<1x128xf32>
    %14 = vector.broadcast %13 : vector<1x128xf32> to vector<64x128xf32>
    %15 = arith.addf %12, %14 : vector<64x128xf32>
    %16 = vector.shape_cast %15 : vector<64x128xf32> to vector<8x8x128xf32>
    %c0_13 = arith.constant 0 : index
    %c0_14 = arith.constant 0 : index
    %c0_15 = arith.constant 0 : index
    %17 = vector.load %arg5[%c0_13, %c0_14, %c0_15] : memref<8x8x128xf32, #tpu.memory_space<vmem>>, vector<8x8x128xf32>
    tpu.vector_store %arg5[%c0_13, %c0_14, %c0_15], %16 {strides = array<i32>} : memref<8x8x128xf32, #tpu.memory_space<vmem>>, vector<8x8x128xf32>,
    return
  }
  func.func @transform_0(%arg0: i32) -> (i32, i32, i32) {
    %c0_i32 = arith.constant 0 : i32
    %c0_i32_0 = arith.constant 0 : i32
    %c0_i32_1 = arith.constant 0 : i32
    return %arg0, %c0_i32, %c0_i32_0 : i32, i32, i32
  }
  func.func @transform_1(%arg0: i32) -> (i32, i32, i32) {
    %c0_i32 = arith.constant 0 : i32
    %c0_i32_0 = arith.constant 0 : i32
    %c0_i32_1 = arith.constant 0 : i32
    return %arg0, %c0_i32, %c0_i32_0 : i32, i32, i32
  }
  func.func @transform_2(%arg0: i32) -> (i32, i32, i32) {
    %c0_i32 = arith.constant 0 : i32
    %c0_i32_0 = arith.constant 0 : i32
    %c0_i32_1 = arith.constant 0 : i32
    %c0_i32_2 = arith.constant 0 : i32
    return %c0_i32, %c0_i32_0, %c0_i32_1 : i32, i32, i32
  }
  func.func @transform_3(%arg0: i32) -> (i32, i32) {
    %c0_i32 = arith.constant 0 : i32
    %c0_i32_0 = arith.constant 0 : i32
    %c0_i32_1 = arith.constant 0 : i32
    return %c0_i32, %c0_i32_0 : i32, i32
  }
  func.func @transform_4(%arg0: i32) -> (i32, i32, i32) {
    %c0_i32 = arith.constant 0 : i32
    %c0_i32_0 = arith.constant 0 : i32
    %c0_i32_1 = arith.constant 0 : i32
    return %arg0, %c0_i32, %c0_i32_0 : i32, i32, i32
  }
}

</mosaic_0001>

<bundles_post_ra>
// kernel: blstm_forward.5
= control target key start
LH: loop header
LB: loop body
LE: loop exit
PB: predicated region body
PF: predicated region fallthrough
CT: control target
= control target key end

     0   :  { %s597_s2 = inlined_call_operand.vmem [shape: bf16[2,128,128], index: 2, kind: input, shape index: {}]   ;;  %s598_s1 = inlined_call_operand.vmem [shape: f32[8,8,128], index: 1, kind: input, shape index: {}]   ;;  %s599_s0 = inlined_call_operand.vmem [shape: f32[8,8,128], index: 0, kind: input, shape index: {}]   ;;  %s600_s3 = inlined_call_operand.vmem [shape: f32[1,128], index: 3, kind: input, shape index: {}]   ;;  %s601_s4 = inlined_call_operand.vmem [shape: f32[8,8,128], index: 4, kind: output, shape index: {}]  }
   0x1   :  { %v433_v0 = vld [vmem:[%s597_s2 + $0x78] sm:$0xff]   ;;  %v435_v2 = vld [vmem:[%s597_s2 + $0x70] sm:$0xff]   ;;  %v437_v4 = vld [vmem:[%s597_s2 + $0x68] sm:$0xff]  }
   0x2   :  { %v434_v1 = vld [vmem:[%s597_s2 + $0x38] sm:$0xff]   ;;  %385 = vmatprep.subr.bf16.mxu0 %v433_v0  ;;  %v436_v3 = vld [vmem:[%s597_s2 + $0x30] sm:$0xff]   ;;  %v438_v5 = vld [vmem:[%s597_s2 + $0x28] sm:$0xff]  }
   0x3   :  { %409 = vmatprep.subr.bf16.mxu1 %v434_v1  ;;  %386 = vmatpush3.bf16.msra.mxu0 %v433_v0  ;;  %v439_v6 = vld [vmem:[%s597_s2 + $0x60] sm:$0xff]   ;;  %v441_v8 = vld [vmem:[%s597_s2 + $0x58] sm:$0xff]   ;;  %v443_v10 = vld [vmem:[%s597_s2 + $0x50] sm:$0xff]  }
   0x4   :  { %410 = vmatpush3.bf16.msra.mxu1 %v434_v1  ;;  %387 = vmatprep.subr.bf16.mxu0 %v435_v2  ;;  %v440_v7 = vld [vmem:[%s597_s2 + $0x20] sm:$0xff]   ;;  %v442_v9 = vld [vmem:[%s597_s2 + $0x18] sm:$0xff]   ;;  %v31_v12 = vld [vmem:[%s598_s1 + $0x8] sm:$0xff] }
   0x5   :  { %411 = vmatprep.subr.bf16.mxu1 %v436_v3  ;;  %v30_v11 = vld [vmem:[%s598_s1] sm:$0xff]  ;;  %v444_v14 = vld [vmem:[%s597_s2 + $0x10] sm:$0xff]   ;;  %v19_v16 = vld [vmem:[%s599_s0 + $0x8] sm:$0xff] }
   0x6   :  { %v18_v13 = vld [vmem:[%s599_s0] sm:$0xff]  ;;  %v38_v15 = vpack.c.bf16 %v31_v12, %v30_v11  ;;  %v445_v18 = vld [vmem:[%s597_s2 + $0x48] sm:$0xff]   ;;  %v32_v22 = vld [vmem:[%s598_s1 + $0x10] sm:$0xff] }
   0x7   :  { %388 = vmatpush3.bf16.msra.mxu0 %v435_v2  ;;  %v26_v17 = vpack.c.bf16 %v19_v16, %v18_v13  ;;  %v446_v19 = vld [vmem:[%s597_s2 + $0x8] sm:$0xff]   ;;  %v447_v20 = vld [vmem:[%s597_s2 + $0x40] sm:$0xff]   ;;  %v33_v23 = vld [vmem:[%s598_s1 + $0x18] sm:$0xff] }
   0x8   :  { %412 = vmatpush3.bf16.msra.mxu1 %v436_v3  ;;  %389 = vmatprep.subr.bf16.mxu0 %v437_v4  ;;  %v448_v21 = vld [vmem:[%s597_s2] sm:$0xff]   ;;  %v20_v24 = vld [vmem:[%s599_s0 + $0x10] sm:$0xff]  ;;  %v21_v25 = vld [vmem:[%s599_s0 + $0x18] sm:$0xff]  ;;  %v39_v30 = vpack.c.bf16 %v33_v23, %v32_v22 }
   0x9   :  { %413 = vmatprep.subr.bf16.mxu1 %v438_v5  ;;  %401 = vmatprep.mubr.bf16.mxu0 %v38_v15  ;;  %v34_v26 = vld [vmem:[%s598_s1 + $0x20] sm:$0xff]  ;;  %v35_v27 = vld [vmem:[%s598_s1 + $0x28] sm:$0xff]  ;;  %v27_v31 = vpack.c.bf16 %v21_v25, %v20_v24  ;;  %v36_v34 = vld [vmem:[%s598_s1 + $0x30] sm:$0xff] }
   0xa   :  { %425 = vmatprep.mubr.bf16.mxu1 %v26_v17  ;;  %v22_v28 = vld [vmem:[%s599_s0 + $0x20] sm:$0xff]  ;;  %v23_v29 = vld [vmem:[%s599_s0 + $0x28] sm:$0xff]  ;;  %v40_v32 = vpack.c.bf16 %v35_v27, %v34_v26  ;;  %v37_v35 = vld [vmem:[%s598_s1 + $0x38] sm:$0xff] }
   0xb   :  { %390 = vmatpush3.bf16.msra.mxu0 %v437_v4  ;;  %v28_v33 = vpack.c.bf16 %v23_v29, %v22_v28  ;;  %v24_v36 = vld [vmem:[%s599_s0 + $0x30] sm:$0xff]  ;;  %v25_v37 = vld [vmem:[%s599_s0 + $0x38] sm:$0xff]  ;;  %v41_v38 = vpack.c.bf16 %v37_v35, %v36_v34  ;;  %v360_v42 = vld [vmem:[%s600_s3] ss:$0 sm:$0xff] }
   0xc   :  { %414 = vmatpush3.bf16.msra.mxu1 %v438_v5  ;;  %391 = vmatprep.subr.bf16.mxu0 %v439_v6  ;;  %v29_v39 = vpack.c.bf16 %v25_v37, %v24_v36 }
   0xd   :  { %415 = vmatprep.subr.bf16.mxu1 %v440_v7 }
   0xf   :  { %392 = vmatpush3.bf16.msra.mxu0 %v439_v6 }
  0x10   :  { %416 = vmatpush3.bf16.msra.mxu1 %v440_v7  ;;  %393 = vmatprep.subr.bf16.mxu0 %v441_v8 }
  0x11   :  { %417 = vmatprep.subr.bf16.mxu1 %v442_v9 }
  0x13   :  { %394 = vmatpush3.bf16.msra.mxu0 %v441_v8 }
  0x14   :  { %418 = vmatpush3.bf16.msra.mxu1 %v442_v9  ;;  %395 = vmatprep.subr.bf16.mxu0 %v443_v10 }
  0x15   :  { %419 = vmatprep.subr.bf16.mxu1 %v444_v14 }
  0x17   :  { %396 = vmatpush3.bf16.msra.mxu0 %v443_v10 }
  0x18   :  { %420 = vmatpush3.bf16.msra.mxu1 %v444_v14  ;;  %397 = vmatprep.subr.bf16.mxu0 %v445_v18 }
  0x19   :  { %421 = vmatprep.subr.bf16.mxu1 %v446_v19 }
  0x1b   :  { %398 = vmatpush3.bf16.msra.mxu0 %v445_v18 }
  0x1c   :  { %422 = vmatpush3.bf16.msra.mxu1 %v446_v19  ;;  %399 = vmatprep.subr.bf16.mxu0 %v447_v20 }
  0x1d   :  { %423 = vmatprep.subr.bf16.mxu1 %v448_v21 }
  0x1f   :  { %400 = vmatpush3.bf16.msra.mxu0 %v447_v20 }
  0x20   :  { %424 = vmatpush3.bf16.msra.mxu1 %v448_v21 }
  0x22   :  { %402 = vmatmul.mubr.bf16.vlgmr.msra.gmra.mxu0 %v39_v30 }
  0x23   :  { %426 = vmatmul.mubr.bf16.vlgmr.msra.gmra.mxu1 %v27_v31  ;;  %405 = vmatprep.mubr.bf16.mxu0 %v40_v32 }
  0x24   :  { %429 = vmatprep.mubr.bf16.mxu1 %v28_v33 }
  0x2a   :  { %406 = vmatmul.mubr.bf16.gmra.mxu0 %v41_v38 }
  0x2b   :  { %430 = vmatmul.mubr.bf16.gmra.mxu1 %v29_v39 }
  0xe2   :  { %v403_v40 = vpop.f32.mrf.mxu0 }
  0xe3   :  { %v427_v41 = vpop.f32.mrf.mxu1 }
  0xe4   :  { %v279_v43 = vadd.f32 %v427_v41, %v403_v40  ;;  %v157_v44 = vpop.f32.mrf.mxu0 }
  0xe5   :  { %v270_v45 = vpop.f32.mrf.mxu1 }
  0xe6   :  { %v310_v46 = vadd.f32 %v360_v42, %v279_v43  ;;  %v271_v47 = vadd.f32 %v270_v45, %v157_v44  ;;  %v404_v48 = vpop.f32.mrf.mxu0 }
  0xe7   :  { %v428_v49 = vpop.f32.mrf.mxu1 }
  0xe8   :  { %318 = vst [vmem:[%s601_s4 + $0x10] sm:$0xff] %v310_v46  ;;  %v308_v50 = vadd.f32 %v360_v42, %v271_v47  ;;  %v282_v51 = vadd.f32 %v428_v49, %v404_v48  ;;  %v160_v52 = vpop.f32.mrf.mxu0 }
  0xe9   :  { %v273_v53 = vpop.f32.mrf.mxu1 }
  0xea   :  { %316 = vst [vmem:[%s601_s4] sm:$0xff] %v308_v50  ;;  %v311_v54 = vadd.f32 %v360_v42, %v282_v51  ;;  %v274_v55 = vadd.f32 %v273_v53, %v160_v52  ;;  %v407_v56 = vpop.f32.mrf.mxu0 }
  0xeb   :  { %v431_v57 = vpop.f32.mrf.mxu1 }
  0xec   :  { %319 = vst [vmem:[%s601_s4 + $0x18] sm:$0xff] %v311_v54  ;;  %v309_v58 = vadd.f32 %v360_v42, %v274_v55  ;;  %v295_v59 = vadd.f32 %v431_v57, %v407_v56  ;;  %v173_v60 = vpop.f32.mrf.mxu0 }
  0xed   :  { %v286_v61 = vpop.f32.mrf.mxu1 }
  0xee   :  { %317 = vst [vmem:[%s601_s4 + $0x8] sm:$0xff] %v309_v58  ;;  %v314_v62 = vadd.f32 %v360_v42, %v295_v59  ;;  %v287_v63 = vadd.f32 %v286_v61, %v173_v60  ;;  %v408_v0 = vpop.f32.mrf.mxu0 }
  0xef   :  { %v432_v1 = vpop.f32.mrf.mxu1 }
  0xf0   :  { %322 = vst [vmem:[%s601_s4 + $0x30] sm:$0xff] %v314_v62  ;;  %v312_v2 = vadd.f32 %v360_v42, %v287_v63  ;;  %v298_v3 = vadd.f32 %v432_v1, %v408_v0  ;;  %v176_v4 = vpop.f32.mrf.mxu0 }
  0xf1   :  { %v289_v5 = vpop.f32.mrf.mxu1 }
  0xf2   :  { %320 = vst [vmem:[%s601_s4 + $0x20] sm:$0xff] %v312_v2  ;;  %v315_v6 = vadd.f32 %v360_v42, %v298_v3  ;;  %v290_v7 = vadd.f32 %v289_v5, %v176_v4 }
  0xf4   :  { %323 = vst [vmem:[%s601_s4 + $0x38] sm:$0xff] %v315_v6  ;;  %v313_v8 = vadd.f32 %v360_v42, %v290_v7 }
  0xf6   :  { %321 = vst [vmem:[%s601_s4 + $0x28] sm:$0xff] %v313_v8 }

// kernel: blstm_forward.3
= control target key start
LH: loop header
LB: loop body
LE: loop exit
PB: predicated region body
PF: predicated region fallthrough
CT: control target
= control target key end

     0   :  { %14 = vsyncpa [#allocation5], 0  ;;  %s2374_s0 = inlined_call_operand.vmem [shape: f32[8,8,128], index: 0, kind: input, shape index: {}, may-alias: {0,1}]   ;;  %s2375_s1 = inlined_call_operand.vmem [shape: f32[8,8,128], index: 1, kind: input, shape index: {}, may-alias: {0,1}]   ;;  %s2376_s2 = inlined_call_operand.hbm [shape: bf16[2,128,512], index: 2, kind: input, shape index: {}]   ;;  %s2377_s3 = inlined_call_operand.hbm [shape: bf16[2,128,512], index: 3, kind: input, shape index: {}]   ;;  %s2378_s4 = inlined_call_operand.hbm [shape: f32[2,1,512], index: 4, kind: input, shape index: {}]   ;;  %s2379_s5 = inlined_call_operand.vmem [shape: f32[8,8,128], index: 5, kind: output, shape index: {0}]   ;;  %s2380_s6 = inlined_call_operand.vmem [shape: f32[8,8,128], index: 6, kind: output, shape index: {1}]   ;;  %s2381_s7 = inlined_call_operand.vmem [shape: f32[2,8,128], index: 7, kind: output, shape index: {2}]   ;;  %s2382_s8 = inlined_call_operand.vmem [shape: f32[2,8,128], index: 8, kind: output, shape index: {3}]  }
   0x1   :  { %15 = vsyncpa [#allocation7], 0  ;;  %s2083_s27 = smov [#allocation6]   ;;  %s2084_s29 = smov [#allocation4]  }
   0x2   :  { %s45_s28 = sshll.u32 %s2083_s27, 4  ;;  %s33_s30 = sshll.u32 %s2084_s29, 4  ;;  %s46_s28 = int_to_ptr.vmem [resolvable:$true] %s45_s28  ;;  %s34_s30 = int_to_ptr.vmem [resolvable:$true] %s33_s30 }
   0x3   :  { %s2019_s9 = scalar_lea.vmem %s46_s28, 8192  ;;  %p2024_p1 = scmp.lt.s32.totalorder %s46_s28, %s46_s28 }
   0x4   :  { %p2020_p0 = scmp.ne.s32.totalorder %s46_s28, %s2019_s9  ;;  %p2025_p2 = scmp.lt.s32.totalorder %s2019_s9, %s2019_s9 }
   0x6   :  { %p2026_p3 = por %p2025_p2, %p2024_p1 }
   0x8   :  { %p2027_p4 = pnand %p2026_p3, %p2020_p0 }
   0xa   :  { %2030 = shalt.err (!%p2027_p4)
}
   0xb   :  { %s2085_s10 = smov 256   ;;  %s2086_s11 = smov 16  }
   0xc   :  { %51 = dma.hbm_to_vmem [thread:$0]  %s2377_s3, 8192, %s46_s28, [#allocation7], %s2085_s10, %s2085_s10, %s2086_s11  }
   0xd   :  { %s2039_s14 = scalar_lea.vmem %s34_s30, 8192  ;;  %p2044_p6 = scmp.lt.s32.totalorder %s34_s30, %s34_s30 }
   0xe   :  { %p2040_p5 = scmp.ne.s32.totalorder %s34_s30, %s2039_s14  ;;  %p2045_p7 = scmp.lt.s32.totalorder %s2039_s14, %s2039_s14 }
  0x10   :  { %p2046_p8 = por %p2045_p7, %p2044_p6 }
  0x12   :  { %p2047_p9 = pnand %p2046_p8, %p2040_p5 }
  0x14   :  { %2050 = shalt.err (!%p2047_p9)
}
  0x15   :  { %39 = dma.hbm_to_vmem [thread:$0]  %s2376_s2, 8192, %s34_s30, [#allocation5], %s2085_s10, %s2085_s10, %s2086_s11  }
  0x16   :  { %s2087_s17 = smov [#allocation8]  }
  0x17   :  { %s57_s18 = sshll.u32 %s2087_s17, 4  ;;  %s58_s18 = int_to_ptr.vmem [resolvable:$true] %s57_s18 }
  0x18   :  { %s2059_s19 = scalar_lea.vmem %s58_s18, 128  ;;  %p2064_p11 = scmp.lt.s32.totalorder %s58_s18, %s58_s18 }
  0x19   :  { %p2060_p10 = scmp.ne.s32.totalorder %s58_s18, %s2059_s19  ;;  %p2065_p12 = scmp.lt.s32.totalorder %s2059_s19, %s2059_s19 }
  0x1b   :  { %p2066_p13 = por %p2065_p12, %p2064_p11 }
  0x1d   :  { %p2067_p0 = pnand %p2066_p13, %p2060_p10 }
  0x1f   :  { %2070 = shalt.err (!%p2067_p0)
}
  0x20   :  { %s2088_s3 = smov 64   ;;  %s2089_s20 = smov 4  }
  0x21   :  { %63 = dma.hbm_to_vmem [thread:$0]  %s2378_s4, 128, %s58_s18, [#allocation7], %s2088_s3, %s2088_s3, %s2089_s20  }
  0x22   :  { %2075 = dma.done.wait [#allocation5], 8192  }
  0x23   :  { %2076 = vsyncadd [#allocation5], 4294959104 }
  0x24   :  { %2077 = dma.done.wait [#allocation7], 8320  }
  0x25   :  { %2078 = vsyncadd [#allocation7], 4294958976  ;;  %v2090_v0 = vmov 0.0   ;;  %v2091_v1 = vmov 0   ;;  %v1787_v2 = vld [vmem:[#allocation4 + $0xe4] ss:$16 sps:$4 sm:$0xff]  }
  0x26   :  { %106 = vst [vmem:[%s2381_s7] sm:$0xff] %v2090_v0  ;;  %107 = vst [vmem:[%s2381_s7 + $0x8] sm:$0xff] %v2090_v0  ;;  %368 = vmatprep.mubr.bf16.mxu0 %v2091_v1  ;;  %441 = vmatprep.mubr.bf16.mxu1 %v2091_v1  ;;  %v1789_v3 = vld [vmem:[#allocation4 + $0xec] ss:$16 sps:$4 sm:$0xff]   ;;  %v1791_v4 = vld [vmem:[#allocation4 + $0xe0] ss:$16 sps:$4 sm:$0xff]  }
  0x27   :  { %108 = vst [vmem:[%s2382_s8] sm:$0xff] %v2090_v0  ;;  %109 = vst [vmem:[%s2382_s8 + $0x8] sm:$0xff] %v2090_v0  ;;  %336 = vmatprep.subr.bf16.mxu0 %v1787_v2  ;;  %v1792_v5 = vld [vmem:[#allocation4 + $0xe8] ss:$16 sps:$4 sm:$0xff]   ;;  %409 = vmatprep.subr.bf16.mxu1 %v1789_v3  ;;  %v1793_v6 = vld [vmem:[#allocation4 + $0xc4] ss:$16 sps:$4 sm:$0xff]  }
  0x28   :  { %337 = vmatpush1.bf16.msra.mxu0 %v1791_v4  ;;  %410 = vmatpush1.bf16.msra.mxu1 %v1792_v5  ;;  %v1795_v7 = vld [vmem:[#allocation4 + $0xcc] ss:$16 sps:$4 sm:$0xff]   ;;  %v1797_v8 = vld [vmem:[#allocation4 + $0xc0] ss:$16 sps:$4 sm:$0xff]   ;;  %v1798_v9 = vld [vmem:[#allocation4 + $0xc8] ss:$16 sps:$4 sm:$0xff]  }
  0x29   :  { %338 = vmatprep.subr.bf16.mxu0 %v1793_v6  ;;  %411 = vmatprep.subr.bf16.mxu1 %v1795_v7  ;;  %v1799_v10 = vld [vmem:[#allocation4 + $0xa4] ss:$16 sps:$4 sm:$0xff]   ;;  %v1801_v11 = vld [vmem:[#allocation4 + $0xac] ss:$16 sps:$4 sm:$0xff]   ;;  %v1803_v12 = vld [vmem:[#allocation4 + $0xa0] ss:$16 sps:$4 sm:$0xff]  }
  0x2a   :  { %v1804_v13 = vld [vmem:[#allocation4 + $0xa8] ss:$16 sps:$4 sm:$0xff]   ;;  %v1805_v14 = vld [vmem:[#allocation4 + $0x84] ss:$16 sps:$4 sm:$0xff]   ;;  %v1807_v15 = vld [vmem:[#allocation4 + $0x8c] ss:$16 sps:$4 sm:$0xff]  }
  0x2b   :  { %v1809_v16 = vld [vmem:[#allocation4 + $0x80] ss:$16 sps:$4 sm:$0xff]   ;;  %v1810_v17 = vld [vmem:[#allocation4 + $0x88] ss:$16 sps:$4 sm:$0xff]   ;;  %v1811_v18 = vld [vmem:[#allocation4 + $0x64] ss:$16 sps:$4 sm:$0xff]  }
  0x2c   :  { %339 = vmatpush1.bf16.msra.mxu0 %v1797_v8  ;;  %412 = vmatpush1.bf16.msra.mxu1 %v1798_v9  ;;  %v1813_v19 = vld [vmem:[#allocation4 + $0x6c] ss:$16 sps:$4 sm:$0xff]   ;;  %v1815_v20 = vld [vmem:[#allocation4 + $0x60] ss:$16 sps:$4 sm:$0xff]   ;;  %v1816_v21 = vld [vmem:[#allocation4 + $0x68] ss:$16 sps:$4 sm:$0xff]  }
  0x2d   :  { %340 = vmatprep.subr.bf16.mxu0 %v1799_v10  ;;  %413 = vmatprep.subr.bf16.mxu1 %v1801_v11  ;;  %v1817_v22 = vld [vmem:[#allocation4 + $0x44] ss:$16 sps:$4 sm:$0xff]   ;;  %v1819_v23 = vld [vmem:[#allocation4 + $0x4c] ss:$16 sps:$4 sm:$0xff]   ;;  %v1821_v24 = vld [vmem:[#allocation4 + $0x40] ss:$16 sps:$4 sm:$0xff]  }
  0x2e   :  { %v1822_v25 = vld [vmem:[#allocation4 + $0x48] ss:$16 sps:$4 sm:$0xff]   ;;  %v1823_v26 = vld [vmem:[#allocation4 + $0x24] ss:$16 sps:$4 sm:$0xff]   ;;  %v1825_v27 = vld [vmem:[#allocation4 + $0x2c] ss:$16 sps:$4 sm:$0xff]  }
  0x2f   :  { %v1827_v28 = vld [vmem:[#allocation4 + $0x20] ss:$16 sps:$4 sm:$0xff]   ;;  %v1828_v29 = vld [vmem:[#allocation4 + $0x28] ss:$16 sps:$4 sm:$0xff]   ;;  %v1829_v30 = vld [vmem:[#allocation4 + $0x4] ss:$16 sps:$4 sm:$0xff]  }
  0x30   :  { %341 = vmatpush1.bf16.msra.mxu0 %v1803_v12  ;;  %414 = vmatpush1.bf16.msra.mxu1 %v1804_v13  ;;  %v1831_v31 = vld [vmem:[#allocation4 + $0xc] ss:$16 sps:$4 sm:$0xff]   ;;  %v1833_v32 = vld [vmem:[#allocation4] ss:$16 sps:$4 sm:$0xff]   ;;  %v1834_v33 = vld [vmem:[#allocation4 + $0x8] ss:$16 sps:$4 sm:$0xff]  }
  0x31   :  { %342 = vmatprep.subr.bf16.mxu0 %v1805_v14  ;;  %415 = vmatprep.subr.bf16.mxu1 %v1807_v15  ;;  %v110_v34 = vld [vmem:[%s2374_s0] sm:$0xff]  ;;  %v111_v35 = vld [vmem:[%s2374_s0 + $0x8] sm:$0xff]  ;;  %v112_v45 = vld [vmem:[%s2374_s0 + $0x10] sm:$0xff] }
  0x32   :  { %v1837_v36 = vld [vmem:[#allocation4 + $0x1e4] ss:$16 sps:$4 sm:$0xff]   ;;  %v1840_v37 = vld [vmem:[#allocation4 + $0x1ec] ss:$16 sps:$4 sm:$0xff]   ;;  %v118_v38 = vpack.c.bf16 %v111_v35, %v110_v34  ;;  %v1835_v39 = vld [vmem:[#allocation4 + $0x1e0] ss:$16 sps:$4 sm:$0xff]  }
  0x33   :  { %v1838_v40 = vld [vmem:[#allocation4 + $0x1e8] ss:$16 sps:$4 sm:$0xff]   ;;  %v1843_v41 = vld [vmem:[#allocation4 + $0x1c4] ss:$16 sps:$4 sm:$0xff]   ;;  %v1846_v42 = vld [vmem:[#allocation4 + $0x1cc] ss:$16 sps:$4 sm:$0xff]  }
  0x34   :  { %343 = vmatpush1.bf16.msra.mxu0 %v1809_v16  ;;  %416 = vmatpush1.bf16.msra.mxu1 %v1810_v17  ;;  %v1841_v43 = vld [vmem:[#allocation4 + $0x1c0] ss:$16 sps:$4 sm:$0xff]   ;;  %v1844_v44 = vld [vmem:[#allocation4 + $0x1c8] ss:$16 sps:$4 sm:$0xff]   ;;  %v1849_v47 = vld [vmem:[#allocation4 + $0x1a4] ss:$16 sps:$4 sm:$0xff]  }
  0x35   :  { %344 = vmatprep.subr.bf16.mxu0 %v1811_v18  ;;  %417 = vmatprep.subr.bf16.mxu1 %v1813_v19  ;;  %v113_v46 = vld [vmem:[%s2374_s0 + $0x18] sm:$0xff]  ;;  %v1847_v50 = vld [vmem:[#allocation4 + $0x1a0] ss:$16 sps:$4 sm:$0xff]   ;;  %v1855_v52 = vld [vmem:[#allocation4 + $0x184] ss:$16 sps:$4 sm:$0xff]  }
  0x36   :  { %v1852_v48 = vld [vmem:[#allocation4 + $0x1ac] ss:$16 sps:$4 sm:$0xff]   ;;  %v119_v49 = vpack.c.bf16 %v113_v46, %v112_v45  ;;  %v1850_v51 = vld [vmem:[#allocation4 + $0x1a8] ss:$16 sps:$4 sm:$0xff]   ;;  %v1853_v54 = vld [vmem:[#allocation4 + $0x180] ss:$16 sps:$4 sm:$0xff]  }
  0x37   :  { %v1858_v53 = vld [vmem:[#allocation4 + $0x18c] ss:$16 sps:$4 sm:$0xff]   ;;  %v1856_v55 = vld [vmem:[#allocation4 + $0x188] ss:$16 sps:$4 sm:$0xff]   ;;  %v114_v56 = vld [vmem:[%s2374_s0 + $0x20] sm:$0xff] }
  0x38   :  { %345 = vmatpush1.bf16.msra.mxu0 %v1815_v20  ;;  %418 = vmatpush1.bf16.msra.mxu1 %v1816_v21  ;;  %v115_v57 = vld [vmem:[%s2374_s0 + $0x28] sm:$0xff]  ;;  %v1861_v58 = vld [vmem:[#allocation4 + $0x164] ss:$16 sps:$4 sm:$0xff]   ;;  %v1859_v61 = vld [vmem:[#allocation4 + $0x160] ss:$16 sps:$4 sm:$0xff]  }
  0x39   :  { %346 = vmatprep.subr.bf16.mxu0 %v1817_v22  ;;  %419 = vmatprep.subr.bf16.mxu1 %v1819_v23  ;;  %v1864_v59 = vld [vmem:[#allocation4 + $0x16c] ss:$16 sps:$4 sm:$0xff]   ;;  %v120_v60 = vpack.c.bf16 %v115_v57, %v114_v56  ;;  %v1862_v62 = vld [vmem:[#allocation4 + $0x168] ss:$16 sps:$4 sm:$0xff]   ;;  %v1867_v63 = vld [vmem:[#allocation4 + $0x144] ss:$16 sps:$4 sm:$0xff]  }
  0x3a   :  { %v1870_v0 = vld [vmem:[#allocation4 + $0x14c] ss:$16 sps:$4 sm:$0xff]   ;;  %v1865_v2 = vld [vmem:[#allocation4 + $0x140] ss:$16 sps:$4 sm:$0xff]   ;;  %v1868_v3 = vld [vmem:[#allocation4 + $0x148] ss:$16 sps:$4 sm:$0xff]  }
  0x3b   :  { %v116_v4 = vld [vmem:[%s2374_s0 + $0x30] sm:$0xff]  ;;  %v117_v5 = vld [vmem:[%s2374_s0 + $0x38] sm:$0xff]  ;;  %v514_v15 = vld [vmem:[%s2375_s1] sm:$0xff] }
  0x3c   :  { %347 = vmatpush1.bf16.msra.mxu0 %v1821_v24  ;;  %420 = vmatpush1.bf16.msra.mxu1 %v1822_v25  ;;  %v1873_v6 = vld [vmem:[#allocation4 + $0x124] ss:$16 sps:$4 sm:$0xff]   ;;  %v1876_v7 = vld [vmem:[#allocation4 + $0x12c] ss:$16 sps:$4 sm:$0xff]   ;;  %v121_v8 = vpack.c.bf16 %v117_v5, %v116_v4  ;;  %v1871_v9 = vld [vmem:[#allocation4 + $0x120] ss:$16 sps:$4 sm:$0xff]  }
  0x3d   :  { %348 = vmatprep.subr.bf16.mxu0 %v1823_v26  ;;  %421 = vmatprep.subr.bf16.mxu1 %v1825_v27  ;;  %v1874_v10 = vld [vmem:[#allocation4 + $0x128] ss:$16 sps:$4 sm:$0xff]   ;;  %v1879_v11 = vld [vmem:[#allocation4 + $0x104] ss:$16 sps:$4 sm:$0xff]   ;;  %v1882_v12 = vld [vmem:[#allocation4 + $0x10c] ss:$16 sps:$4 sm:$0xff]   ;;  %v156_v27 = vlaneseq }
  0x3e   :  { %v1877_v13 = vld [vmem:[#allocation4 + $0x100] ss:$16 sps:$4 sm:$0xff]   ;;  %v1880_v14 = vld [vmem:[#allocation4 + $0x108] ss:$16 sps:$4 sm:$0xff]  }
  0x3f   :  { %v515_v16 = vld [vmem:[%s2375_s1 + $0x8] sm:$0xff]  ;;  %v516_v18 = vld [vmem:[%s2375_s1 + $0x10] sm:$0xff]  ;;  %v517_v19 = vld [vmem:[%s2375_s1 + $0x18] sm:$0xff] }
  0x40   :  { %349 = vmatpush1.bf16.msra.mxu0 %v1827_v28  ;;  %422 = vmatpush1.bf16.msra.mxu1 %v1828_v29  ;;  %v522_v17 = vpack.c.bf16 %v515_v16, %v514_v15  ;;  %v523_v20 = vpack.c.bf16 %v517_v19, %v516_v18  ;;  %v518_v21 = vld [vmem:[%s2375_s1 + $0x20] sm:$0xff]  ;;  %v519_v22 = vld [vmem:[%s2375_s1 + $0x28] sm:$0xff]  ;;  %v520_v24 = vld [vmem:[%s2375_s1 + $0x30] sm:$0xff]  ;;  %v2223_v28 = vshrl.u32 %v156_v27, 7 }
  0x41   :  { %350 = vmatprep.subr.bf16.mxu0 %v1829_v30  ;;  %423 = vmatprep.subr.bf16.mxu1 %v1831_v31  ;;  %v524_v23 = vpack.c.bf16 %v519_v22, %v518_v21  ;;  %v521_v25 = vld [vmem:[%s2375_s1 + $0x38] sm:$0xff]  ;;  %v154_v31 = vld [vmem:[#allocation8] sm:$0xf]  ;;  %s2325_s1 = smov 0  }
  0x42   :  { %v525_v26 = vpack.c.bf16 %v521_v25, %v520_v24  ;;  %v158_v29 = vsub.s32 0, %v2223_v28  ;;  %v166_v30 = vsub.s32 2, %v2223_v28 }
  0x44   :  { %351 = vmatpush1.bf16.msra.mxu0 %v1833_v32  ;;  %424 = vmatpush1.bf16.msra.mxu1 %v1834_v33  ;;  %v170_v32 = vsub.s32 3, %v2223_v28  ;;  %v2231_v33 = vrot.slane %v154_v31, %v158_v29  ;;  %v2235_v34 = vrot.slane %v154_v31, %v166_v30 }
  0x45   :  { %742 = vmatprep.subr.bf16.mxu0 %v1837_v36  ;;  %815 = vmatprep.subr.bf16.mxu1 %v1840_v37 }
  0x46   :  { %v2243_v36 = vrot.slane %v154_v31, %v170_v32 }
  0x47   :  { %369 = vmatmul.mubr.bf16.vlgmr.msra.gmra.mxu0 %v118_v38  ;;  %442 = vmatmul.mubr.bf16.vlgmr.msra.gmra.mxu1 %v118_v38 }
  0x48   :  { %743 = vmatpush1.bf16.msra.mxu0 %v1835_v39  ;;  %816 = vmatpush1.bf16.msra.mxu1 %v1838_v40 }
  0x49   :  { %744 = vmatprep.subr.bf16.mxu0 %v1843_v41  ;;  %817 = vmatprep.subr.bf16.mxu1 %v1846_v42 }
  0x4a   :  { %378 = vmatprep.mubr.bf16.mxu0 %v2091_v1  ;;  %451 = vmatprep.mubr.bf16.mxu1 %v2091_v1 }
  0x4c   :  { %745 = vmatpush1.bf16.msra.mxu0 %v1841_v43  ;;  %818 = vmatpush1.bf16.msra.mxu1 %v1844_v44 }
  0x4d   :  { %746 = vmatprep.subr.bf16.mxu0 %v1849_v47  ;;  %819 = vmatprep.subr.bf16.mxu1 %v1852_v48 }
  0x4f   :  { %379 = vmatmul.mubr.bf16.gmra.mxu0 %v119_v49  ;;  %452 = vmatmul.mubr.bf16.gmra.mxu1 %v119_v49 }
  0x50   :  { %747 = vmatpush1.bf16.msra.mxu0 %v1847_v50  ;;  %820 = vmatpush1.bf16.msra.mxu1 %v1850_v51 }
  0x51   :  { %748 = vmatprep.subr.bf16.mxu0 %v1855_v52  ;;  %821 = vmatprep.subr.bf16.mxu1 %v1858_v53 }
  0x52   :  { %388 = vmatprep.mubr.bf16.mxu0 %v2091_v1  ;;  %461 = vmatprep.mubr.bf16.mxu1 %v2091_v1 }
  0x54   :  { %749 = vmatpush1.bf16.msra.mxu0 %v1853_v54  ;;  %822 = vmatpush1.bf16.msra.mxu1 %v1856_v55 }
  0x55   :  { %750 = vmatprep.subr.bf16.mxu0 %v1861_v58  ;;  %823 = vmatprep.subr.bf16.mxu1 %v1864_v59 }
  0x57   :  { %389 = vmatmul.mubr.bf16.gmra.mxu0 %v120_v60  ;;  %462 = vmatmul.mubr.bf16.gmra.mxu1 %v120_v60 }
  0x58   :  { %751 = vmatpush1.bf16.msra.mxu0 %v1859_v61  ;;  %824 = vmatpush1.bf16.msra.mxu1 %v1862_v62 }
  0x59   :  { %752 = vmatprep.subr.bf16.mxu0 %v1867_v63  ;;  %825 = vmatprep.subr.bf16.mxu1 %v1870_v0 }
  0x5a   :  { %398 = vmatprep.mubr.bf16.mxu0 %v2091_v1  ;;  %471 = vmatprep.mubr.bf16.mxu1 %v2091_v1 }
  0x5c   :  { %753 = vmatpush1.bf16.msra.mxu0 %v1865_v2  ;;  %826 = vmatpush1.bf16.msra.mxu1 %v1868_v3 }
  0x5d   :  { %754 = vmatprep.subr.bf16.mxu0 %v1873_v6  ;;  %827 = vmatprep.subr.bf16.mxu1 %v1876_v7 }
  0x5f   :  { %399 = vmatmul.mubr.bf16.gmra.mxu0 %v121_v8  ;;  %472 = vmatmul.mubr.bf16.gmra.mxu1 %v121_v8 }
  0x60   :  { %755 = vmatpush1.bf16.msra.mxu0 %v1871_v9  ;;  %828 = vmatpush1.bf16.msra.mxu1 %v1874_v10 }
  0x61   :  { %756 = vmatprep.subr.bf16.mxu0 %v1879_v11  ;;  %829 = vmatprep.subr.bf16.mxu1 %v1882_v12 }
  0x62   :  { %774 = vmatprep.mubr.bf16.mxu0 %v2091_v1  ;;  %847 = vmatprep.mubr.bf16.mxu1 %v2091_v1 }
  0x64   :  { %757 = vmatpush1.bf16.msra.mxu0 %v1877_v13  ;;  %830 = vmatpush1.bf16.msra.mxu1 %v1880_v14 }
  0x67   :  { %775 = vmatmul.mubr.bf16.vlgmr.msra.gmra.mxu0 %v522_v17  ;;  %848 = vmatmul.mubr.bf16.vlgmr.msra.gmra.mxu1 %v522_v17 }
  0x68   :  { %784 = vmatprep.mubr.bf16.mxu0 %v2091_v1  ;;  %857 = vmatprep.mubr.bf16.mxu1 %v2091_v1 }
  0x6f   :  { %785 = vmatmul.mubr.bf16.gmra.mxu0 %v523_v20  ;;  %858 = vmatmul.mubr.bf16.gmra.mxu1 %v523_v20 }
  0x70   :  { %794 = vmatprep.mubr.bf16.mxu0 %v2091_v1  ;;  %867 = vmatprep.mubr.bf16.mxu1 %v2091_v1 }
  0x77   :  { %795 = vmatmul.mubr.bf16.gmra.mxu0 %v524_v23  ;;  %868 = vmatmul.mubr.bf16.gmra.mxu1 %v524_v23 }
  0x78   :  { %804 = vmatprep.mubr.bf16.mxu0 %v2091_v1  ;;  %877 = vmatprep.mubr.bf16.mxu1 %v2091_v1  ;;  %v162_v1 = vsub.s32 1, %v2223_v28 }
  0x7a   :  { %v2239_v35 = vrot.slane %v154_v31, %v162_v1  ;;  %v560_v31 = vld [vmem:[#allocation8 + $0x4] sm:$0xf] }
  0x7f   :  { %805 = vmatmul.mubr.bf16.gmra.mxu0 %v525_v26  ;;  %878 = vmatmul.mubr.bf16.gmra.mxu1 %v525_v26 }
 0x107   :  { %v370_v37 = vpop.f32.mrf.mxu0  ;;  %v443_v38 = vpop.f32.mrf.mxu1 }
 0x108   :  { %v371_v39 = vadd.f32 %v370_v37, %v2231_v33  ;;  %v444_v40 = vadd.f32 %v443_v38, %v2235_v34 }
 0x109   :  { %v372_v41 = vpop.f32.mrf.mxu0  ;;  %v445_v42 = vpop.f32.mrf.mxu1 }
 0x10a   :  { %482 = vst [vmem:[#allocation2] sm:$0xff] %v371_v39  ;;  %484 = vst [vmem:[#allocation2 + $0x10] sm:$0xff] %v444_v40  ;;  %v373_v43 = vadd.f32 %v372_v41, %v2239_v35  ;;  %v446_v44 = vadd.f32 %v445_v42, %v2243_v36 }
 0x10b   :  { %v374_v45 = vpop.f32.mrf.mxu0  ;;  %v447_v46 = vpop.f32.mrf.mxu1 }
 0x10c   :  { %483 = vst [vmem:[#allocation2 + $0x8] sm:$0xff] %v373_v43  ;;  %485 = vst [vmem:[#allocation2 + $0x18] sm:$0xff] %v446_v44  ;;  %v375_v47 = vadd.f32 %v374_v45, %v2231_v33  ;;  %v448_v48 = vadd.f32 %v447_v46, %v2235_v34  ;;  %v2277_v43 = vrot.slane %v560_v31, %v158_v29 }
 0x10d   :  { %v376_v49 = vpop.f32.mrf.mxu0  ;;  %v449_v50 = vpop.f32.mrf.mxu1  ;;  %v2281_v44 = vrot.slane %v560_v31, %v166_v30  ;;  %v2291_v29 = vrot.slane %v560_v31, %v170_v32 }
 0x10e   :  { %486 = vst [vmem:[#allocation2 + $0x20] sm:$0xff] %v375_v47  ;;  %488 = vst [vmem:[#allocation2 + $0x30] sm:$0xff] %v448_v48  ;;  %v377_v51 = vadd.f32 %v376_v49, %v2239_v35  ;;  %v450_v52 = vadd.f32 %v449_v50, %v2243_v36 }
 0x10f   :  { %v380_v53 = vpop.f32.mrf.mxu0  ;;  %v453_v54 = vpop.f32.mrf.mxu1 }
 0x110   :  { %487 = vst [vmem:[#allocation2 + $0x28] sm:$0xff] %v377_v51  ;;  %489 = vst [vmem:[#allocation2 + $0x38] sm:$0xff] %v450_v52  ;;  %v381_v55 = vadd.f32 %v380_v53, %v2231_v33  ;;  %v454_v56 = vadd.f32 %v453_v54, %v2235_v34 }
 0x111   :  { %v382_v57 = vpop.f32.mrf.mxu0  ;;  %v455_v58 = vpop.f32.mrf.mxu1 }
 0x112   :  { %490 = vst [vmem:[#allocation2 + $0x40] sm:$0xff] %v381_v55  ;;  %492 = vst [vmem:[#allocation2 + $0x50] sm:$0xff] %v454_v56  ;;  %v383_v59 = vadd.f32 %v382_v57, %v2239_v35  ;;  %v456_v60 = vadd.f32 %v455_v58, %v2243_v36 }
 0x113   :  { %v384_v61 = vpop.f32.mrf.mxu0  ;;  %v457_v62 = vpop.f32.mrf.mxu1 }
 0x114   :  { %491 = vst [vmem:[#allocation2 + $0x48] sm:$0xff] %v383_v59  ;;  %493 = vst [vmem:[#allocation2 + $0x58] sm:$0xff] %v456_v60  ;;  %v385_v63 = vadd.f32 %v384_v61, %v2231_v33  ;;  %v458_v0 = vadd.f32 %v457_v62, %v2235_v34 }
 0x115   :  { %v386_v2 = vpop.f32.mrf.mxu0  ;;  %v459_v3 = vpop.f32.mrf.mxu1 }
 0x116   :  { %494 = vst [vmem:[#allocation2 + $0x60] sm:$0xff] %v385_v63  ;;  %496 = vst [vmem:[#allocation2 + $0x70] sm:$0xff] %v458_v0  ;;  %v387_v4 = vadd.f32 %v386_v2, %v2239_v35  ;;  %v460_v5 = vadd.f32 %v459_v3, %v2243_v36 }
 0x117   :  { %v390_v6 = vpop.f32.mrf.mxu0  ;;  %v463_v7 = vpop.f32.mrf.mxu1 }
 0x118   :  { %495 = vst [vmem:[#allocation2 + $0x68] sm:$0xff] %v387_v4  ;;  %497 = vst [vmem:[#allocation2 + $0x78] sm:$0xff] %v460_v5  ;;  %v391_v8 = vadd.f32 %v390_v6, %v2231_v33  ;;  %v464_v9 = vadd.f32 %v463_v7, %v2235_v34 }
 0x119   :  { %v392_v10 = vpop.f32.mrf.mxu0  ;;  %v465_v11 = vpop.f32.mrf.mxu1 }
 0x11a   :  { %498 = vst [vmem:[#allocation2 + $0x80] sm:$0xff] %v391_v8  ;;  %500 = vst [vmem:[#allocation2 + $0x90] sm:$0xff] %v464_v9  ;;  %v393_v12 = vadd.f32 %v392_v10, %v2239_v35  ;;  %v466_v13 = vadd.f32 %v465_v11, %v2243_v36 }
 0x11b   :  { %v394_v14 = vpop.f32.mrf.mxu0  ;;  %v467_v15 = vpop.f32.mrf.mxu1 }
 0x11c   :  { %499 = vst [vmem:[#allocation2 + $0x88] sm:$0xff] %v393_v12  ;;  %501 = vst [vmem:[#allocation2 + $0x98] sm:$0xff] %v466_v13  ;;  %v395_v16 = vadd.f32 %v394_v14, %v2231_v33  ;;  %v468_v17 = vadd.f32 %v467_v15, %v2235_v34 }
 0x11d   :  { %v396_v18 = vpop.f32.mrf.mxu0  ;;  %v469_v19 = vpop.f32.mrf.mxu1 }
 0x11e   :  { %502 = vst [vmem:[#allocation2 + $0xa0] sm:$0xff] %v395_v16  ;;  %504 = vst [vmem:[#allocation2 + $0xb0] sm:$0xff] %v468_v17  ;;  %v397_v20 = vadd.f32 %v396_v18, %v2239_v35  ;;  %v470_v21 = vadd.f32 %v469_v19, %v2243_v36 }
 0x11f   :  { %v400_v22 = vpop.f32.mrf.mxu0  ;;  %v473_v23 = vpop.f32.mrf.mxu1 }
 0x120   :  { %503 = vst [vmem:[#allocation2 + $0xa8] sm:$0xff] %v397_v20  ;;  %505 = vst [vmem:[#allocation2 + $0xb8] sm:$0xff] %v470_v21  ;;  %v401_v24 = vadd.f32 %v400_v22, %v2231_v33  ;;  %v474_v25 = vadd.f32 %v473_v23, %v2235_v34 }
 0x121   :  { %v402_v26 = vpop.f32.mrf.mxu0  ;;  %v475_v27 = vpop.f32.mrf.mxu1 }
 0x122   :  { %506 = vst [vmem:[#allocation2 + $0xc0] sm:$0xff] %v401_v24  ;;  %508 = vst [vmem:[#allocation2 + $0xd0] sm:$0xff] %v474_v25  ;;  %v403_v37 = vadd.f32 %v402_v26, %v2239_v35  ;;  %v476_v38 = vadd.f32 %v475_v27, %v2243_v36 }
 0x123   :  { %v404_v39 = vpop.f32.mrf.mxu0  ;;  %v477_v40 = vpop.f32.mrf.mxu1 }
 0x124   :  { %507 = vst [vmem:[#allocation2 + $0xc8] sm:$0xff] %v403_v37  ;;  %509 = vst [vmem:[#allocation2 + $0xd8] sm:$0xff] %v476_v38  ;;  %v405_v41 = vadd.f32 %v404_v39, %v2231_v33  ;;  %v478_v42 = vadd.f32 %v477_v40, %v2235_v34  ;;  %v2287_v33 = vrot.slane %v560_v31, %v162_v1 }
 0x125   :  { %v406_v45 = vpop.f32.mrf.mxu0  ;;  %v479_v46 = vpop.f32.mrf.mxu1 }
 0x126   :  { %510 = vst [vmem:[#allocation2 + $0xe0] sm:$0xff] %v405_v41  ;;  %512 = vst [vmem:[#allocation2 + $0xf0] sm:$0xff] %v478_v42  ;;  %v407_v47 = vadd.f32 %v406_v45, %v2239_v35  ;;  %v480_v48 = vadd.f32 %v479_v46, %v2243_v36 }
 0x127   :  { %v776_v34 = vpop.f32.mrf.mxu0  ;;  %v849_v49 = vpop.f32.mrf.mxu1 }
 0x128   :  { %511 = vst [vmem:[#allocation2 + $0xe8] sm:$0xff] %v407_v47  ;;  %513 = vst [vmem:[#allocation2 + $0xf8] sm:$0xff] %v480_v48  ;;  %v777_v30 = vadd.f32 %v776_v34, %v2277_v43  ;;  %v850_v50 = vadd.f32 %v849_v49, %v2281_v44 }
 0x129   :  { %v778_v51 = vpop.f32.mrf.mxu0  ;;  %v851_v35 = vpop.f32.mrf.mxu1 }
 0x12a   :  { %888 = vst [vmem:[#allocation3] sm:$0xff] %v777_v30  ;;  %890 = vst [vmem:[#allocation3 + $0x10] sm:$0xff] %v850_v50  ;;  %v779_v36 = vadd.f32 %v778_v51, %v2287_v33  ;;  %v852_v1 = vadd.f32 %v851_v35, %v2291_v29 }
 0x12b   :  { %v780_v52 = vpop.f32.mrf.mxu0  ;;  %v853_v28 = vpop.f32.mrf.mxu1 }
 0x12c   :  { %889 = vst [vmem:[#allocation3 + $0x8] sm:$0xff] %v779_v36  ;;  %891 = vst [vmem:[#allocation3 + $0x18] sm:$0xff] %v852_v1  ;;  %v781_v32 = vadd.f32 %v780_v52, %v2277_v43  ;;  %v854_v53 = vadd.f32 %v853_v28, %v2281_v44 }
 0x12d   :  { %v782_v54 = vpop.f32.mrf.mxu0  ;;  %v855_v55 = vpop.f32.mrf.mxu1 }
 0x12e   :  { %892 = vst [vmem:[#allocation3 + $0x20] sm:$0xff] %v781_v32  ;;  %894 = vst [vmem:[#allocation3 + $0x30] sm:$0xff] %v854_v53  ;;  %v783_v56 = vadd.f32 %v782_v54, %v2287_v33  ;;  %v856_v57 = vadd.f32 %v855_v55, %v2291_v29 }
 0x12f   :  { %v786_v58 = vpop.f32.mrf.mxu0  ;;  %v859_v59 = vpop.f32.mrf.mxu1 }
 0x130   :  { %893 = vst [vmem:[#allocation3 + $0x28] sm:$0xff] %v783_v56  ;;  %895 = vst [vmem:[#allocation3 + $0x38] sm:$0xff] %v856_v57  ;;  %v787_v60 = vadd.f32 %v786_v58, %v2277_v43  ;;  %v860_v61 = vadd.f32 %v859_v59, %v2281_v44 }
 0x131   :  { %v788_v62 = vpop.f32.mrf.mxu0  ;;  %v861_v63 = vpop.f32.mrf.mxu1 }
 0x132   :  { %896 = vst [vmem:[#allocation3 + $0x40] sm:$0xff] %v787_v60  ;;  %898 = vst [vmem:[#allocation3 + $0x50] sm:$0xff] %v860_v61  ;;  %v789_v0 = vadd.f32 %v788_v62, %v2287_v33  ;;  %v862_v2 = vadd.f32 %v861_v63, %v2291_v29 }
 0x133   :  { %v790_v3 = vpop.f32.mrf.mxu0  ;;  %v863_v4 = vpop.f32.mrf.mxu1 }
 0x134   :  { %897 = vst [vmem:[#allocation3 + $0x48] sm:$0xff] %v789_v0  ;;  %899 = vst [vmem:[#allocation3 + $0x58] sm:$0xff] %v862_v2  ;;  %v791_v5 = vadd.f32 %v790_v3, %v2277_v43  ;;  %v864_v6 = vadd.f32 %v863_v4, %v2281_v44 }
 0x135   :  { %v792_v7 = vpop.f32.mrf.mxu0  ;;  %v865_v8 = vpop.f32.mrf.mxu1 }
 0x136   :  { %900 = vst [vmem:[#allocation3 + $0x60] sm:$0xff] %v791_v5  ;;  %902 = vst [vmem:[#allocation3 + $0x70] sm:$0xff] %v864_v6  ;;  %v793_v9 = vadd.f32 %v792_v7, %v2287_v33  ;;  %v866_v10 = vadd.f32 %v865_v8, %v2291_v29 }
 0x137   :  { %v796_v11 = vpop.f32.mrf.mxu0  ;;  %v869_v12 = vpop.f32.mrf.mxu1 }
 0x138   :  { %901 = vst [vmem:[#allocation3 + $0x68] sm:$0xff] %v793_v9  ;;  %903 = vst [vmem:[#allocation3 + $0x78] sm:$0xff] %v866_v10  ;;  %v797_v13 = vadd.f32 %v796_v11, %v2277_v43  ;;  %v870_v14 = vadd.f32 %v869_v12, %v2281_v44 }
 0x139   :  { %v798_v15 = vpop.f32.mrf.mxu0  ;;  %v871_v16 = vpop.f32.mrf.mxu1 }
 0x13a   :  { %904 = vst [vmem:[#allocation3 + $0x80] sm:$0xff] %v797_v13  ;;  %906 = vst [vmem:[#allocation3 + $0x90] sm:$0xff] %v870_v14  ;;  %v799_v17 = vadd.f32 %v798_v15, %v2287_v33  ;;  %v872_v18 = vadd.f32 %v871_v16, %v2291_v29 }
 0x13b   :  { %v800_v19 = vpop.f32.mrf.mxu0  ;;  %v873_v20 = vpop.f32.mrf.mxu1 }
 0x13c   :  { %905 = vst [vmem:[#allocation3 + $0x88] sm:$0xff] %v799_v17  ;;  %907 = vst [vmem:[#allocation3 + $0x98] sm:$0xff] %v872_v18  ;;  %v801_v21 = vadd.f32 %v800_v19, %v2277_v43  ;;  %v874_v22 = vadd.f32 %v873_v20, %v2281_v44 }
 0x13d   :  { %v802_v23 = vpop.f32.mrf.mxu0  ;;  %v875_v24 = vpop.f32.mrf.mxu1 }
 0x13e   :  { %908 = vst [vmem:[#allocation3 + $0xa0] sm:$0xff] %v801_v21  ;;  %910 = vst [vmem:[#allocation3 + $0xb0] sm:$0xff] %v874_v22  ;;  %v803_v25 = vadd.f32 %v802_v23, %v2287_v33  ;;  %v876_v26 = vadd.f32 %v875_v24, %v2291_v29 }
 0x13f   :  { %v806_v27 = vpop.f32.mrf.mxu0  ;;  %v879_v31 = vpop.f32.mrf.mxu1 }
 0x140   :  { %909 = vst [vmem:[#allocation3 + $0xa8] sm:$0xff] %v803_v25  ;;  %911 = vst [vmem:[#allocation3 + $0xb8] sm:$0xff] %v876_v26  ;;  %v807_v37 = vadd.f32 %v806_v27, %v2277_v43  ;;  %v880_v38 = vadd.f32 %v879_v31, %v2281_v44 }
 0x141   :  { %v808_v39 = vpop.f32.mrf.mxu0  ;;  %v881_v40 = vpop.f32.mrf.mxu1 }
 0x142   :  { %912 = vst [vmem:[#allocation3 + $0xc0] sm:$0xff] %v807_v37  ;;  %914 = vst [vmem:[#allocation3 + $0xd0] sm:$0xff] %v880_v38  ;;  %v809_v41 = vadd.f32 %v808_v39, %v2287_v33  ;;  %v882_v42 = vadd.f32 %v881_v40, %v2291_v29 }
 0x143   :  { %v810_v45 = vpop.f32.mrf.mxu0  ;;  %v883_v46 = vpop.f32.mrf.mxu1 }
 0x144   :  { %913 = vst [vmem:[#allocation3 + $0xc8] sm:$0xff] %v809_v41  ;;  %915 = vst [vmem:[#allocation3 + $0xd8] sm:$0xff] %v882_v42  ;;  %v811_v47 = vadd.f32 %v810_v45, %v2277_v43  ;;  %v884_v48 = vadd.f32 %v883_v46, %v2281_v44 }
 0x145   :  { %v812_v34 = vpop.f32.mrf.mxu0  ;;  %v885_v49 = vpop.f32.mrf.mxu1 }
 0x146   :  { %916 = vst [vmem:[#allocation3 + $0xe0] sm:$0xff] %v811_v47  ;;  %918 = vst [vmem:[#allocation3 + $0xf0] sm:$0xff] %v884_v48  ;;  %v813_v30 = vadd.f32 %v812_v34, %v2287_v33  ;;  %v886_v50 = vadd.f32 %v885_v49, %v2291_v29 }
 0x148   :  { %917 = vst [vmem:[#allocation3 + $0xe8] sm:$0xff] %v813_v30  ;;  %919 = vst [vmem:[#allocation3 + $0xf8] sm:$0xff] %v886_v50 }
 0x149 LB: > { %v1883_v43 = vld [vmem:[#allocation6 + $0xe4] ss:$16 sps:$4 sm:$0xff]   ;;  %v1885_v51 = vld [vmem:[#allocation6 + $0xe0] ss:$16 sps:$4 sm:$0xff]   ;;  %v2092_v44 = vmov 0   ;;  %s1767_s17 = sshll.u32 %s2081_s1, 5  ;;  %s2081_s1 = sphi %s2325_s1, %s925_s1  }
 0x14a   : > { %1159 = vmatprep.mubr.bf16.mxu0 %v2092_v44  ;;  %1200 = vmatprep.mubr.bf16.mxu1 %v2092_v44  ;;  %v1886_v33 = vld [vmem:[#allocation6 + $0xc4] ss:$16 sps:$4 sm:$0xff]   ;;  %v1888_v29 = vld [vmem:[#allocation6 + $0xc0] ss:$16 sps:$4 sm:$0xff]   ;;  %v1894_v36 = vld [vmem:[#allocation6 + $0xec] ss:$16 sps:$4 sm:$0xff]  }
 0x14b   : > { %1127 = vmatprep.subr.bf16.mxu0 %v1883_v43  ;;  %v1889_v35 = vld [vmem:[#allocation6 + $0xa4] ss:$16 sps:$4 sm:$0xff]   ;;  %v1897_v1 = vld [vmem:[#allocation6 + $0xe8] ss:$16 sps:$4 sm:$0xff]   ;;  %v1891_v52 = vld [vmem:[#allocation6 + $0xa0] ss:$16 sps:$4 sm:$0xff]   ;;  %1168 = vmatprep.subr.bf16.mxu1 %v1894_v36 }
 0x14c   : > { %1128 = vmatpush1.bf16.msra.mxu0 %v1885_v51  ;;  %v1892_v28 = vld [vmem:[#allocation6 + $0x84] ss:$16 sps:$4 sm:$0xff]   ;;  %1169 = vmatpush1.bf16.msra.mxu1 %v1897_v1  ;;  %v1900_v32 = vld [vmem:[#allocation6 + $0xcc] ss:$16 sps:$4 sm:$0xff]   ;;  %v1903_v53 = vld [vmem:[#allocation6 + $0xc8] ss:$16 sps:$4 sm:$0xff]  }
 0x14d   : > { %1129 = vmatprep.subr.bf16.mxu0 %v1886_v33  ;;  %1170 = vmatprep.subr.bf16.mxu1 %v1900_v32  ;;  %v1896_v54 = vld [vmem:[#allocation6 + $0x80] ss:$16 sps:$4 sm:$0xff]   ;;  %v1898_v55 = vld [vmem:[#allocation6 + $0x64] ss:$16 sps:$4 sm:$0xff]   ;;  %v1906_v56 = vld [vmem:[#allocation6 + $0xac] ss:$16 sps:$4 sm:$0xff]  }
 0x14e   : > { %v1909_v57 = vld [vmem:[#allocation6 + $0xa8] ss:$16 sps:$4 sm:$0xff]   ;;  %v1912_v58 = vld [vmem:[#allocation6 + $0x8c] ss:$16 sps:$4 sm:$0xff]   ;;  %v1902_v59 = vld [vmem:[#allocation6 + $0x60] ss:$16 sps:$4 sm:$0xff]  }
 0x14f   : > { %v1904_v60 = vld [vmem:[#allocation6 + $0x44] ss:$16 sps:$4 sm:$0xff]   ;;  %v1915_v61 = vld [vmem:[#allocation6 + $0x88] ss:$16 sps:$4 sm:$0xff]   ;;  %v1918_v62 = vld [vmem:[#allocation6 + $0x6c] ss:$16 sps:$4 sm:$0xff]  }
 0x150   : > { %1130 = vmatpush1.bf16.msra.mxu0 %v1888_v29  ;;  %1171 = vmatpush1.bf16.msra.mxu1 %v1903_v53  ;;  %v1908_v63 = vld [vmem:[#allocation6 + $0x40] ss:$16 sps:$4 sm:$0xff]   ;;  %v1910_v0 = vld [vmem:[#allocation6 + $0x24] ss:$16 sps:$4 sm:$0xff]   ;;  %v1921_v2 = vld [vmem:[#allocation6 + $0x68] ss:$16 sps:$4 sm:$0xff]  }
 0x151   : > { %1131 = vmatprep.subr.bf16.mxu0 %v1889_v35  ;;  %1172 = vmatprep.subr.bf16.mxu1 %v1906_v56  ;;  %v1922_v3 = vld [vmem:[#allocation6 + $0x4c] ss:$16 sps:$4 sm:$0xff]   ;;  %v1914_v4 = vld [vmem:[#allocation6 + $0x20] ss:$16 sps:$4 sm:$0xff]   ;;  %v1916_v5 = vld [vmem:[#allocation6 + $0x4] ss:$16 sps:$4 sm:$0xff]  }
 0x152   : > { %v1927_v6 = vld [vmem:[#allocation6 + $0x48] ss:$16 sps:$4 sm:$0xff]   ;;  %v1928_v7 = vld [vmem:[#allocation6 + $0x2c] ss:$16 sps:$4 sm:$0xff]   ;;  %v1920_v8 = vld [vmem:[#allocation6] ss:$16 sps:$4 sm:$0xff]  }
 0x153   : > { %v933_v9 = vld [vmem:[%s2381_s7] sm:$0xff]  ;;  %v1933_v11 = vld [vmem:[#allocation6 + $0x28] ss:$16 sps:$4 sm:$0xff]   ;;  %v1934_v12 = vld [vmem:[#allocation6 + $0xc] ss:$16 sps:$4 sm:$0xff]   ;;  %s928_s18 = scalar_lea.vmem [#allocation2], %s1767_s17 }
 0x154   : > { %1132 = vmatpush1.bf16.msra.mxu0 %v1891_v52  ;;  %1173 = vmatpush1.bf16.msra.mxu1 %v1909_v57  ;;  %v1926_v10 = vld [vmem:[#allocation6 + $0x1e4] ss:$16 sps:$4 sm:$0xff]   ;;  %v934_v13 = vpack.c.bf16 %v933_v9, %v933_v9  ;;  %v1924_v14 = vld [vmem:[#allocation6 + $0x1e0] ss:$16 sps:$4 sm:$0xff]   ;;  %v1939_v16 = vld [vmem:[#allocation6 + $0x8] ss:$16 sps:$4 sm:$0xff]  }
 0x155   : > { %1133 = vmatprep.subr.bf16.mxu0 %v1892_v28  ;;  %1174 = vmatprep.subr.bf16.mxu1 %v1912_v58  ;;  %v1932_v15 = vld [vmem:[#allocation6 + $0x1c4] ss:$16 sps:$4 sm:$0xff]   ;;  %v1945_v17 = vld [vmem:[#allocation6 + $0x1ec] ss:$16 sps:$4 sm:$0xff]   ;;  %v1930_v18 = vld [vmem:[#allocation6 + $0x1c0] ss:$16 sps:$4 sm:$0xff]  }
 0x156   : > { %v1938_v19 = vld [vmem:[#allocation6 + $0x1a4] ss:$16 sps:$4 sm:$0xff]   ;;  %v1943_v20 = vld [vmem:[#allocation6 + $0x1e8] ss:$16 sps:$4 sm:$0xff]   ;;  %v1951_v21 = vld [vmem:[#allocation6 + $0x1cc] ss:$16 sps:$4 sm:$0xff]  }
 0x157   : > { %v1936_v22 = vld [vmem:[#allocation6 + $0x1a0] ss:$16 sps:$4 sm:$0xff]   ;;  %v1942_v23 = vld [vmem:[#allocation6 + $0x184] ss:$16 sps:$4 sm:$0xff]   ;;  %v1949_v24 = vld [vmem:[#allocation6 + $0x1c8] ss:$16 sps:$4 sm:$0xff]  }
 0x158   : > { %1134 = vmatpush1.bf16.msra.mxu0 %v1896_v54  ;;  %1175 = vmatpush1.bf16.msra.mxu1 %v1915_v61  ;;  %v1957_v25 = vld [vmem:[#allocation6 + $0x1ac] ss:$16 sps:$4 sm:$0xff]   ;;  %v1940_v26 = vld [vmem:[#allocation6 + $0x180] ss:$16 sps:$4 sm:$0xff]   ;;  %v1948_v27 = vld [vmem:[#allocation6 + $0x164] ss:$16 sps:$4 sm:$0xff]  }
 0x159   : > { %1135 = vmatprep.subr.bf16.mxu0 %v1898_v55  ;;  %1176 = vmatprep.subr.bf16.mxu1 %v1918_v62  ;;  %v1955_v31 = vld [vmem:[#allocation6 + $0x1a8] ss:$16 sps:$4 sm:$0xff]   ;;  %v1963_v37 = vld [vmem:[#allocation6 + $0x18c] ss:$16 sps:$4 sm:$0xff]   ;;  %v1946_v38 = vld [vmem:[#allocation6 + $0x160] ss:$16 sps:$4 sm:$0xff]  }
 0x15a   : > { %v1954_v39 = vld [vmem:[#allocation6 + $0x144] ss:$16 sps:$4 sm:$0xff]   ;;  %v1961_v40 = vld [vmem:[#allocation6 + $0x188] ss:$16 sps:$4 sm:$0xff]   ;;  %v1969_v41 = vld [vmem:[#allocation6 + $0x16c] ss:$16 sps:$4 sm:$0xff]  }
 0x15b   : > { %v1952_v42 = vld [vmem:[#allocation6 + $0x140] ss:$16 sps:$4 sm:$0xff]   ;;  %v1960_v45 = vld [vmem:[#allocation6 + $0x124] ss:$16 sps:$4 sm:$0xff]   ;;  %v1967_v46 = vld [vmem:[#allocation6 + $0x168] ss:$16 sps:$4 sm:$0xff]  }
 0x15c   : > { %1136 = vmatpush1.bf16.msra.mxu0 %v1902_v59  ;;  %1177 = vmatpush1.bf16.msra.mxu1 %v1921_v2  ;;  %v1972_v47 = vld [vmem:[#allocation6 + $0x14c] ss:$16 sps:$4 sm:$0xff]   ;;  %v1958_v48 = vld [vmem:[#allocation6 + $0x120] ss:$16 sps:$4 sm:$0xff]   ;;  %v1966_v34 = vld [vmem:[#allocation6 + $0x104] ss:$16 sps:$4 sm:$0xff]  }
 0x15d   : > { %1137 = vmatprep.subr.bf16.mxu0 %v1904_v60  ;;  %1178 = vmatprep.subr.bf16.mxu1 %v1922_v3  ;;  %v1970_v49 = vld [vmem:[#allocation6 + $0x148] ss:$16 sps:$4 sm:$0xff]   ;;  %v1975_v30 = vld [vmem:[#allocation6 + $0x12c] ss:$16 sps:$4 sm:$0xff]   ;;  %v1964_v50 = vld [vmem:[#allocation6 + $0x100] ss:$16 sps:$4 sm:$0xff]  }
 0x15e   : > { %v1727_v43 = vld [vmem:[%s2381_s7 + $0x8] sm:$0xff]  ;;  %v929_v35 = vld [vmem:[%s928_s18] sm:$0xff]  ;;  %v932_v58 = vld [vmem:[%s928_s18 + $0x18] sm:$0xff]  ;;  %s1243_s19 = ssub.s32 7, %s2081_s1  ;;  %s1724_s23 = sshll.u32 %s2081_s1, 3 }
 0x15f   : > { %v1973_v51 = vld [vmem:[#allocation6 + $0x128] ss:$16 sps:$4 sm:$0xff]   ;;  %v1253_v33 = vpack.c.bf16 %v1727_v43, %v1727_v43  ;;  %s1768_s3 = sshll.u32 %s1243_s19, 5  ;;  %s1239_s26 = scalar_lea.vmem %s2379_s5, %s1724_s23 }
 0x160   : > { %1138 = vmatpush1.bf16.msra.mxu0 %v1908_v63  ;;  %1179 = vmatpush1.bf16.msra.mxu1 %v1927_v6  ;;  %v1976_v29 = vld [vmem:[#allocation6 + $0x108] ss:$16 sps:$4 sm:$0xff]   ;;  %v931_v63 = vld [vmem:[%s928_s18 + $0x10] sm:$0xff]  ;;  %s1246_s20 = scalar_lea.vmem [#allocation3], %s1768_s3  ;;  %s1764_s10 = sshll.u32 %s1243_s19, 3 }
 0x161   : > { %1139 = vmatprep.subr.bf16.mxu0 %v1910_v0  ;;  %1180 = vmatprep.subr.bf16.mxu1 %v1928_v7  ;;  %v930_v1 = vld [vmem:[%s928_s18 + $0x8] sm:$0xff]  ;;  %v1247_v7 = vld [vmem:[%s1246_s20] sm:$0xff]  ;;  %s1560_s13 = scalar_lea.vmem %s2380_s6, %s1764_s10  ;;  %s925_s1 = sadd.s32 1, %s2081_s1  }
 0x162   : > { %p922_p1 = scmp.ge.s32.totalorder %s925_s1, 8  }
 0x164   : > { %1140 = vmatpush1.bf16.msra.mxu0 %v1914_v4  ;;  %1181 = vmatpush1.bf16.msra.mxu1 %v1933_v11  ;;  %v1248_v11 = vld [vmem:[%s1246_s20 + $0x8] sm:$0xff] }
 0x165   : > { %1141 = vmatprep.subr.bf16.mxu0 %v1916_v5  ;;  %1182 = vmatprep.subr.bf16.mxu1 %v1934_v12 }
 0x168   : > { %1142 = vmatpush1.bf16.msra.mxu0 %v1920_v8  ;;  %1183 = vmatpush1.bf16.msra.mxu1 %v1939_v16 }
 0x169   : > { %1447 = vmatprep.subr.bf16.mxu0 %v1926_v10  ;;  %1488 = vmatprep.subr.bf16.mxu1 %v1945_v17 }
 0x16b   : > { %1160 = vmatmul.mubr.bf16.vlgmr.msra.gmra.mxu0 %v934_v13  ;;  %1201 = vmatmul.mubr.bf16.vlgmr.msra.gmra.mxu1 %v934_v13 }
 0x16c   : > { %1448 = vmatpush1.bf16.msra.mxu0 %v1924_v14  ;;  %1479 = vmatprep.mubr.bf16.mxu0 %v2092_v44  ;;  %v1232_v14 = vld [vmem:[%s2382_s8] sm:$0xff] }
 0x16d   : > { %1449 = vmatprep.subr.bf16.mxu0 %v1932_v15  ;;  %1489 = vmatpush1.bf16.msra.mxu1 %v1943_v20 }
 0x16e   : > { %1490 = vmatprep.subr.bf16.mxu1 %v1951_v21  ;;  %1520 = vmatprep.mubr.bf16.mxu1 %v2092_v44  ;;  %v1978_v44 = vld [vmem:[#allocation6 + $0x10c] ss:$16 sps:$4 sm:$0xff]  }
 0x170   : > { %1450 = vmatpush1.bf16.msra.mxu0 %v1930_v18 }
 0x171   : > { %1451 = vmatprep.subr.bf16.mxu0 %v1938_v19  ;;  %1491 = vmatpush1.bf16.msra.mxu1 %v1949_v24 }
 0x172   : > { %1492 = vmatprep.subr.bf16.mxu1 %v1957_v25 }
 0x174   : > { %1452 = vmatpush1.bf16.msra.mxu0 %v1936_v22 }
 0x175   : > { %1453 = vmatprep.subr.bf16.mxu0 %v1942_v23  ;;  %1493 = vmatpush1.bf16.msra.mxu1 %v1955_v31  ;;  %v1250_v31 = vld [vmem:[%s1246_s20 + $0x18] sm:$0xff] }
 0x176   : > { %1494 = vmatprep.subr.bf16.mxu1 %v1963_v37 }
 0x178   : > { %1454 = vmatpush1.bf16.msra.mxu0 %v1940_v26 }
 0x179   : > { %1455 = vmatprep.subr.bf16.mxu0 %v1948_v27  ;;  %1495 = vmatpush1.bf16.msra.mxu1 %v1961_v40 }
 0x17a   : > { %1496 = vmatprep.subr.bf16.mxu1 %v1969_v41 }
 0x17c   : > { %1456 = vmatpush1.bf16.msra.mxu0 %v1946_v38 }
 0x17d   : > { %1457 = vmatprep.subr.bf16.mxu0 %v1954_v39  ;;  %1497 = vmatpush1.bf16.msra.mxu1 %v1967_v46  ;;  %v1249_v39 = vld [vmem:[%s1246_s20 + $0x10] sm:$0xff] }
 0x17e   : > { %1498 = vmatprep.subr.bf16.mxu1 %v1972_v47 }
 0x180   : > { %1458 = vmatpush1.bf16.msra.mxu0 %v1952_v42 }
 0x181   : > { %1459 = vmatprep.subr.bf16.mxu0 %v1960_v45  ;;  %1499 = vmatpush1.bf16.msra.mxu1 %v1970_v49 }
 0x182   : > { %1500 = vmatprep.subr.bf16.mxu1 %v1975_v30 }
 0x184   : > { %1460 = vmatpush1.bf16.msra.mxu0 %v1958_v48 }
 0x185   : > { %1461 = vmatprep.subr.bf16.mxu0 %v1966_v34  ;;  %1501 = vmatpush1.bf16.msra.mxu1 %v1973_v51 }
 0x186   : > { %1502 = vmatprep.subr.bf16.mxu1 %v1978_v44  ;;  %v1763_v44 = vld [vmem:[%s2382_s8 + $0x8] sm:$0xff] }
 0x188   : > { %1462 = vmatpush1.bf16.msra.mxu0 %v1964_v50 }
 0x189   : > { %1503 = vmatpush1.bf16.msra.mxu1 %v1976_v29 }
 0x18b   : > { %1480 = vmatmul.mubr.bf16.vlgmr.msra.gmra.mxu0 %v1253_v33 }
 0x18c   : > { %1521 = vmatmul.mubr.bf16.vlgmr.msra.gmra.mxu1 %v1253_v33 }
 0x22b   : > { %v1161_v36 = vpop.f32.mrf.mxu0  ;;  %v1202_v56 = vpop.f32.mrf.mxu1 }
 0x22c   : > { %v1209_v52 = vadd.f32 %v1161_v36, %v929_v35  ;;  %v1211_v2 = vadd.f32 %v1202_v56, %v931_v63 }
 0x22d   : > { %v1163_v28 = vpop.f32.mrf.mxu0  ;;  %v1204_v59 = vpop.f32.mrf.mxu1 }
 0x22e   : > { %v1721_v32 = vmul.f32 -1.442695, %v1209_v52  ;;  %v1210_v53 = vadd.f32 %v1163_v28, %v930_v1  ;;  %v1212_v61 = vadd.f32 %v1204_v59, %v932_v58 }
 0x22f   : > { %v1165_v54 = vpop.f32.mrf.mxu0  ;;  %v1206_v60 = vpop.f32.mrf.mxu1 }
 0x230   : > { %1979 = vpow2.f32 %v1721_v32  ;;  %v1722_v55 = vmul.f32 -1.442695, %v1210_v53  ;;  %v1723_v0 = vmul.f32 -1.442695, %v1212_v61 }
 0x231   : > { %v1166_v57 = vpop.f32.mrf.mxu0  ;;  %v1207_v62 = vpop.f32.mrf.mxu1 }
 0x232   : > { %1981 = vpow2.f32 %v1722_v55 }
 0x233   : > { %1983 = vpow2.f32 %v1723_v0 }
 0x234   : > { %1985 = vtanh.f32 %v1211_v2 }
 0x23d   : > { %v1980_v3 = vpop.eup %1979 }
 0x23e   : > { %v1216_v4 = vadd.f32 1.0, %v1980_v3 }
 0x23f   : > { %v1982_v5 = vpop.eup %1981 }
 0x240   : > { %1987 = vrcp.f32 %v1216_v4  ;;  %v1222_v6 = vadd.f32 1.0, %v1982_v5  ;;  %v1984_v8 = vpop.eup %1983 }
 0x241   : > { %v1986_v9 = vpop.eup %1985  ;;  %v1229_v15 = vadd.f32 1.0, %v1984_v8 }
 0x242   : > { %1989 = vrcp.f32 %v1222_v6 }
 0x24b   : > { %v1481_v10 = vpop.f32.mrf.mxu0 }
 0x24c   : > { %v1529_v12 = vadd.f32 %v1481_v10, %v1247_v7  ;;  %v1522_v24 = vpop.f32.mrf.mxu1 }
 0x24d   : > { %v1988_v13 = vpop.eup %1987  ;;  %v1483_v16 = vpop.f32.mrf.mxu0  ;;  %v1531_v41 = vadd.f32 %v1522_v24, %v1249_v39 }
 0x24e   : > { %v1234_v17 = vmul.f32 %v1988_v13, %v1986_v9  ;;  %v1760_v18 = vmul.f32 -1.442695, %v1529_v12  ;;  %v1530_v19 = vadd.f32 %v1483_v16, %v1248_v11  ;;  %v1524_v27 = vpop.f32.mrf.mxu1 }
 0x24f   : > { %v1990_v20 = vpop.eup %1989  ;;  %v1485_v21 = vpop.f32.mrf.mxu0  ;;  %v1532_v40 = vadd.f32 %v1524_v27, %v1250_v31 }
 0x250   : > { %v1233_v22 = vmul.f32 %v1990_v20, %v1232_v14  ;;  %1991 = vpow2.f32 %v1760_v18  ;;  %v1761_v23 = vmul.f32 -1.442695, %v1530_v19  ;;  %v1526_v37 = vpop.f32.mrf.mxu1 }
 0x251   : > { %1993 = vrcp.f32 %v1229_v15  ;;  %v1486_v25 = vpop.f32.mrf.mxu0  ;;  %v1762_v42 = vmul.f32 -1.442695, %v1532_v40 }
 0x252   : > { %v1235_v26 = vadd.f32 %v1234_v17, %v1233_v22  ;;  %1995 = vpow2.f32 %v1761_v23  ;;  %v1527_v38 = vpop.f32.mrf.mxu1 }
 0x254   : > { %1997 = vtanh.f32 %v1235_v26  ;;  %1242 = vst [vmem:[%s2382_s8] sm:$0xff] %v1235_v26 }
 0x255   : > { %1999 = vtanh.f32 %v1531_v41 }
 0x256   : > { %2001 = vpow2.f32 %v1762_v42 }
 0x25d   : > { %v1992_v45 = vpop.eup %1991 }
 0x25e   : > { %v1994_v46 = vpop.eup %1993  ;;  %v1536_v47 = vadd.f32 1.0, %v1992_v45 }
 0x25f   : > { %v1996_v48 = vpop.eup %1995 }
 0x260   : > { %2003 = vrcp.f32 %v1536_v47  ;;  %v1542_v34 = vadd.f32 1.0, %v1996_v48 }
 0x261   : > { %v1998_v49 = vpop.eup %1997 }
 0x262   : > { %v1237_v30 = vmul.f32 %v1998_v49, %v1994_v46  ;;  %2005 = vrcp.f32 %v1542_v34  ;;  %v2000_v50 = vpop.eup %1999 }
 0x263   : > { %v2002_v43 = vpop.eup %2001 }
 0x264   : > { %1240 = vst [vmem:[%s1239_s26] sm:$0xff] %v1237_v30  ;;  %1241 = vst [vmem:[%s2381_s7] sm:$0xff] %v1237_v30  ;;  %v1549_v29 = vadd.f32 1.0, %v2002_v43 }
 0x266   : > { %2007 = vrcp.f32 %v1549_v29 }
 0x26d   : > { %v2004_v51 = vpop.eup %2003 }
 0x26e   : > { %v1555_v36 = vmul.f32 %v2004_v51, %v2000_v50 }
 0x26f   : > { %v2006_v33 = vpop.eup %2005 }
 0x270   : > { %v1554_v35 = vmul.f32 %v2006_v33, %v1763_v44 }
 0x272   : > { %v1556_v1 = vadd.f32 %v1555_v36, %v1554_v35 }
 0x273   : > { %v2008_v52 = vpop.eup %2007 }
 0x274   : > { %2009 = vtanh.f32 %v1556_v1  ;;  %1766 = vst [vmem:[%s2382_s8 + $0x8] sm:$0xff] %v1556_v1 }
 0x280   :  { %924 = sbr.rel (!%p922_p1) target bundleno = 329 (0x149), region = 103 }
 0x281   : > { %v2010_v28 = vpop.eup %2009 }
 0x282   : > { %v1558_v32 = vmul.f32 %v2010_v28, %v2008_v52 }
 0x284   : > { %1561 = vst [vmem:[%s1560_s13] sm:$0xff] %v1558_v32  ;;  %1765 = vst [vmem:[%s2381_s7 + $0x8] sm:$0xff] %v1558_v32 }
 0x285   :  { %1594 = vsyncpa [#allocation5], 1 }
 0x286   :  { %1595 = vsyncpa [#allocation7], 1 }

// kernel: blstm_forward.4
= control target key start
LH: loop header
LB: loop body
LE: loop exit
PB: predicated region body
PF: predicated region fallthrough
CT: control target
= control target key end

     0   :  { %16 = vsyncpa [#allocation5], 0  ;;  %s3066_s13 = smov [#allocation4]   ;;  %s3949_s0 = inlined_call_operand.vmem [shape: f32[8,8,128], index: 0, kind: input, shape index: {}, may-alias: {0,2}]   ;;  %s3950_s1 = inlined_call_operand.vmem [shape: f32[8,8,128], index: 1, kind: input, shape index: {}, may-alias: {1,3}]   ;;  %s3951_s2 = inlined_call_operand.vmem [shape: f32[8,8,128], index: 2, kind: input, shape index: {}, may-alias: {0,2}]   ;;  %s3952_s3 = inlined_call_operand.vmem [shape: f32[8,8,128], index: 3, kind: input, shape index: {}, may-alias: {1,3}]   ;;  %s3953_s4 = inlined_call_operand.vmem [shape: bf16[2,2,128,512], index: 4, kind: input, shape index: {}]   ;;  %s3954_s5 = inlined_call_operand.hbm [shape: bf16[2,128,512], index: 5, kind: input, shape index: {}]   ;;  %s3955_s6 = inlined_call_operand.vmem [shape: f32[2,1,512], index: 6, kind: input, shape index: {}]   ;;  %s3956_s7 = inlined_call_operand.vmem [shape: f32[8,8,128], index: 7, kind: output, shape index: {0}]   ;;  %s3957_s8 = inlined_call_operand.vmem [shape: f32[8,8,128], index: 8, kind: output, shape index: {1}]   ;;  %s3958_s9 = inlined_call_operand.vmem [shape: f32[2,8,128], index: 9, kind: output, shape index: {2}]   ;;  %s3959_s10 = inlined_call_operand.vmem [shape: f32[2,8,128], index: 10, kind: output, shape index: {3}]  }
   0x1   :  { %s48_s14 = sshll.u32 %s3066_s13, 4  ;;  %s49_s14 = int_to_ptr.vmem [resolvable:$true] %s48_s14 }
   0x2   :  { %s3044_s15 = scalar_lea.vmem %s49_s14, 8192  ;;  %p3049_p1 = scmp.lt.s32.totalorder %s49_s14, %s49_s14 }
   0x3   :  { %p3045_p0 = scmp.ne.s32.totalorder %s49_s14, %s3044_s15  ;;  %p3050_p2 = scmp.lt.s32.totalorder %s3044_s15, %s3044_s15 }
   0x5   :  { %p3051_p3 = por %p3050_p2, %p3049_p1 }
   0x7   :  { %p3052_p4 = pnand %p3051_p3, %p3045_p0 }
   0x9   :  { %3055 = shalt.err (!%p3052_p4)
}
   0xa   :  { %s3067_s16 = smov 256   ;;  %s3068_s17 = smov 16  }
   0xb   :  { %54 = dma.hbm_to_vmem [thread:$0]  %s3954_s5, 8192, %s49_s14, [#allocation5], %s3067_s16, %s3067_s16, %s3068_s17  }
   0xc   :  { %3060 = dma.done.wait [#allocation5], 8192  }
   0xd   :  { %3061 = vsyncadd [#allocation5], 4294959104  ;;  %v3069_v0 = vmov 0.0   ;;  %v3070_v1 = vmov 0   ;;  %v2716_v2 = vld [vmem:[%s3953_s4 + $0x1e4] ss:$16 sps:$4 sm:$0xff]  }
   0xe   :  { %107 = vst [vmem:[%s3958_s9] sm:$0xff] %v3069_v0  ;;  %108 = vst [vmem:[%s3958_s9 + $0x8] sm:$0xff] %v3069_v0  ;;  %392 = vmatprep.mubr.bf16.mxu0 %v3070_v1  ;;  %465 = vmatprep.mubr.bf16.mxu1 %v3070_v1  ;;  %v2718_v3 = vld [vmem:[%s3953_s4 + $0x1ec] ss:$16 sps:$4 sm:$0xff]   ;;  %v2720_v4 = vld [vmem:[%s3953_s4 + $0x1e0] ss:$16 sps:$4 sm:$0xff]  }
   0xf   :  { %109 = vst [vmem:[%s3959_s10] sm:$0xff] %v3069_v0  ;;  %110 = vst [vmem:[%s3959_s10 + $0x8] sm:$0xff] %v3069_v0  ;;  %360 = vmatprep.subr.bf16.mxu0 %v2716_v2  ;;  %v2721_v5 = vld [vmem:[%s3953_s4 + $0x1e8] ss:$16 sps:$4 sm:$0xff]   ;;  %433 = vmatprep.subr.bf16.mxu1 %v2718_v3  ;;  %v2722_v6 = vld [vmem:[%s3953_s4 + $0x1c4] ss:$16 sps:$4 sm:$0xff]  }
  0x10   :  { %361 = vmatpush1.bf16.msra.mxu0 %v2720_v4  ;;  %434 = vmatpush1.bf16.msra.mxu1 %v2721_v5  ;;  %v2724_v7 = vld [vmem:[%s3953_s4 + $0x1cc] ss:$16 sps:$4 sm:$0xff]   ;;  %v2726_v8 = vld [vmem:[%s3953_s4 + $0x1c0] ss:$16 sps:$4 sm:$0xff]   ;;  %v2727_v9 = vld [vmem:[%s3953_s4 + $0x1c8] ss:$16 sps:$4 sm:$0xff]  }
  0x11   :  { %362 = vmatprep.subr.bf16.mxu0 %v2722_v6  ;;  %435 = vmatprep.subr.bf16.mxu1 %v2724_v7  ;;  %v2728_v10 = vld [vmem:[%s3953_s4 + $0x1a4] ss:$16 sps:$4 sm:$0xff]   ;;  %v2730_v11 = vld [vmem:[%s3953_s4 + $0x1ac] ss:$16 sps:$4 sm:$0xff]   ;;  %v2732_v12 = vld [vmem:[%s3953_s4 + $0x1a0] ss:$16 sps:$4 sm:$0xff]  }
  0x12   :  { %v2733_v13 = vld [vmem:[%s3953_s4 + $0x1a8] ss:$16 sps:$4 sm:$0xff]   ;;  %v2734_v14 = vld [vmem:[%s3953_s4 + $0x184] ss:$16 sps:$4 sm:$0xff]   ;;  %v2736_v15 = vld [vmem:[%s3953_s4 + $0x18c] ss:$16 sps:$4 sm:$0xff]  }
  0x13   :  { %v2738_v16 = vld [vmem:[%s3953_s4 + $0x180] ss:$16 sps:$4 sm:$0xff]   ;;  %v2739_v17 = vld [vmem:[%s3953_s4 + $0x188] ss:$16 sps:$4 sm:$0xff]   ;;  %v2740_v18 = vld [vmem:[%s3953_s4 + $0x164] ss:$16 sps:$4 sm:$0xff]  }
  0x14   :  { %363 = vmatpush1.bf16.msra.mxu0 %v2726_v8  ;;  %436 = vmatpush1.bf16.msra.mxu1 %v2727_v9  ;;  %v2742_v19 = vld [vmem:[%s3953_s4 + $0x16c] ss:$16 sps:$4 sm:$0xff]   ;;  %v2744_v20 = vld [vmem:[%s3953_s4 + $0x160] ss:$16 sps:$4 sm:$0xff]   ;;  %v2745_v21 = vld [vmem:[%s3953_s4 + $0x168] ss:$16 sps:$4 sm:$0xff]  }
  0x15   :  { %364 = vmatprep.subr.bf16.mxu0 %v2728_v10  ;;  %437 = vmatprep.subr.bf16.mxu1 %v2730_v11  ;;  %v2746_v22 = vld [vmem:[%s3953_s4 + $0x144] ss:$16 sps:$4 sm:$0xff]   ;;  %v2748_v23 = vld [vmem:[%s3953_s4 + $0x14c] ss:$16 sps:$4 sm:$0xff]   ;;  %v2750_v24 = vld [vmem:[%s3953_s4 + $0x140] ss:$16 sps:$4 sm:$0xff]  }
  0x16   :  { %v2751_v25 = vld [vmem:[%s3953_s4 + $0x148] ss:$16 sps:$4 sm:$0xff]   ;;  %v2752_v26 = vld [vmem:[%s3953_s4 + $0x124] ss:$16 sps:$4 sm:$0xff]   ;;  %v2754_v27 = vld [vmem:[%s3953_s4 + $0x12c] ss:$16 sps:$4 sm:$0xff]  }
  0x17   :  { %v2756_v28 = vld [vmem:[%s3953_s4 + $0x120] ss:$16 sps:$4 sm:$0xff]   ;;  %v2757_v29 = vld [vmem:[%s3953_s4 + $0x128] ss:$16 sps:$4 sm:$0xff]   ;;  %v2758_v30 = vld [vmem:[%s3953_s4 + $0x104] ss:$16 sps:$4 sm:$0xff]  }
  0x18   :  { %365 = vmatpush1.bf16.msra.mxu0 %v2732_v12  ;;  %438 = vmatpush1.bf16.msra.mxu1 %v2733_v13  ;;  %v2760_v31 = vld [vmem:[%s3953_s4 + $0x10c] ss:$16 sps:$4 sm:$0xff]   ;;  %v2762_v32 = vld [vmem:[%s3953_s4 + $0x100] ss:$16 sps:$4 sm:$0xff]   ;;  %v2763_v33 = vld [vmem:[%s3953_s4 + $0x108] ss:$16 sps:$4 sm:$0xff]  }
  0x19   :  { %366 = vmatprep.subr.bf16.mxu0 %v2734_v14  ;;  %439 = vmatprep.subr.bf16.mxu1 %v2736_v15  ;;  %v119_v34 = vld [vmem:[%s3950_s1] sm:$0xff]  ;;  %v120_v35 = vld [vmem:[%s3950_s1 + $0x8] sm:$0xff]  ;;  %v121_v45 = vld [vmem:[%s3950_s1 + $0x10] sm:$0xff] }
  0x1a   :  { %v2766_v36 = vld [vmem:[%s3953_s4 + $0xe4] ss:$16 sps:$4 sm:$0xff]   ;;  %v2769_v37 = vld [vmem:[%s3953_s4 + $0xec] ss:$16 sps:$4 sm:$0xff]   ;;  %v163_v38 = vpack.c.bf16 %v120_v35, %v119_v34  ;;  %v2764_v39 = vld [vmem:[%s3953_s4 + $0xe0] ss:$16 sps:$4 sm:$0xff]  }
  0x1b   :  { %v2767_v40 = vld [vmem:[%s3953_s4 + $0xe8] ss:$16 sps:$4 sm:$0xff]   ;;  %v2772_v41 = vld [vmem:[%s3953_s4 + $0xc4] ss:$16 sps:$4 sm:$0xff]   ;;  %v2775_v42 = vld [vmem:[%s3953_s4 + $0xcc] ss:$16 sps:$4 sm:$0xff]  }
  0x1c   :  { %367 = vmatpush1.bf16.msra.mxu0 %v2738_v16  ;;  %440 = vmatpush1.bf16.msra.mxu1 %v2739_v17  ;;  %v2770_v43 = vld [vmem:[%s3953_s4 + $0xc0] ss:$16 sps:$4 sm:$0xff]   ;;  %v2773_v44 = vld [vmem:[%s3953_s4 + $0xc8] ss:$16 sps:$4 sm:$0xff]   ;;  %v2778_v47 = vld [vmem:[%s3953_s4 + $0xa4] ss:$16 sps:$4 sm:$0xff]  }
  0x1d   :  { %368 = vmatprep.subr.bf16.mxu0 %v2740_v18  ;;  %441 = vmatprep.subr.bf16.mxu1 %v2742_v19  ;;  %v122_v46 = vld [vmem:[%s3950_s1 + $0x18] sm:$0xff]  ;;  %v2776_v50 = vld [vmem:[%s3953_s4 + $0xa0] ss:$16 sps:$4 sm:$0xff]   ;;  %v2784_v52 = vld [vmem:[%s3953_s4 + $0x84] ss:$16 sps:$4 sm:$0xff]  }
  0x1e   :  { %v2781_v48 = vld [vmem:[%s3953_s4 + $0xac] ss:$16 sps:$4 sm:$0xff]   ;;  %v164_v49 = vpack.c.bf16 %v122_v46, %v121_v45  ;;  %v2779_v51 = vld [vmem:[%s3953_s4 + $0xa8] ss:$16 sps:$4 sm:$0xff]   ;;  %v2782_v54 = vld [vmem:[%s3953_s4 + $0x80] ss:$16 sps:$4 sm:$0xff]  }
  0x1f   :  { %v2787_v53 = vld [vmem:[%s3953_s4 + $0x8c] ss:$16 sps:$4 sm:$0xff]   ;;  %v2785_v55 = vld [vmem:[%s3953_s4 + $0x88] ss:$16 sps:$4 sm:$0xff]   ;;  %v123_v56 = vld [vmem:[%s3950_s1 + $0x20] sm:$0xff] }
  0x20   :  { %369 = vmatpush1.bf16.msra.mxu0 %v2744_v20  ;;  %442 = vmatpush1.bf16.msra.mxu1 %v2745_v21  ;;  %v124_v57 = vld [vmem:[%s3950_s1 + $0x28] sm:$0xff]  ;;  %v2790_v58 = vld [vmem:[%s3953_s4 + $0x64] ss:$16 sps:$4 sm:$0xff]   ;;  %v2788_v61 = vld [vmem:[%s3953_s4 + $0x60] ss:$16 sps:$4 sm:$0xff]  }
  0x21   :  { %370 = vmatprep.subr.bf16.mxu0 %v2746_v22  ;;  %443 = vmatprep.subr.bf16.mxu1 %v2748_v23  ;;  %v2793_v59 = vld [vmem:[%s3953_s4 + $0x6c] ss:$16 sps:$4 sm:$0xff]   ;;  %v165_v60 = vpack.c.bf16 %v124_v57, %v123_v56  ;;  %v2791_v62 = vld [vmem:[%s3953_s4 + $0x68] ss:$16 sps:$4 sm:$0xff]   ;;  %v2796_v63 = vld [vmem:[%s3953_s4 + $0x44] ss:$16 sps:$4 sm:$0xff]  }
  0x22   :  { %v2799_v0 = vld [vmem:[%s3953_s4 + $0x4c] ss:$16 sps:$4 sm:$0xff]   ;;  %v2794_v2 = vld [vmem:[%s3953_s4 + $0x40] ss:$16 sps:$4 sm:$0xff]   ;;  %v2797_v3 = vld [vmem:[%s3953_s4 + $0x48] ss:$16 sps:$4 sm:$0xff]  }
  0x23   :  { %v125_v4 = vld [vmem:[%s3950_s1 + $0x30] sm:$0xff]  ;;  %v126_v5 = vld [vmem:[%s3950_s1 + $0x38] sm:$0xff]  ;;  %v111_v15 = vld [vmem:[%s3949_s0] sm:$0xff] }
  0x24   :  { %371 = vmatpush1.bf16.msra.mxu0 %v2750_v24  ;;  %444 = vmatpush1.bf16.msra.mxu1 %v2751_v25  ;;  %v2802_v6 = vld [vmem:[%s3953_s4 + $0x24] ss:$16 sps:$4 sm:$0xff]   ;;  %v2805_v7 = vld [vmem:[%s3953_s4 + $0x2c] ss:$16 sps:$4 sm:$0xff]   ;;  %v166_v8 = vpack.c.bf16 %v126_v5, %v125_v4  ;;  %v2800_v9 = vld [vmem:[%s3953_s4 + $0x20] ss:$16 sps:$4 sm:$0xff]  }
  0x25   :  { %372 = vmatprep.subr.bf16.mxu0 %v2752_v26  ;;  %445 = vmatprep.subr.bf16.mxu1 %v2754_v27  ;;  %v2803_v10 = vld [vmem:[%s3953_s4 + $0x28] ss:$16 sps:$4 sm:$0xff]   ;;  %v2808_v11 = vld [vmem:[%s3953_s4 + $0x4] ss:$16 sps:$4 sm:$0xff]   ;;  %v2811_v12 = vld [vmem:[%s3953_s4 + $0xc] ss:$16 sps:$4 sm:$0xff]  }
  0x26   :  { %v2806_v13 = vld [vmem:[%s3953_s4] ss:$16 sps:$4 sm:$0xff]   ;;  %v2809_v14 = vld [vmem:[%s3953_s4 + $0x8] ss:$16 sps:$4 sm:$0xff]   ;;  %v2814_v17 = vld [vmem:[%s3953_s4 + $0x3e4] ss:$16 sps:$4 sm:$0xff]  }
  0x27   :  { %v112_v16 = vld [vmem:[%s3949_s0 + $0x8] sm:$0xff]  ;;  %v2812_v20 = vld [vmem:[%s3953_s4 + $0x3e0] ss:$16 sps:$4 sm:$0xff]   ;;  %v2820_v22 = vld [vmem:[%s3953_s4 + $0x3c4] ss:$16 sps:$4 sm:$0xff]  }
  0x28   :  { %373 = vmatpush1.bf16.msra.mxu0 %v2756_v28  ;;  %446 = vmatpush1.bf16.msra.mxu1 %v2757_v29  ;;  %v2817_v18 = vld [vmem:[%s3953_s4 + $0x3ec] ss:$16 sps:$4 sm:$0xff]   ;;  %v127_v19 = vpack.c.bf16 %v112_v16, %v111_v15  ;;  %v2815_v21 = vld [vmem:[%s3953_s4 + $0x3e8] ss:$16 sps:$4 sm:$0xff]   ;;  %v2818_v24 = vld [vmem:[%s3953_s4 + $0x3c0] ss:$16 sps:$4 sm:$0xff]  }
  0x29   :  { %374 = vmatprep.subr.bf16.mxu0 %v2758_v30  ;;  %447 = vmatprep.subr.bf16.mxu1 %v2760_v31  ;;  %v2823_v23 = vld [vmem:[%s3953_s4 + $0x3cc] ss:$16 sps:$4 sm:$0xff]   ;;  %v2821_v25 = vld [vmem:[%s3953_s4 + $0x3c8] ss:$16 sps:$4 sm:$0xff]   ;;  %v113_v26 = vld [vmem:[%s3949_s0 + $0x10] sm:$0xff] }
  0x2a   :  { %v114_v27 = vld [vmem:[%s3949_s0 + $0x18] sm:$0xff]  ;;  %v2826_v28 = vld [vmem:[%s3953_s4 + $0x3a4] ss:$16 sps:$4 sm:$0xff]   ;;  %v2824_v31 = vld [vmem:[%s3953_s4 + $0x3a0] ss:$16 sps:$4 sm:$0xff]  }
  0x2b   :  { %v2829_v29 = vld [vmem:[%s3953_s4 + $0x3ac] ss:$16 sps:$4 sm:$0xff]   ;;  %v128_v30 = vpack.c.bf16 %v114_v27, %v113_v26  ;;  %v2830_v35 = vld [vmem:[%s3953_s4 + $0x380] ss:$16 sps:$4 sm:$0xff]  }
  0x2c   :  { %375 = vmatpush1.bf16.msra.mxu0 %v2762_v32  ;;  %448 = vmatpush1.bf16.msra.mxu1 %v2763_v33  ;;  %v2827_v32 = vld [vmem:[%s3953_s4 + $0x3a8] ss:$16 sps:$4 sm:$0xff]   ;;  %v2832_v33 = vld [vmem:[%s3953_s4 + $0x384] ss:$16 sps:$4 sm:$0xff]   ;;  %v2835_v34 = vld [vmem:[%s3953_s4 + $0x38c] ss:$16 sps:$4 sm:$0xff]  }
  0x2d   :  { %666 = vmatprep.subr.bf16.mxu0 %v2766_v36  ;;  %739 = vmatprep.subr.bf16.mxu1 %v2769_v37  ;;  %v2833_v36 = vld [vmem:[%s3953_s4 + $0x388] ss:$16 sps:$4 sm:$0xff]   ;;  %v115_v37 = vld [vmem:[%s3949_s0 + $0x20] sm:$0xff]  ;;  %v2847_v45 = vld [vmem:[%s3953_s4 + $0x34c] ss:$16 sps:$4 sm:$0xff]  }
  0x2e   :  { %v2842_v46 = vld [vmem:[%s3953_s4 + $0x340] ss:$16 sps:$4 sm:$0xff]   ;;  %v2859_v56 = vld [vmem:[%s3953_s4 + $0x30c] ss:$16 sps:$4 sm:$0xff]  }
  0x2f   :  { %393 = vmatmul.mubr.bf16.vlgmr.msra.gmra.mxu0 %v163_v38  ;;  %466 = vmatmul.mubr.bf16.vlgmr.msra.gmra.mxu1 %v163_v38  ;;  %v116_v38 = vld [vmem:[%s3949_s0 + $0x28] sm:$0xff]  ;;  %v2854_v57 = vld [vmem:[%s3953_s4 + $0x300] ss:$16 sps:$4 sm:$0xff]  }
  0x30   :  { %667 = vmatpush1.bf16.msra.mxu0 %v2764_v39  ;;  %740 = vmatpush1.bf16.msra.mxu1 %v2767_v40  ;;  %v2838_v39 = vld [vmem:[%s3953_s4 + $0x364] ss:$16 sps:$4 sm:$0xff]   ;;  %v2841_v40 = vld [vmem:[%s3953_s4 + $0x36c] ss:$16 sps:$4 sm:$0xff]   ;;  %v2866_v5 = vld [vmem:[%s3953_s4 + $0x2c0] ss:$16 sps:$4 sm:$0xff]  }
  0x31   :  { %668 = vmatprep.subr.bf16.mxu0 %v2772_v41  ;;  %741 = vmatprep.subr.bf16.mxu1 %v2775_v42  ;;  %v129_v41 = vpack.c.bf16 %v116_v38, %v115_v37  ;;  %v2836_v42 = vld [vmem:[%s3953_s4 + $0x360] ss:$16 sps:$4 sm:$0xff]   ;;  %v2871_v4 = vld [vmem:[%s3953_s4 + $0x2cc] ss:$16 sps:$4 sm:$0xff]  }
  0x32   :  { %402 = vmatprep.mubr.bf16.mxu0 %v3070_v1  ;;  %475 = vmatprep.mubr.bf16.mxu1 %v3070_v1  ;;  %v2883_v15 = vld [vmem:[%s3953_s4 + $0x28c] ss:$16 sps:$4 sm:$0xff]   ;;  %v2878_v16 = vld [vmem:[%s3953_s4 + $0x280] ss:$16 sps:$4 sm:$0xff]  }
  0x33   :  { %v2895_v26 = vld [vmem:[%s3953_s4 + $0x24c] ss:$16 sps:$4 sm:$0xff]   ;;  %v2890_v27 = vld [vmem:[%s3953_s4 + $0x240] ss:$16 sps:$4 sm:$0xff]  }
  0x34   :  { %669 = vmatpush1.bf16.msra.mxu0 %v2770_v43  ;;  %742 = vmatpush1.bf16.msra.mxu1 %v2773_v44  ;;  %v2839_v43 = vld [vmem:[%s3953_s4 + $0x368] ss:$16 sps:$4 sm:$0xff]   ;;  %v2844_v44 = vld [vmem:[%s3953_s4 + $0x344] ss:$16 sps:$4 sm:$0xff]   ;;  %v2907_v37 = vld [vmem:[%s3953_s4 + $0x20c] ss:$16 sps:$4 sm:$0xff]  }
  0x35   :  { %670 = vmatprep.subr.bf16.mxu0 %v2778_v47  ;;  %743 = vmatprep.subr.bf16.mxu1 %v2781_v48  ;;  %v2845_v47 = vld [vmem:[%s3953_s4 + $0x348] ss:$16 sps:$4 sm:$0xff]   ;;  %v117_v48 = vld [vmem:[%s3949_s0 + $0x30] sm:$0xff] }
  0x36   :  { %v2902_v38 = vld [vmem:[%s3953_s4 + $0x200] ss:$16 sps:$4 sm:$0xff]  }
  0x37   :  { %403 = vmatmul.mubr.bf16.gmra.mxu0 %v164_v49  ;;  %476 = vmatmul.mubr.bf16.gmra.mxu1 %v164_v49  ;;  %v118_v49 = vld [vmem:[%s3949_s0 + $0x38] sm:$0xff] }
  0x38   :  { %671 = vmatpush1.bf16.msra.mxu0 %v2776_v50  ;;  %744 = vmatpush1.bf16.msra.mxu1 %v2779_v51  ;;  %v2850_v50 = vld [vmem:[%s3953_s4 + $0x324] ss:$16 sps:$4 sm:$0xff]   ;;  %v2853_v51 = vld [vmem:[%s3953_s4 + $0x32c] ss:$16 sps:$4 sm:$0xff]  }
  0x39   :  { %672 = vmatprep.subr.bf16.mxu0 %v2784_v52  ;;  %745 = vmatprep.subr.bf16.mxu1 %v2787_v53  ;;  %v130_v52 = vpack.c.bf16 %v118_v49, %v117_v48  ;;  %v2848_v53 = vld [vmem:[%s3953_s4 + $0x320] ss:$16 sps:$4 sm:$0xff]  }
  0x3a   :  { %412 = vmatprep.mubr.bf16.mxu0 %v3070_v1  ;;  %485 = vmatprep.mubr.bf16.mxu1 %v3070_v1  ;;  %v904_v49 = vld [vmem:[%s3951_s2 + $0x30] sm:$0xff] }
  0x3c   :  { %673 = vmatpush1.bf16.msra.mxu0 %v2782_v54  ;;  %746 = vmatpush1.bf16.msra.mxu1 %v2785_v55  ;;  %v2851_v54 = vld [vmem:[%s3953_s4 + $0x328] ss:$16 sps:$4 sm:$0xff]   ;;  %v2856_v55 = vld [vmem:[%s3953_s4 + $0x304] ss:$16 sps:$4 sm:$0xff]  }
  0x3d   :  { %674 = vmatprep.subr.bf16.mxu0 %v2790_v58  ;;  %747 = vmatprep.subr.bf16.mxu1 %v2793_v59  ;;  %v2857_v58 = vld [vmem:[%s3953_s4 + $0x308] ss:$16 sps:$4 sm:$0xff]   ;;  %v906_v59 = vld [vmem:[%s3952_s3] sm:$0xff] }
  0x3f   :  { %413 = vmatmul.mubr.bf16.gmra.mxu0 %v165_v60  ;;  %486 = vmatmul.mubr.bf16.gmra.mxu1 %v165_v60  ;;  %v907_v60 = vld [vmem:[%s3952_s3 + $0x8] sm:$0xff] }
  0x40   :  { %675 = vmatpush1.bf16.msra.mxu0 %v2788_v61  ;;  %748 = vmatpush1.bf16.msra.mxu1 %v2791_v62  ;;  %v2862_v61 = vld [vmem:[%s3953_s4 + $0x2e4] ss:$16 sps:$4 sm:$0xff]   ;;  %v2865_v62 = vld [vmem:[%s3953_s4 + $0x2ec] ss:$16 sps:$4 sm:$0xff]  }
  0x41   :  { %676 = vmatprep.subr.bf16.mxu0 %v2796_v63  ;;  %749 = vmatprep.subr.bf16.mxu1 %v2799_v0  ;;  %v951_v63 = vpack.c.bf16 %v907_v60, %v906_v59  ;;  %v2860_v0 = vld [vmem:[%s3953_s4 + $0x2e0] ss:$16 sps:$4 sm:$0xff]  }
  0x42   :  { %422 = vmatprep.mubr.bf16.mxu0 %v3070_v1  ;;  %495 = vmatprep.mubr.bf16.mxu1 %v3070_v1 }
  0x44   :  { %677 = vmatpush1.bf16.msra.mxu0 %v2794_v2  ;;  %750 = vmatpush1.bf16.msra.mxu1 %v2797_v3  ;;  %v2863_v2 = vld [vmem:[%s3953_s4 + $0x2e8] ss:$16 sps:$4 sm:$0xff]   ;;  %v2868_v3 = vld [vmem:[%s3953_s4 + $0x2c4] ss:$16 sps:$4 sm:$0xff]  }
  0x45   :  { %678 = vmatprep.subr.bf16.mxu0 %v2802_v6  ;;  %751 = vmatprep.subr.bf16.mxu1 %v2805_v7  ;;  %v2869_v6 = vld [vmem:[%s3953_s4 + $0x2c8] ss:$16 sps:$4 sm:$0xff]   ;;  %v908_v7 = vld [vmem:[%s3952_s3 + $0x10] sm:$0xff] }
  0x47   :  { %423 = vmatmul.mubr.bf16.gmra.mxu0 %v166_v8  ;;  %496 = vmatmul.mubr.bf16.gmra.mxu1 %v166_v8  ;;  %v909_v8 = vld [vmem:[%s3952_s3 + $0x18] sm:$0xff] }
  0x48   :  { %679 = vmatpush1.bf16.msra.mxu0 %v2800_v9  ;;  %752 = vmatpush1.bf16.msra.mxu1 %v2803_v10  ;;  %v2874_v9 = vld [vmem:[%s3953_s4 + $0x2a4] ss:$16 sps:$4 sm:$0xff]   ;;  %v2877_v10 = vld [vmem:[%s3953_s4 + $0x2ac] ss:$16 sps:$4 sm:$0xff]  }
  0x49   :  { %680 = vmatprep.subr.bf16.mxu0 %v2808_v11  ;;  %753 = vmatprep.subr.bf16.mxu1 %v2811_v12  ;;  %v952_v11 = vpack.c.bf16 %v909_v8, %v908_v7  ;;  %v2872_v12 = vld [vmem:[%s3953_s4 + $0x2a0] ss:$16 sps:$4 sm:$0xff]   ;;  %v814_v8 = vlaneseq }
  0x4a   :  { %698 = vmatprep.mubr.bf16.mxu0 %v3070_v1  ;;  %771 = vmatprep.mubr.bf16.mxu1 %v3070_v1 }
  0x4c   :  { %681 = vmatpush1.bf16.msra.mxu0 %v2806_v13  ;;  %754 = vmatpush1.bf16.msra.mxu1 %v2809_v14  ;;  %v2875_v13 = vld [vmem:[%s3953_s4 + $0x2a8] ss:$16 sps:$4 sm:$0xff]   ;;  %v2880_v14 = vld [vmem:[%s3953_s4 + $0x284] ss:$16 sps:$4 sm:$0xff]  }
  0x4d   :  { %1148 = vmatprep.subr.bf16.mxu0 %v2814_v17  ;;  %1221 = vmatprep.subr.bf16.mxu1 %v2817_v18  ;;  %v2881_v17 = vld [vmem:[%s3953_s4 + $0x288] ss:$16 sps:$4 sm:$0xff]   ;;  %v910_v18 = vld [vmem:[%s3952_s3 + $0x20] sm:$0xff] }
  0x4f   :  { %699 = vmatmul.mubr.bf16.vlgmr.msra.gmra.mxu0 %v127_v19  ;;  %772 = vmatmul.mubr.bf16.vlgmr.msra.gmra.mxu1 %v127_v19  ;;  %v911_v19 = vld [vmem:[%s3952_s3 + $0x28] sm:$0xff] }
  0x50   :  { %1149 = vmatpush1.bf16.msra.mxu0 %v2812_v20  ;;  %1222 = vmatpush1.bf16.msra.mxu1 %v2815_v21  ;;  %v2886_v20 = vld [vmem:[%s3953_s4 + $0x264] ss:$16 sps:$4 sm:$0xff]   ;;  %v2889_v21 = vld [vmem:[%s3953_s4 + $0x26c] ss:$16 sps:$4 sm:$0xff]  }
  0x51   :  { %1150 = vmatprep.subr.bf16.mxu0 %v2820_v22  ;;  %1223 = vmatprep.subr.bf16.mxu1 %v2823_v23  ;;  %v953_v22 = vpack.c.bf16 %v911_v19, %v910_v18  ;;  %v2884_v23 = vld [vmem:[%s3953_s4 + $0x260] ss:$16 sps:$4 sm:$0xff]  }
  0x52   :  { %708 = vmatprep.mubr.bf16.mxu0 %v3070_v1  ;;  %781 = vmatprep.mubr.bf16.mxu1 %v3070_v1 }
  0x54   :  { %1151 = vmatpush1.bf16.msra.mxu0 %v2818_v24  ;;  %1224 = vmatpush1.bf16.msra.mxu1 %v2821_v25  ;;  %v2887_v24 = vld [vmem:[%s3953_s4 + $0x268] ss:$16 sps:$4 sm:$0xff]   ;;  %v2892_v25 = vld [vmem:[%s3953_s4 + $0x244] ss:$16 sps:$4 sm:$0xff]  }
  0x55   :  { %1152 = vmatprep.subr.bf16.mxu0 %v2826_v28  ;;  %1225 = vmatprep.subr.bf16.mxu1 %v2829_v29  ;;  %v2893_v28 = vld [vmem:[%s3953_s4 + $0x248] ss:$16 sps:$4 sm:$0xff]   ;;  %v912_v29 = vld [vmem:[%s3952_s3 + $0x30] sm:$0xff] }
  0x57   :  { %709 = vmatmul.mubr.bf16.gmra.mxu0 %v128_v30  ;;  %782 = vmatmul.mubr.bf16.gmra.mxu1 %v128_v30  ;;  %v913_v30 = vld [vmem:[%s3952_s3 + $0x38] sm:$0xff] }
  0x58   :  { %1153 = vmatpush1.bf16.msra.mxu0 %v2824_v31  ;;  %1226 = vmatpush1.bf16.msra.mxu1 %v2827_v32  ;;  %v2898_v31 = vld [vmem:[%s3953_s4 + $0x224] ss:$16 sps:$4 sm:$0xff]   ;;  %v2901_v32 = vld [vmem:[%s3953_s4 + $0x22c] ss:$16 sps:$4 sm:$0xff]  }
  0x59   :  { %1154 = vmatprep.subr.bf16.mxu0 %v2832_v33  ;;  %1227 = vmatprep.subr.bf16.mxu1 %v2835_v34  ;;  %v954_v33 = vpack.c.bf16 %v913_v30, %v912_v29  ;;  %v2896_v34 = vld [vmem:[%s3953_s4 + $0x220] ss:$16 sps:$4 sm:$0xff]  }
  0x5a   :  { %718 = vmatprep.mubr.bf16.mxu0 %v3070_v1  ;;  %791 = vmatprep.mubr.bf16.mxu1 %v3070_v1 }
  0x5c   :  { %1155 = vmatpush1.bf16.msra.mxu0 %v2830_v35  ;;  %1228 = vmatpush1.bf16.msra.mxu1 %v2833_v36  ;;  %v2899_v35 = vld [vmem:[%s3953_s4 + $0x228] ss:$16 sps:$4 sm:$0xff]   ;;  %v2904_v36 = vld [vmem:[%s3953_s4 + $0x204] ss:$16 sps:$4 sm:$0xff]  }
  0x5d   :  { %1156 = vmatprep.subr.bf16.mxu0 %v2838_v39  ;;  %1229 = vmatprep.subr.bf16.mxu1 %v2841_v40  ;;  %v2905_v39 = vld [vmem:[%s3953_s4 + $0x208] ss:$16 sps:$4 sm:$0xff]   ;;  %v898_v40 = vld [vmem:[%s3951_s2] sm:$0xff] }
  0x5f   :  { %719 = vmatmul.mubr.bf16.gmra.mxu0 %v129_v41  ;;  %792 = vmatmul.mubr.bf16.gmra.mxu1 %v129_v41  ;;  %v899_v41 = vld [vmem:[%s3951_s2 + $0x8] sm:$0xff] }
  0x60   :  { %1157 = vmatpush1.bf16.msra.mxu0 %v2836_v42  ;;  %1230 = vmatpush1.bf16.msra.mxu1 %v2839_v43  ;;  %v914_v42 = vpack.c.bf16 %v899_v41, %v898_v40  ;;  %v900_v43 = vld [vmem:[%s3951_s2 + $0x10] sm:$0xff] }
  0x61   :  { %1158 = vmatprep.subr.bf16.mxu0 %v2844_v44  ;;  %1231 = vmatprep.subr.bf16.mxu1 %v2847_v45  ;;  %v901_v44 = vld [vmem:[%s3951_s2 + $0x18] sm:$0xff] }
  0x62   :  { %728 = vmatprep.mubr.bf16.mxu0 %v3070_v1  ;;  %801 = vmatprep.mubr.bf16.mxu1 %v3070_v1  ;;  %v915_v45 = vpack.c.bf16 %v901_v44, %v900_v43 }
  0x64   :  { %1159 = vmatpush1.bf16.msra.mxu0 %v2842_v46  ;;  %1232 = vmatpush1.bf16.msra.mxu1 %v2845_v47  ;;  %v902_v46 = vld [vmem:[%s3951_s2 + $0x20] sm:$0xff]  ;;  %v903_v47 = vld [vmem:[%s3951_s2 + $0x28] sm:$0xff] }
  0x65   :  { %1160 = vmatprep.subr.bf16.mxu0 %v2850_v50  ;;  %1233 = vmatprep.subr.bf16.mxu1 %v2853_v51  ;;  %v916_v48 = vpack.c.bf16 %v903_v47, %v902_v46  ;;  %v905_v50 = vld [vmem:[%s3951_s2 + $0x38] sm:$0xff] }
  0x66   :  { %v917_v51 = vpack.c.bf16 %v905_v50, %v904_v49 }
  0x67   :  { %729 = vmatmul.mubr.bf16.gmra.mxu0 %v130_v52  ;;  %802 = vmatmul.mubr.bf16.gmra.mxu1 %v130_v52 }
  0x68   :  { %1161 = vmatpush1.bf16.msra.mxu0 %v2848_v53  ;;  %1234 = vmatpush1.bf16.msra.mxu1 %v2851_v54 }
  0x69   :  { %1162 = vmatprep.subr.bf16.mxu0 %v2856_v55  ;;  %1235 = vmatprep.subr.bf16.mxu1 %v2859_v56 }
  0x6a   :  { %1180 = vmatprep.mubr.bf16.mxu0 %v3070_v1  ;;  %1253 = vmatprep.mubr.bf16.mxu1 %v3070_v1 }
  0x6c   :  { %1163 = vmatpush1.bf16.msra.mxu0 %v2854_v57  ;;  %1236 = vmatpush1.bf16.msra.mxu1 %v2857_v58 }
  0x6d   :  { %1454 = vmatprep.subr.bf16.mxu0 %v2862_v61  ;;  %1527 = vmatprep.subr.bf16.mxu1 %v2865_v62 }
  0x6f   :  { %1181 = vmatmul.mubr.bf16.vlgmr.msra.gmra.mxu0 %v951_v63  ;;  %1254 = vmatmul.mubr.bf16.vlgmr.msra.gmra.mxu1 %v951_v63 }
  0x70   :  { %1455 = vmatpush1.bf16.msra.mxu0 %v2860_v0  ;;  %1528 = vmatpush1.bf16.msra.mxu1 %v2863_v2 }
  0x71   :  { %1456 = vmatprep.subr.bf16.mxu0 %v2868_v3  ;;  %1529 = vmatprep.subr.bf16.mxu1 %v2871_v4 }
  0x72   :  { %1190 = vmatprep.mubr.bf16.mxu0 %v3070_v1  ;;  %1263 = vmatprep.mubr.bf16.mxu1 %v3070_v1 }
  0x74   :  { %1457 = vmatpush1.bf16.msra.mxu0 %v2866_v5  ;;  %1530 = vmatpush1.bf16.msra.mxu1 %v2869_v6 }
  0x75   :  { %1458 = vmatprep.subr.bf16.mxu0 %v2874_v9  ;;  %1531 = vmatprep.subr.bf16.mxu1 %v2877_v10 }
  0x77   :  { %1191 = vmatmul.mubr.bf16.gmra.mxu0 %v952_v11  ;;  %1264 = vmatmul.mubr.bf16.gmra.mxu1 %v952_v11 }
  0x78   :  { %1459 = vmatpush1.bf16.msra.mxu0 %v2872_v12  ;;  %1532 = vmatpush1.bf16.msra.mxu1 %v2875_v13  ;;  %v3686_v13 = vshrl.u32 %v814_v8, 7 }
  0x79   :  { %1460 = vmatprep.subr.bf16.mxu0 %v2880_v14  ;;  %1533 = vmatprep.subr.bf16.mxu1 %v2883_v15 }
  0x7a   :  { %1200 = vmatprep.mubr.bf16.mxu0 %v3070_v1  ;;  %1273 = vmatprep.mubr.bf16.mxu1 %v3070_v1  ;;  %v816_v18 = vsub.s32 0, %v3686_v13  ;;  %v824_v19 = vsub.s32 2, %v3686_v13 }
  0x7c   :  { %1461 = vmatpush1.bf16.msra.mxu0 %v2878_v16  ;;  %1534 = vmatpush1.bf16.msra.mxu1 %v2881_v17 }
  0x7d   :  { %1462 = vmatprep.subr.bf16.mxu0 %v2886_v20  ;;  %1535 = vmatprep.subr.bf16.mxu1 %v2889_v21 }
  0x7f   :  { %1201 = vmatmul.mubr.bf16.gmra.mxu0 %v953_v22  ;;  %1274 = vmatmul.mubr.bf16.gmra.mxu1 %v953_v22  ;;  %v812_v22 = vld [vmem:[%s3955_s6] sm:$0xf] }
  0x80   :  { %1463 = vmatpush1.bf16.msra.mxu0 %v2884_v23  ;;  %1536 = vmatpush1.bf16.msra.mxu1 %v2887_v24  ;;  %v820_v23 = vsub.s32 1, %v3686_v13  ;;  %v828_v24 = vsub.s32 3, %v3686_v13 }
  0x81   :  { %1464 = vmatprep.subr.bf16.mxu0 %v2892_v25  ;;  %1537 = vmatprep.subr.bf16.mxu1 %v2895_v26 }
  0x82   :  { %1210 = vmatprep.mubr.bf16.mxu0 %v3070_v1  ;;  %1283 = vmatprep.mubr.bf16.mxu1 %v3070_v1 }
  0x84   :  { %1465 = vmatpush1.bf16.msra.mxu0 %v2890_v27  ;;  %1538 = vmatpush1.bf16.msra.mxu1 %v2893_v28  ;;  %v3713_v27 = vrot.slane %v812_v22, %v816_v18  ;;  %v3717_v28 = vrot.slane %v812_v22, %v824_v19 }
  0x85   :  { %1466 = vmatprep.subr.bf16.mxu0 %v2898_v31  ;;  %1539 = vmatprep.subr.bf16.mxu1 %v2901_v32 }
  0x87   :  { %1211 = vmatmul.mubr.bf16.gmra.mxu0 %v954_v33  ;;  %1284 = vmatmul.mubr.bf16.gmra.mxu1 %v954_v33  ;;  %v3721_v33 = vrot.slane %v812_v22, %v820_v23 }
  0x88   :  { %1467 = vmatpush1.bf16.msra.mxu0 %v2896_v34  ;;  %1540 = vmatpush1.bf16.msra.mxu1 %v2899_v35  ;;  %v3725_v34 = vrot.slane %v812_v22, %v828_v24 }
  0x89   :  { %1468 = vmatprep.subr.bf16.mxu0 %v2904_v36  ;;  %1541 = vmatprep.subr.bf16.mxu1 %v2907_v37 }
  0x8a   :  { %1486 = vmatprep.mubr.bf16.mxu0 %v3070_v1  ;;  %1559 = vmatprep.mubr.bf16.mxu1 %v3070_v1 }
  0x8c   :  { %1469 = vmatpush1.bf16.msra.mxu0 %v2902_v38  ;;  %1542 = vmatpush1.bf16.msra.mxu1 %v2905_v39 }
  0x8f   :  { %1487 = vmatmul.mubr.bf16.vlgmr.msra.gmra.mxu0 %v914_v42  ;;  %1560 = vmatmul.mubr.bf16.vlgmr.msra.gmra.mxu1 %v914_v42 }
  0x90   :  { %1496 = vmatprep.mubr.bf16.mxu0 %v3070_v1  ;;  %1569 = vmatprep.mubr.bf16.mxu1 %v3070_v1 }
  0x97   :  { %1497 = vmatmul.mubr.bf16.gmra.mxu0 %v915_v45  ;;  %1570 = vmatmul.mubr.bf16.gmra.mxu1 %v915_v45 }
  0x98   :  { %1506 = vmatprep.mubr.bf16.mxu0 %v3070_v1  ;;  %1579 = vmatprep.mubr.bf16.mxu1 %v3070_v1 }
  0x9f   :  { %1507 = vmatmul.mubr.bf16.gmra.mxu0 %v916_v48  ;;  %1580 = vmatmul.mubr.bf16.gmra.mxu1 %v916_v48 }
  0xa0   :  { %1516 = vmatprep.mubr.bf16.mxu0 %v3070_v1  ;;  %1589 = vmatprep.mubr.bf16.mxu1 %v3070_v1 }
  0xa7   :  { %1517 = vmatmul.mubr.bf16.gmra.mxu0 %v917_v51  ;;  %1590 = vmatmul.mubr.bf16.gmra.mxu1 %v917_v51 }
  0xef   :  { %v394_v52 = vpop.f32.mrf.mxu0  ;;  %v467_v53 = vpop.f32.mrf.mxu1 }
  0xf1   :  { %v396_v54 = vpop.f32.mrf.mxu0  ;;  %v469_v55 = vpop.f32.mrf.mxu1 }
  0xf3   :  { %v398_v56 = vpop.f32.mrf.mxu0  ;;  %v471_v57 = vpop.f32.mrf.mxu1 }
  0xf5   :  { %v400_v58 = vpop.f32.mrf.mxu0  ;;  %v473_v59 = vpop.f32.mrf.mxu1 }
  0xf7   :  { %v3654_v1 = vpop.f32.mrf.mxu0  ;;  %v3656_v60 = vpop.f32.mrf.mxu1 }
  0xf9   :  { %v3658_v61 = vpop.f32.mrf.mxu0  ;;  %v3660_v62 = vpop.f32.mrf.mxu1 }
  0xfb   :  { %v3662_v63 = vpop.f32.mrf.mxu0  ;;  %v3664_v0 = vpop.f32.mrf.mxu1 }
  0xfd   :  { %v3666_v2 = vpop.f32.mrf.mxu0  ;;  %v3668_v3 = vpop.f32.mrf.mxu1 }
  0xff   :  { %v3670_v4 = vpop.f32.mrf.mxu0  ;;  %v3672_v5 = vpop.f32.mrf.mxu1 }
 0x101   :  { %v3674_v6 = vpop.f32.mrf.mxu0  ;;  %v3676_v7 = vpop.f32.mrf.mxu1 }
 0x103   :  { %v3678_v9 = vpop.f32.mrf.mxu0  ;;  %v3680_v10 = vpop.f32.mrf.mxu1 }
 0x105   :  { %v3682_v11 = vpop.f32.mrf.mxu0  ;;  %v3684_v12 = vpop.f32.mrf.mxu1 }
 0x107   :  { %v3688_v14 = vpop.f32.mrf.mxu0  ;;  %v3690_v15 = vpop.f32.mrf.mxu1 }
 0x109   :  { %v3692_v16 = vpop.f32.mrf.mxu0  ;;  %v3694_v17 = vpop.f32.mrf.mxu1 }
 0x10b   :  { %v3698_v20 = vpop.f32.mrf.mxu0  ;;  %v3700_v21 = vpop.f32.mrf.mxu1 }
 0x10d   :  { %v3707_v25 = vpop.f32.mrf.mxu0  ;;  %v3709_v26 = vpop.f32.mrf.mxu1 }
 0x10f   :  { %v700_v29 = vpop.f32.mrf.mxu0  ;;  %v773_v30 = vpop.f32.mrf.mxu1 }
 0x110   :  { %v701_v31 = vadd.f32 %v700_v29, %v394_v52  ;;  %v774_v32 = vadd.f32 %v773_v30, %v467_v53 }
 0x111   :  { %v702_v35 = vpop.f32.mrf.mxu0  ;;  %v775_v36 = vpop.f32.mrf.mxu1 }
 0x112   :  { %v834_v37 = vadd.f32 %v3713_v27, %v701_v31  ;;  %v836_v38 = vadd.f32 %v3717_v28, %v774_v32  ;;  %v703_v39 = vadd.f32 %v702_v35, %v396_v54  ;;  %v776_v40 = vadd.f32 %v775_v36, %v469_v55 }
 0x113   :  { %v704_v41 = vpop.f32.mrf.mxu0  ;;  %v777_v42 = vpop.f32.mrf.mxu1 }
 0x114   :  { %866 = vst [vmem:[#allocation2] sm:$0xff] %v834_v37  ;;  %868 = vst [vmem:[#allocation2 + $0x10] sm:$0xff] %v836_v38  ;;  %v835_v43 = vadd.f32 %v3721_v33, %v703_v39  ;;  %v837_v44 = vadd.f32 %v3725_v34, %v776_v40  ;;  %v705_v45 = vadd.f32 %v704_v41, %v398_v56 }
 0x115   :  { %v778_v46 = vadd.f32 %v777_v42, %v471_v57  ;;  %v706_v47 = vpop.f32.mrf.mxu0  ;;  %v779_v48 = vpop.f32.mrf.mxu1 }
 0x116   :  { %867 = vst [vmem:[#allocation2 + $0x8] sm:$0xff] %v835_v43  ;;  %869 = vst [vmem:[#allocation2 + $0x18] sm:$0xff] %v837_v44  ;;  %v838_v49 = vadd.f32 %v3713_v27, %v705_v45  ;;  %v707_v51 = vadd.f32 %v706_v47, %v400_v58  ;;  %v780_v52 = vadd.f32 %v779_v48, %v473_v59 }
 0x117   :  { %v840_v50 = vadd.f32 %v3717_v28, %v778_v46  ;;  %v710_v53 = vpop.f32.mrf.mxu0  ;;  %v783_v54 = vpop.f32.mrf.mxu1 }
 0x118   :  { %870 = vst [vmem:[#allocation2 + $0x20] sm:$0xff] %v838_v49  ;;  %v839_v55 = vadd.f32 %v3721_v33, %v707_v51  ;;  %v841_v8 = vadd.f32 %v3725_v34, %v780_v52  ;;  %v711_v56 = vadd.f32 %v710_v53, %v3654_v1  ;;  %v784_v57 = vadd.f32 %v783_v54, %v3656_v60 }
 0x119   :  { %872 = vst [vmem:[#allocation2 + $0x30] sm:$0xff] %v840_v50  ;;  %v712_v22 = vpop.f32.mrf.mxu0  ;;  %v785_v29 = vpop.f32.mrf.mxu1 }
 0x11a   :  { %871 = vst [vmem:[#allocation2 + $0x28] sm:$0xff] %v839_v55  ;;  %873 = vst [vmem:[#allocation2 + $0x38] sm:$0xff] %v841_v8  ;;  %v842_v30 = vadd.f32 %v3713_v27, %v711_v56  ;;  %v844_v58 = vadd.f32 %v3717_v28, %v784_v57  ;;  %v713_v59 = vadd.f32 %v712_v22, %v3658_v61 }
 0x11b   :  { %v786_v31 = vadd.f32 %v785_v29, %v3660_v62  ;;  %v714_v32 = vpop.f32.mrf.mxu0  ;;  %v787_v35 = vpop.f32.mrf.mxu1 }
 0x11c   :  { %874 = vst [vmem:[#allocation2 + $0x40] sm:$0xff] %v842_v30  ;;  %876 = vst [vmem:[#allocation2 + $0x50] sm:$0xff] %v844_v58  ;;  %v843_v1 = vadd.f32 %v3721_v33, %v713_v59  ;;  %v715_v36 = vadd.f32 %v714_v32, %v3662_v63  ;;  %v788_v37 = vadd.f32 %v787_v35, %v3664_v0 }
 0x11d   :  { %v845_v60 = vadd.f32 %v3725_v34, %v786_v31  ;;  %v716_v38 = vpop.f32.mrf.mxu0  ;;  %v789_v39 = vpop.f32.mrf.mxu1 }
 0x11e   :  { %875 = vst [vmem:[#allocation2 + $0x48] sm:$0xff] %v843_v1  ;;  %v846_v61 = vadd.f32 %v3713_v27, %v715_v36  ;;  %v848_v62 = vadd.f32 %v3717_v28, %v788_v37  ;;  %v717_v40 = vadd.f32 %v716_v38, %v3666_v2  ;;  %v790_v41 = vadd.f32 %v789_v39, %v3668_v3 }
 0x11f   :  { %877 = vst [vmem:[#allocation2 + $0x58] sm:$0xff] %v845_v60  ;;  %v720_v42 = vpop.f32.mrf.mxu0  ;;  %v793_v43 = vpop.f32.mrf.mxu1 }
 0x120   :  { %878 = vst [vmem:[#allocation2 + $0x60] sm:$0xff] %v846_v61  ;;  %880 = vst [vmem:[#allocation2 + $0x70] sm:$0xff] %v848_v62  ;;  %v847_v63 = vadd.f32 %v3721_v33, %v717_v40  ;;  %v849_v0 = vadd.f32 %v3725_v34, %v790_v41  ;;  %v721_v44 = vadd.f32 %v720_v42, %v3670_v4 }
 0x121   :  { %v794_v45 = vadd.f32 %v793_v43, %v3672_v5  ;;  %v722_v46 = vpop.f32.mrf.mxu0  ;;  %v795_v47 = vpop.f32.mrf.mxu1 }
 0x122   :  { %879 = vst [vmem:[#allocation2 + $0x68] sm:$0xff] %v847_v63  ;;  %881 = vst [vmem:[#allocation2 + $0x78] sm:$0xff] %v849_v0  ;;  %v850_v2 = vadd.f32 %v3713_v27, %v721_v44  ;;  %v723_v48 = vadd.f32 %v722_v46, %v3674_v6  ;;  %v796_v49 = vadd.f32 %v795_v47, %v3676_v7 }
 0x123   :  { %v852_v3 = vadd.f32 %v3717_v28, %v794_v45  ;;  %v724_v50 = vpop.f32.mrf.mxu0  ;;  %v797_v51 = vpop.f32.mrf.mxu1 }
 0x124   :  { %882 = vst [vmem:[#allocation2 + $0x80] sm:$0xff] %v850_v2  ;;  %v851_v4 = vadd.f32 %v3721_v33, %v723_v48  ;;  %v853_v5 = vadd.f32 %v3725_v34, %v796_v49  ;;  %v725_v52 = vadd.f32 %v724_v50, %v3678_v9  ;;  %v798_v53 = vadd.f32 %v797_v51, %v3680_v10 }
 0x125   :  { %884 = vst [vmem:[#allocation2 + $0x90] sm:$0xff] %v852_v3  ;;  %v726_v54 = vpop.f32.mrf.mxu0  ;;  %v799_v55 = vpop.f32.mrf.mxu1 }
 0x126   :  { %883 = vst [vmem:[#allocation2 + $0x88] sm:$0xff] %v851_v4  ;;  %885 = vst [vmem:[#allocation2 + $0x98] sm:$0xff] %v853_v5  ;;  %v854_v6 = vadd.f32 %v3713_v27, %v725_v52  ;;  %v856_v7 = vadd.f32 %v3717_v28, %v798_v53  ;;  %v727_v8 = vadd.f32 %v726_v54, %v3682_v11 }
 0x127   :  { %v800_v56 = vadd.f32 %v799_v55, %v3684_v12  ;;  %v730_v57 = vpop.f32.mrf.mxu0  ;;  %v803_v22 = vpop.f32.mrf.mxu1 }
 0x128   :  { %886 = vst [vmem:[#allocation2 + $0xa0] sm:$0xff] %v854_v6  ;;  %888 = vst [vmem:[#allocation2 + $0xb0] sm:$0xff] %v856_v7  ;;  %v855_v9 = vadd.f32 %v3721_v33, %v727_v8  ;;  %v731_v29 = vadd.f32 %v730_v57, %v3688_v14  ;;  %v804_v30 = vadd.f32 %v803_v22, %v3690_v15  ;;  %v2619_v7 = vld [vmem:[%s3955_s6 + $0x4] sm:$0xf]  ;;  %s3900_s6 = smov 0  }
 0x129   :  { %v857_v10 = vadd.f32 %v3725_v34, %v800_v56  ;;  %v732_v58 = vpop.f32.mrf.mxu0  ;;  %v805_v59 = vpop.f32.mrf.mxu1  ;;  %v3832_v57 = vrot.slane %v2619_v7, %v816_v18  ;;  %v3836_v22 = vrot.slane %v2619_v7, %v824_v19 }
 0x12a   :  { %887 = vst [vmem:[#allocation2 + $0xa8] sm:$0xff] %v855_v9  ;;  %v858_v11 = vadd.f32 %v3713_v27, %v731_v29  ;;  %v860_v12 = vadd.f32 %v3717_v28, %v804_v30  ;;  %v733_v31 = vadd.f32 %v732_v58, %v3692_v16  ;;  %v806_v32 = vadd.f32 %v805_v59, %v3694_v17 }
 0x12b   :  { %889 = vst [vmem:[#allocation2 + $0xb8] sm:$0xff] %v857_v10  ;;  %v734_v35 = vpop.f32.mrf.mxu0  ;;  %v807_v1 = vpop.f32.mrf.mxu1  ;;  %v3840_v58 = vrot.slane %v2619_v7, %v820_v23  ;;  %v3844_v59 = vrot.slane %v2619_v7, %v828_v24 }
 0x12c   :  { %890 = vst [vmem:[#allocation2 + $0xc0] sm:$0xff] %v858_v11  ;;  %892 = vst [vmem:[#allocation2 + $0xd0] sm:$0xff] %v860_v12  ;;  %v859_v14 = vadd.f32 %v3721_v33, %v733_v31  ;;  %v861_v15 = vadd.f32 %v3725_v34, %v806_v32  ;;  %v735_v60 = vadd.f32 %v734_v35, %v3698_v20 }
 0x12d   :  { %v808_v36 = vadd.f32 %v807_v1, %v3700_v21  ;;  %v736_v37 = vpop.f32.mrf.mxu0  ;;  %v809_v38 = vpop.f32.mrf.mxu1 }
 0x12e   :  { %891 = vst [vmem:[#allocation2 + $0xc8] sm:$0xff] %v859_v14  ;;  %893 = vst [vmem:[#allocation2 + $0xd8] sm:$0xff] %v861_v15  ;;  %v862_v16 = vadd.f32 %v3713_v27, %v735_v60  ;;  %v737_v39 = vadd.f32 %v736_v37, %v3707_v25  ;;  %v810_v61 = vadd.f32 %v809_v38, %v3709_v26 }
 0x12f   :  { %v864_v17 = vadd.f32 %v3717_v28, %v808_v36  ;;  %v1182_v62 = vpop.f32.mrf.mxu0  ;;  %v1255_v40 = vpop.f32.mrf.mxu1 }
 0x130   :  { %894 = vst [vmem:[#allocation2 + $0xe0] sm:$0xff] %v862_v16  ;;  %v863_v20 = vadd.f32 %v3721_v33, %v737_v39  ;;  %v865_v21 = vadd.f32 %v3725_v34, %v810_v61 }
 0x131   :  { %896 = vst [vmem:[#allocation2 + $0xf0] sm:$0xff] %v864_v17  ;;  %v1184_v41 = vpop.f32.mrf.mxu0  ;;  %v1257_v42 = vpop.f32.mrf.mxu1 }
 0x132   :  { %895 = vst [vmem:[#allocation2 + $0xe8] sm:$0xff] %v863_v20  ;;  %897 = vst [vmem:[#allocation2 + $0xf8] sm:$0xff] %v865_v21 }
 0x133   :  { %v1186_v43 = vpop.f32.mrf.mxu0  ;;  %v1259_v27 = vpop.f32.mrf.mxu1 }
 0x135   :  { %v1188_v63 = vpop.f32.mrf.mxu0  ;;  %v1261_v28 = vpop.f32.mrf.mxu1 }
 0x137   :  { %v1192_v0 = vpop.f32.mrf.mxu0  ;;  %v1265_v25 = vpop.f32.mrf.mxu1 }
 0x139   :  { %v3783_v44 = vpop.f32.mrf.mxu0  ;;  %v3785_v26 = vpop.f32.mrf.mxu1 }
 0x13b   :  { %v3787_v45 = vpop.f32.mrf.mxu0  ;;  %v3789_v46 = vpop.f32.mrf.mxu1 }
 0x13d   :  { %v3791_v33 = vpop.f32.mrf.mxu0  ;;  %v3793_v34 = vpop.f32.mrf.mxu1 }
 0x13f   :  { %v3795_v47 = vpop.f32.mrf.mxu0  ;;  %v3797_v2 = vpop.f32.mrf.mxu1 }
 0x141   :  { %v3799_v3 = vpop.f32.mrf.mxu0  ;;  %v3801_v48 = vpop.f32.mrf.mxu1 }
 0x143   :  { %v3803_v49 = vpop.f32.mrf.mxu0  ;;  %v3805_v50 = vpop.f32.mrf.mxu1 }
 0x145   :  { %v3807_v51 = vpop.f32.mrf.mxu0  ;;  %v3809_v4 = vpop.f32.mrf.mxu1 }
 0x147   :  { %v3811_v5 = vpop.f32.mrf.mxu0  ;;  %v3813_v52 = vpop.f32.mrf.mxu1 }
 0x149   :  { %v3815_v53 = vpop.f32.mrf.mxu0  ;;  %v3817_v54 = vpop.f32.mrf.mxu1 }
 0x14b   :  { %v3819_v55 = vpop.f32.mrf.mxu0  ;;  %v3821_v6 = vpop.f32.mrf.mxu1 }
 0x14d   :  { %v3826_v8 = vpop.f32.mrf.mxu0  ;;  %v3828_v56 = vpop.f32.mrf.mxu1 }
 0x14f   :  { %v1488_v9 = vpop.f32.mrf.mxu0  ;;  %v1561_v10 = vpop.f32.mrf.mxu1 }
 0x150   :  { %v1489_v29 = vadd.f32 %v1488_v9, %v1182_v62  ;;  %v1562_v30 = vadd.f32 %v1561_v10, %v1255_v40 }
 0x151   :  { %v1490_v11 = vpop.f32.mrf.mxu0  ;;  %v1563_v12 = vpop.f32.mrf.mxu1 }
 0x152   :  { %v1623_v18 = vadd.f32 %v3832_v57, %v1489_v29  ;;  %v1625_v31 = vadd.f32 %v3836_v22, %v1562_v30  ;;  %v1491_v19 = vadd.f32 %v1490_v11, %v1184_v41  ;;  %v1564_v32 = vadd.f32 %v1563_v12, %v1257_v42 }
 0x153   :  { %v1492_v35 = vpop.f32.mrf.mxu0  ;;  %v1565_v1 = vpop.f32.mrf.mxu1 }
 0x154   :  { %1655 = vst [vmem:[#allocation3] sm:$0xff] %v1623_v18  ;;  %1657 = vst [vmem:[#allocation3 + $0x10] sm:$0xff] %v1625_v31  ;;  %v1624_v14 = vadd.f32 %v3840_v58, %v1491_v19  ;;  %v1626_v23 = vadd.f32 %v3844_v59, %v1564_v32  ;;  %v1493_v15 = vadd.f32 %v1492_v35, %v1186_v43 }
 0x155   :  { %v1566_v13 = vadd.f32 %v1565_v1, %v1259_v27  ;;  %v1494_v24 = vpop.f32.mrf.mxu0  ;;  %v1567_v60 = vpop.f32.mrf.mxu1 }
 0x156   :  { %1656 = vst [vmem:[#allocation3 + $0x8] sm:$0xff] %v1624_v14  ;;  %1658 = vst [vmem:[#allocation3 + $0x18] sm:$0xff] %v1626_v23  ;;  %v1627_v36 = vadd.f32 %v3832_v57, %v1493_v15  ;;  %v1495_v38 = vadd.f32 %v1494_v24, %v1188_v63  ;;  %v1568_v16 = vadd.f32 %v1567_v60, %v1261_v28 }
 0x157   :  { %v1629_v37 = vadd.f32 %v3836_v22, %v1566_v13  ;;  %v1498_v17 = vpop.f32.mrf.mxu0  ;;  %v1571_v39 = vpop.f32.mrf.mxu1 }
 0x158   :  { %1659 = vst [vmem:[#allocation3 + $0x20] sm:$0xff] %v1627_v36  ;;  %v1628_v61 = vadd.f32 %v3840_v58, %v1495_v38  ;;  %v1630_v62 = vadd.f32 %v3844_v59, %v1568_v16  ;;  %v1499_v40 = vadd.f32 %v1498_v17, %v1192_v0  ;;  %v1572_v20 = vadd.f32 %v1571_v39, %v1265_v25 }
 0x159   :  { %1661 = vst [vmem:[#allocation3 + $0x30] sm:$0xff] %v1629_v37  ;;  %v1500_v21 = vpop.f32.mrf.mxu0  ;;  %v1573_v41 = vpop.f32.mrf.mxu1 }
 0x15a   :  { %1660 = vst [vmem:[#allocation3 + $0x28] sm:$0xff] %v1628_v61  ;;  %1662 = vst [vmem:[#allocation3 + $0x38] sm:$0xff] %v1630_v62  ;;  %v1631_v42 = vadd.f32 %v3832_v57, %v1499_v40  ;;  %v1633_v43 = vadd.f32 %v3836_v22, %v1572_v20  ;;  %v1501_v27 = vadd.f32 %v1500_v21, %v3783_v44 }
 0x15b   :  { %v1574_v63 = vadd.f32 %v1573_v41, %v3785_v26  ;;  %v1502_v28 = vpop.f32.mrf.mxu0  ;;  %v1575_v7 = vpop.f32.mrf.mxu1 }
 0x15c   :  { %1663 = vst [vmem:[#allocation3 + $0x40] sm:$0xff] %v1631_v42  ;;  %1665 = vst [vmem:[#allocation3 + $0x50] sm:$0xff] %v1633_v43  ;;  %v1632_v9 = vadd.f32 %v3840_v58, %v1501_v27  ;;  %v1503_v25 = vadd.f32 %v1502_v28, %v3787_v45  ;;  %v1576_v10 = vadd.f32 %v1575_v7, %v3789_v46 }
 0x15d   :  { %v1634_v0 = vadd.f32 %v3844_v59, %v1574_v63  ;;  %v1504_v29 = vpop.f32.mrf.mxu0  ;;  %v1577_v30 = vpop.f32.mrf.mxu1 }
 0x15e   :  { %1664 = vst [vmem:[#allocation3 + $0x48] sm:$0xff] %v1632_v9  ;;  %v1635_v44 = vadd.f32 %v3832_v57, %v1503_v25  ;;  %v1637_v26 = vadd.f32 %v3836_v22, %v1576_v10  ;;  %v1505_v11 = vadd.f32 %v1504_v29, %v3791_v33  ;;  %v1578_v12 = vadd.f32 %v1577_v30, %v3793_v34 }
 0x15f   :  { %1666 = vst [vmem:[#allocation3 + $0x58] sm:$0xff] %v1634_v0  ;;  %v1508_v18 = vpop.f32.mrf.mxu0  ;;  %v1581_v31 = vpop.f32.mrf.mxu1 }
 0x160   :  { %1667 = vst [vmem:[#allocation3 + $0x60] sm:$0xff] %v1635_v44  ;;  %1669 = vst [vmem:[#allocation3 + $0x70] sm:$0xff] %v1637_v26  ;;  %v1636_v45 = vadd.f32 %v3840_v58, %v1505_v11  ;;  %v1638_v46 = vadd.f32 %v3844_v59, %v1578_v12  ;;  %v1509_v19 = vadd.f32 %v1508_v18, %v3795_v47 }
 0x161   :  { %v1582_v32 = vadd.f32 %v1581_v31, %v3797_v2  ;;  %v1510_v35 = vpop.f32.mrf.mxu0  ;;  %v1583_v1 = vpop.f32.mrf.mxu1 }
 0x162   :  { %1668 = vst [vmem:[#allocation3 + $0x68] sm:$0xff] %v1636_v45  ;;  %1670 = vst [vmem:[#allocation3 + $0x78] sm:$0xff] %v1638_v46  ;;  %v1639_v33 = vadd.f32 %v3832_v57, %v1509_v19  ;;  %v1511_v14 = vadd.f32 %v1510_v35, %v3799_v3  ;;  %v1584_v23 = vadd.f32 %v1583_v1, %v3801_v48 }
 0x163   :  { %v1641_v34 = vadd.f32 %v3836_v22, %v1582_v32  ;;  %v1512_v15 = vpop.f32.mrf.mxu0  ;;  %v1585_v13 = vpop.f32.mrf.mxu1 }
 0x164   :  { %1671 = vst [vmem:[#allocation3 + $0x80] sm:$0xff] %v1639_v33  ;;  %v1640_v47 = vadd.f32 %v3840_v58, %v1511_v14  ;;  %v1642_v2 = vadd.f32 %v3844_v59, %v1584_v23  ;;  %v1513_v24 = vadd.f32 %v1512_v15, %v3803_v49  ;;  %v1586_v60 = vadd.f32 %v1585_v13, %v3805_v50 }
 0x165   :  { %1673 = vst [vmem:[#allocation3 + $0x90] sm:$0xff] %v1641_v34  ;;  %v1514_v36 = vpop.f32.mrf.mxu0  ;;  %v1587_v37 = vpop.f32.mrf.mxu1 }
 0x166   :  { %1672 = vst [vmem:[#allocation3 + $0x88] sm:$0xff] %v1640_v47  ;;  %1674 = vst [vmem:[#allocation3 + $0x98] sm:$0xff] %v1642_v2  ;;  %v1643_v3 = vadd.f32 %v3832_v57, %v1513_v24  ;;  %v1645_v48 = vadd.f32 %v3836_v22, %v1586_v60  ;;  %v1515_v38 = vadd.f32 %v1514_v36, %v3807_v51 }
 0x167   :  { %v1588_v16 = vadd.f32 %v1587_v37, %v3809_v4  ;;  %v1518_v17 = vpop.f32.mrf.mxu0  ;;  %v1591_v39 = vpop.f32.mrf.mxu1 }
 0x168   :  { %1675 = vst [vmem:[#allocation3 + $0xa0] sm:$0xff] %v1643_v3  ;;  %1677 = vst [vmem:[#allocation3 + $0xb0] sm:$0xff] %v1645_v48  ;;  %v1644_v49 = vadd.f32 %v3840_v58, %v1515_v38  ;;  %v1519_v61 = vadd.f32 %v1518_v17, %v3811_v5  ;;  %v1592_v62 = vadd.f32 %v1591_v39, %v3813_v52 }
 0x169   :  { %v1646_v50 = vadd.f32 %v3844_v59, %v1588_v16  ;;  %v1520_v40 = vpop.f32.mrf.mxu0  ;;  %v1593_v20 = vpop.f32.mrf.mxu1 }
 0x16a   :  { %1676 = vst [vmem:[#allocation3 + $0xa8] sm:$0xff] %v1644_v49  ;;  %v1647_v51 = vadd.f32 %v3832_v57, %v1519_v61  ;;  %v1649_v4 = vadd.f32 %v3836_v22, %v1592_v62  ;;  %v1521_v21 = vadd.f32 %v1520_v40, %v3815_v53  ;;  %v1594_v41 = vadd.f32 %v1593_v20, %v3817_v54 }
 0x16b   :  { %1678 = vst [vmem:[#allocation3 + $0xb8] sm:$0xff] %v1646_v50  ;;  %v1522_v42 = vpop.f32.mrf.mxu0  ;;  %v1595_v43 = vpop.f32.mrf.mxu1 }
 0x16c   :  { %1679 = vst [vmem:[#allocation3 + $0xc0] sm:$0xff] %v1647_v51  ;;  %1681 = vst [vmem:[#allocation3 + $0xd0] sm:$0xff] %v1649_v4  ;;  %v1648_v5 = vadd.f32 %v3840_v58, %v1521_v21  ;;  %v1650_v52 = vadd.f32 %v3844_v59, %v1594_v41  ;;  %v1523_v27 = vadd.f32 %v1522_v42, %v3819_v55 }
 0x16d   :  { %v1596_v63 = vadd.f32 %v1595_v43, %v3821_v6  ;;  %v1524_v28 = vpop.f32.mrf.mxu0  ;;  %v1597_v7 = vpop.f32.mrf.mxu1 }
 0x16e   :  { %1680 = vst [vmem:[#allocation3 + $0xc8] sm:$0xff] %v1648_v5  ;;  %1682 = vst [vmem:[#allocation3 + $0xd8] sm:$0xff] %v1650_v52  ;;  %v1651_v53 = vadd.f32 %v3832_v57, %v1523_v27  ;;  %v1525_v9 = vadd.f32 %v1524_v28, %v3826_v8  ;;  %v1598_v0 = vadd.f32 %v1597_v7, %v3828_v56 }
 0x16f   :  { %v1653_v54 = vadd.f32 %v3836_v22, %v1596_v63 }
 0x170   :  { %1683 = vst [vmem:[#allocation3 + $0xe0] sm:$0xff] %v1651_v53  ;;  %v1652_v25 = vadd.f32 %v3840_v58, %v1525_v9  ;;  %v1654_v55 = vadd.f32 %v3844_v59, %v1598_v0 }
 0x171   :  { %1685 = vst [vmem:[#allocation3 + $0xf0] sm:$0xff] %v1653_v54 }
 0x172   :  { %1684 = vst [vmem:[#allocation3 + $0xe8] sm:$0xff] %v1652_v25  ;;  %1686 = vst [vmem:[#allocation3 + $0xf8] sm:$0xff] %v1654_v55 }
 0x173 LB: > { %v2908_v6 = vld [vmem:[#allocation4 + $0xe4] ss:$16 sps:$4 sm:$0xff]   ;;  %v2910_v57 = vld [vmem:[#allocation4 + $0xe0] ss:$16 sps:$4 sm:$0xff]   ;;  %v3071_v8 = vmov 0   ;;  %s2700_s23 = sshll.u32 %s3064_s6, 5  ;;  %s3064_s6 = sphi %s3900_s6, %s1692_s6  }
 0x174   : > { %1926 = vmatprep.mubr.bf16.mxu0 %v3071_v8  ;;  %1967 = vmatprep.mubr.bf16.mxu1 %v3071_v8  ;;  %v2911_v56 = vld [vmem:[#allocation4 + $0xc4] ss:$16 sps:$4 sm:$0xff]   ;;  %v2913_v22 = vld [vmem:[#allocation4 + $0xc0] ss:$16 sps:$4 sm:$0xff]   ;;  %v2919_v59 = vld [vmem:[#allocation4 + $0xec] ss:$16 sps:$4 sm:$0xff]  }
 0x175   : > { %1894 = vmatprep.subr.bf16.mxu0 %v2908_v6  ;;  %v2914_v58 = vld [vmem:[#allocation4 + $0xa4] ss:$16 sps:$4 sm:$0xff]   ;;  %v2922_v10 = vld [vmem:[#allocation4 + $0xe8] ss:$16 sps:$4 sm:$0xff]   ;;  %v2916_v29 = vld [vmem:[#allocation4 + $0xa0] ss:$16 sps:$4 sm:$0xff]   ;;  %1935 = vmatprep.subr.bf16.mxu1 %v2919_v59 }
 0x176   : > { %1895 = vmatpush1.bf16.msra.mxu0 %v2910_v57  ;;  %v2917_v30 = vld [vmem:[#allocation4 + $0x84] ss:$16 sps:$4 sm:$0xff]   ;;  %1936 = vmatpush1.bf16.msra.mxu1 %v2922_v10  ;;  %v2925_v44 = vld [vmem:[#allocation4 + $0xcc] ss:$16 sps:$4 sm:$0xff]   ;;  %v2928_v26 = vld [vmem:[#allocation4 + $0xc8] ss:$16 sps:$4 sm:$0xff]  }
 0x177   : > { %1896 = vmatprep.subr.bf16.mxu0 %v2911_v56  ;;  %1937 = vmatprep.subr.bf16.mxu1 %v2925_v44  ;;  %v2921_v11 = vld [vmem:[#allocation4 + $0x80] ss:$16 sps:$4 sm:$0xff]   ;;  %v2923_v12 = vld [vmem:[#allocation4 + $0x64] ss:$16 sps:$4 sm:$0xff]   ;;  %v2931_v18 = vld [vmem:[#allocation4 + $0xac] ss:$16 sps:$4 sm:$0xff]  }
 0x178   : > { %v2934_v31 = vld [vmem:[#allocation4 + $0xa8] ss:$16 sps:$4 sm:$0xff]   ;;  %v2937_v45 = vld [vmem:[#allocation4 + $0x8c] ss:$16 sps:$4 sm:$0xff]   ;;  %v2927_v46 = vld [vmem:[#allocation4 + $0x60] ss:$16 sps:$4 sm:$0xff]  }
 0x179   : > { %v2929_v19 = vld [vmem:[#allocation4 + $0x44] ss:$16 sps:$4 sm:$0xff]   ;;  %v2940_v32 = vld [vmem:[#allocation4 + $0x88] ss:$16 sps:$4 sm:$0xff]   ;;  %v2943_v35 = vld [vmem:[#allocation4 + $0x6c] ss:$16 sps:$4 sm:$0xff]  }
 0x17a   : > { %1897 = vmatpush1.bf16.msra.mxu0 %v2913_v22  ;;  %1938 = vmatpush1.bf16.msra.mxu1 %v2928_v26  ;;  %v2933_v1 = vld [vmem:[#allocation4 + $0x40] ss:$16 sps:$4 sm:$0xff]   ;;  %v2935_v33 = vld [vmem:[#allocation4 + $0x24] ss:$16 sps:$4 sm:$0xff]   ;;  %v2946_v34 = vld [vmem:[#allocation4 + $0x68] ss:$16 sps:$4 sm:$0xff]  }
 0x17b   : > { %1898 = vmatprep.subr.bf16.mxu0 %v2914_v58  ;;  %1939 = vmatprep.subr.bf16.mxu1 %v2931_v18  ;;  %v2947_v14 = vld [vmem:[#allocation4 + $0x4c] ss:$16 sps:$4 sm:$0xff]   ;;  %v2939_v23 = vld [vmem:[#allocation4 + $0x20] ss:$16 sps:$4 sm:$0xff]   ;;  %v2941_v15 = vld [vmem:[#allocation4 + $0x4] ss:$16 sps:$4 sm:$0xff]  }
 0x17c   : > { %v2952_v13 = vld [vmem:[#allocation4 + $0x48] ss:$16 sps:$4 sm:$0xff]   ;;  %v2953_v47 = vld [vmem:[#allocation4 + $0x2c] ss:$16 sps:$4 sm:$0xff]   ;;  %v2945_v2 = vld [vmem:[#allocation4] ss:$16 sps:$4 sm:$0xff]  }
 0x17d   : > { %v1700_v24 = vld [vmem:[%s3958_s9] sm:$0xff]  ;;  %v2958_v36 = vld [vmem:[#allocation4 + $0x28] ss:$16 sps:$4 sm:$0xff]   ;;  %v2959_v37 = vld [vmem:[#allocation4 + $0xc] ss:$16 sps:$4 sm:$0xff]   ;;  %s1695_s24 = scalar_lea.vmem [#allocation2], %s2700_s23 }
 0x17e   : > { %1899 = vmatpush1.bf16.msra.mxu0 %v2916_v29  ;;  %1940 = vmatpush1.bf16.msra.mxu1 %v2934_v31  ;;  %v2951_v60 = vld [vmem:[#allocation4 + $0x1e4] ss:$16 sps:$4 sm:$0xff]   ;;  %v1701_v3 = vpack.c.bf16 %v1700_v24, %v1700_v24  ;;  %v2949_v48 = vld [vmem:[#allocation4 + $0x1e0] ss:$16 sps:$4 sm:$0xff]   ;;  %v2964_v16 = vld [vmem:[#allocation4 + $0x8] ss:$16 sps:$4 sm:$0xff]  }
 0x17f   : > { %1900 = vmatprep.subr.bf16.mxu0 %v2917_v30  ;;  %1941 = vmatprep.subr.bf16.mxu1 %v2937_v45  ;;  %v2957_v38 = vld [vmem:[#allocation4 + $0x1c4] ss:$16 sps:$4 sm:$0xff]   ;;  %v2970_v17 = vld [vmem:[#allocation4 + $0x1ec] ss:$16 sps:$4 sm:$0xff]   ;;  %v2955_v39 = vld [vmem:[#allocation4 + $0x1c0] ss:$16 sps:$4 sm:$0xff]  }
 0x180   : > { %v2963_v49 = vld [vmem:[#allocation4 + $0x1a4] ss:$16 sps:$4 sm:$0xff]   ;;  %v2968_v50 = vld [vmem:[#allocation4 + $0x1e8] ss:$16 sps:$4 sm:$0xff]   ;;  %v2976_v61 = vld [vmem:[#allocation4 + $0x1cc] ss:$16 sps:$4 sm:$0xff]  }
 0x181   : > { %v2961_v62 = vld [vmem:[#allocation4 + $0x1a0] ss:$16 sps:$4 sm:$0xff]   ;;  %v2967_v40 = vld [vmem:[#allocation4 + $0x184] ss:$16 sps:$4 sm:$0xff]   ;;  %v2974_v20 = vld [vmem:[#allocation4 + $0x1c8] ss:$16 sps:$4 sm:$0xff]  }
 0x182   : > { %1901 = vmatpush1.bf16.msra.mxu0 %v2921_v11  ;;  %1942 = vmatpush1.bf16.msra.mxu1 %v2940_v32  ;;  %v2982_v51 = vld [vmem:[#allocation4 + $0x1ac] ss:$16 sps:$4 sm:$0xff]   ;;  %v2965_v4 = vld [vmem:[#allocation4 + $0x180] ss:$16 sps:$4 sm:$0xff]   ;;  %v2973_v21 = vld [vmem:[#allocation4 + $0x164] ss:$16 sps:$4 sm:$0xff]  }
 0x183   : > { %1902 = vmatprep.subr.bf16.mxu0 %v2923_v12  ;;  %1943 = vmatprep.subr.bf16.mxu1 %v2943_v35  ;;  %v2980_v41 = vld [vmem:[#allocation4 + $0x1a8] ss:$16 sps:$4 sm:$0xff]   ;;  %v2988_v42 = vld [vmem:[#allocation4 + $0x18c] ss:$16 sps:$4 sm:$0xff]   ;;  %v2971_v43 = vld [vmem:[#allocation4 + $0x160] ss:$16 sps:$4 sm:$0xff]  }
 0x184   : > { %v2979_v5 = vld [vmem:[#allocation4 + $0x144] ss:$16 sps:$4 sm:$0xff]   ;;  %v2986_v52 = vld [vmem:[#allocation4 + $0x188] ss:$16 sps:$4 sm:$0xff]   ;;  %v2994_v27 = vld [vmem:[#allocation4 + $0x16c] ss:$16 sps:$4 sm:$0xff]  }
 0x185   : > { %v2977_v63 = vld [vmem:[#allocation4 + $0x140] ss:$16 sps:$4 sm:$0xff]   ;;  %v2985_v28 = vld [vmem:[#allocation4 + $0x124] ss:$16 sps:$4 sm:$0xff]   ;;  %v2992_v7 = vld [vmem:[#allocation4 + $0x168] ss:$16 sps:$4 sm:$0xff]  }
 0x186   : > { %1903 = vmatpush1.bf16.msra.mxu0 %v2927_v46  ;;  %1944 = vmatpush1.bf16.msra.mxu1 %v2946_v34  ;;  %v2997_v53 = vld [vmem:[#allocation4 + $0x14c] ss:$16 sps:$4 sm:$0xff]   ;;  %v2983_v54 = vld [vmem:[#allocation4 + $0x120] ss:$16 sps:$4 sm:$0xff]   ;;  %v2991_v9 = vld [vmem:[#allocation4 + $0x104] ss:$16 sps:$4 sm:$0xff]  }
 0x187   : > { %1904 = vmatprep.subr.bf16.mxu0 %v2929_v19  ;;  %1945 = vmatprep.subr.bf16.mxu1 %v2947_v14  ;;  %v2995_v0 = vld [vmem:[#allocation4 + $0x148] ss:$16 sps:$4 sm:$0xff]   ;;  %v3000_v25 = vld [vmem:[#allocation4 + $0x12c] ss:$16 sps:$4 sm:$0xff]   ;;  %v2989_v55 = vld [vmem:[#allocation4 + $0x100] ss:$16 sps:$4 sm:$0xff]  }
 0x188   : > { %v2660_v6 = vld [vmem:[%s3958_s9 + $0x8] sm:$0xff]  ;;  %v1696_v58 = vld [vmem:[%s1695_s24] sm:$0xff]  ;;  %v1699_v45 = vld [vmem:[%s1695_s24 + $0x18] sm:$0xff]  ;;  %s2010_s25 = ssub.s32 7, %s3064_s6  ;;  %s2657_s29 = sshll.u32 %s3064_s6, 3 }
 0x189   : > { %v2998_v57 = vld [vmem:[#allocation4 + $0x128] ss:$16 sps:$4 sm:$0xff]   ;;  %v2020_v56 = vpack.c.bf16 %v2660_v6, %v2660_v6  ;;  %s2701_s26 = sshll.u32 %s2010_s25, 5  ;;  %s2006_s12 = scalar_lea.vmem %s3956_s7, %s2657_s29 }
 0x18a   : > { %1905 = vmatpush1.bf16.msra.mxu0 %v2933_v1  ;;  %1946 = vmatpush1.bf16.msra.mxu1 %v2952_v13  ;;  %v3001_v22 = vld [vmem:[#allocation4 + $0x108] ss:$16 sps:$4 sm:$0xff]   ;;  %v1698_v1 = vld [vmem:[%s1695_s24 + $0x10] sm:$0xff]  ;;  %s2013_s27 = scalar_lea.vmem [#allocation3], %s2701_s26  ;;  %s2697_s16 = sshll.u32 %s2010_s25, 3 }
 0x18b   : > { %1906 = vmatprep.subr.bf16.mxu0 %v2935_v33  ;;  %1947 = vmatprep.subr.bf16.mxu1 %v2953_v47  ;;  %v1697_v10 = vld [vmem:[%s1695_s24 + $0x8] sm:$0xff]  ;;  %v2014_v47 = vld [vmem:[%s2013_s27] sm:$0xff]  ;;  %s2327_s19 = scalar_lea.vmem %s3957_s8, %s2697_s16  ;;  %s1692_s6 = sadd.s32 1, %s3064_s6  }
 0x18c   : > { %p1689_p5 = scmp.ge.s32.totalorder %s1692_s6, 8  }
 0x18e   : > { %1907 = vmatpush1.bf16.msra.mxu0 %v2939_v23  ;;  %1948 = vmatpush1.bf16.msra.mxu1 %v2958_v36  ;;  %v2015_v36 = vld [vmem:[%s2013_s27 + $0x8] sm:$0xff] }
 0x18f   : > { %1908 = vmatprep.subr.bf16.mxu0 %v2941_v15  ;;  %1949 = vmatprep.subr.bf16.mxu1 %v2959_v37 }
 0x192   : > { %1909 = vmatpush1.bf16.msra.mxu0 %v2945_v2  ;;  %1950 = vmatpush1.bf16.msra.mxu1 %v2964_v16 }
 0x193   : > { %2214 = vmatprep.subr.bf16.mxu0 %v2951_v60  ;;  %2255 = vmatprep.subr.bf16.mxu1 %v2970_v17 }
 0x195   : > { %1927 = vmatmul.mubr.bf16.vlgmr.msra.gmra.mxu0 %v1701_v3  ;;  %1968 = vmatmul.mubr.bf16.vlgmr.msra.gmra.mxu1 %v1701_v3 }
 0x196   : > { %2215 = vmatpush1.bf16.msra.mxu0 %v2949_v48  ;;  %2246 = vmatprep.mubr.bf16.mxu0 %v3071_v8  ;;  %v1999_v48 = vld [vmem:[%s3959_s10] sm:$0xff] }
 0x197   : > { %2216 = vmatprep.subr.bf16.mxu0 %v2957_v38  ;;  %2256 = vmatpush1.bf16.msra.mxu1 %v2968_v50 }
 0x198   : > { %2257 = vmatprep.subr.bf16.mxu1 %v2976_v61  ;;  %2287 = vmatprep.mubr.bf16.mxu1 %v3071_v8  ;;  %v3003_v8 = vld [vmem:[#allocation4 + $0x10c] ss:$16 sps:$4 sm:$0xff]  }
 0x19a   : > { %2217 = vmatpush1.bf16.msra.mxu0 %v2955_v39 }
 0x19b   : > { %2218 = vmatprep.subr.bf16.mxu0 %v2963_v49  ;;  %2258 = vmatpush1.bf16.msra.mxu1 %v2974_v20 }
 0x19c   : > { %2259 = vmatprep.subr.bf16.mxu1 %v2982_v51 }
 0x19e   : > { %2219 = vmatpush1.bf16.msra.mxu0 %v2961_v62 }
 0x19f   : > { %2220 = vmatprep.subr.bf16.mxu0 %v2967_v40  ;;  %2260 = vmatpush1.bf16.msra.mxu1 %v2980_v41  ;;  %v2017_v41 = vld [vmem:[%s2013_s27 + $0x18] sm:$0xff] }
 0x1a0   : > { %2261 = vmatprep.subr.bf16.mxu1 %v2988_v42 }
 0x1a2   : > { %2221 = vmatpush1.bf16.msra.mxu0 %v2965_v4 }
 0x1a3   : > { %2222 = vmatprep.subr.bf16.mxu0 %v2973_v21  ;;  %2262 = vmatpush1.bf16.msra.mxu1 %v2986_v52 }
 0x1a4   : > { %2263 = vmatprep.subr.bf16.mxu1 %v2994_v27 }
 0x1a6   : > { %2223 = vmatpush1.bf16.msra.mxu0 %v2971_v43 }
 0x1a7   : > { %2224 = vmatprep.subr.bf16.mxu0 %v2979_v5  ;;  %2264 = vmatpush1.bf16.msra.mxu1 %v2992_v7  ;;  %v2016_v5 = vld [vmem:[%s2013_s27 + $0x10] sm:$0xff] }
 0x1a8   : > { %2265 = vmatprep.subr.bf16.mxu1 %v2997_v53 }
 0x1aa   : > { %2225 = vmatpush1.bf16.msra.mxu0 %v2977_v63 }
 0x1ab   : > { %2226 = vmatprep.subr.bf16.mxu0 %v2985_v28  ;;  %2266 = vmatpush1.bf16.msra.mxu1 %v2995_v0 }
 0x1ac   : > { %2267 = vmatprep.subr.bf16.mxu1 %v3000_v25 }
 0x1ae   : > { %2227 = vmatpush1.bf16.msra.mxu0 %v2983_v54 }
 0x1af   : > { %2228 = vmatprep.subr.bf16.mxu0 %v2991_v9  ;;  %2268 = vmatpush1.bf16.msra.mxu1 %v2998_v57 }
 0x1b0   : > { %2269 = vmatprep.subr.bf16.mxu1 %v3003_v8  ;;  %v2696_v8 = vld [vmem:[%s3959_s10 + $0x8] sm:$0xff] }
 0x1b2   : > { %2229 = vmatpush1.bf16.msra.mxu0 %v2989_v55 }
 0x1b3   : > { %2270 = vmatpush1.bf16.msra.mxu1 %v3001_v22 }
 0x1b5   : > { %2247 = vmatmul.mubr.bf16.vlgmr.msra.gmra.mxu0 %v2020_v56 }
 0x1b6   : > { %2288 = vmatmul.mubr.bf16.vlgmr.msra.gmra.mxu1 %v2020_v56 }
 0x255   : > { %v1928_v59 = vpop.f32.mrf.mxu0  ;;  %v1969_v18 = vpop.f32.mrf.mxu1 }
 0x256   : > { %v1976_v29 = vadd.f32 %v1928_v59, %v1696_v58  ;;  %v1978_v34 = vadd.f32 %v1969_v18, %v1698_v1 }
 0x257   : > { %v1930_v30 = vpop.f32.mrf.mxu0  ;;  %v1971_v46 = vpop.f32.mrf.mxu1 }
 0x258   : > { %v2654_v44 = vmul.f32 -1.442695, %v1976_v29  ;;  %v1977_v26 = vadd.f32 %v1930_v30, %v1697_v10  ;;  %v1979_v32 = vadd.f32 %v1971_v46, %v1699_v45 }
 0x259   : > { %v1932_v11 = vpop.f32.mrf.mxu0  ;;  %v1973_v19 = vpop.f32.mrf.mxu1 }
 0x25a   : > { %3004 = vpow2.f32 %v2654_v44  ;;  %v2655_v12 = vmul.f32 -1.442695, %v1977_v26  ;;  %v2656_v33 = vmul.f32 -1.442695, %v1979_v32 }
 0x25b   : > { %v1933_v31 = vpop.f32.mrf.mxu0  ;;  %v1974_v35 = vpop.f32.mrf.mxu1 }
 0x25c   : > { %3006 = vpow2.f32 %v2655_v12 }
 0x25d   : > { %3008 = vpow2.f32 %v2656_v33 }
 0x25e   : > { %3010 = vtanh.f32 %v1978_v34 }
 0x267   : > { %v3005_v14 = vpop.eup %3004 }
 0x268   : > { %v1983_v23 = vadd.f32 1.0, %v3005_v14 }
 0x269   : > { %v3007_v15 = vpop.eup %3006 }
 0x26a   : > { %3012 = vrcp.f32 %v1983_v23  ;;  %v1989_v13 = vadd.f32 1.0, %v3007_v15  ;;  %v3009_v2 = vpop.eup %3008 }
 0x26b   : > { %v3011_v24 = vpop.eup %3010  ;;  %v1996_v38 = vadd.f32 1.0, %v3009_v2 }
 0x26c   : > { %3014 = vrcp.f32 %v1989_v13 }
 0x275   : > { %v2248_v60 = vpop.f32.mrf.mxu0 }
 0x276   : > { %v2296_v37 = vadd.f32 %v2248_v60, %v2014_v47  ;;  %v2289_v20 = vpop.f32.mrf.mxu1 }
 0x277   : > { %v3013_v3 = vpop.eup %3012  ;;  %v2250_v16 = vpop.f32.mrf.mxu0  ;;  %v2298_v27 = vadd.f32 %v2289_v20, %v2016_v5 }
 0x278   : > { %v2001_v17 = vmul.f32 %v3013_v3, %v3011_v24  ;;  %v2693_v39 = vmul.f32 -1.442695, %v2296_v37  ;;  %v2297_v49 = vadd.f32 %v2250_v16, %v2015_v36  ;;  %v2291_v21 = vpop.f32.mrf.mxu1 }
 0x279   : > { %v3015_v50 = vpop.eup %3014  ;;  %v2252_v61 = vpop.f32.mrf.mxu0  ;;  %v2299_v52 = vadd.f32 %v2291_v21, %v2017_v41 }
 0x27a   : > { %v2000_v62 = vmul.f32 %v3015_v50, %v1999_v48  ;;  %3016 = vpow2.f32 %v2693_v39  ;;  %v2694_v40 = vmul.f32 -1.442695, %v2297_v49  ;;  %v2293_v42 = vpop.f32.mrf.mxu1 }
 0x27b   : > { %3018 = vrcp.f32 %v1996_v38  ;;  %v2253_v51 = vpop.f32.mrf.mxu0  ;;  %v2695_v63 = vmul.f32 -1.442695, %v2299_v52 }
 0x27c   : > { %v2002_v4 = vadd.f32 %v2001_v17, %v2000_v62  ;;  %3020 = vpow2.f32 %v2694_v40  ;;  %v2294_v43 = vpop.f32.mrf.mxu1 }
 0x27e   : > { %3022 = vtanh.f32 %v2002_v4  ;;  %2009 = vst [vmem:[%s3959_s10] sm:$0xff] %v2002_v4 }
 0x27f   : > { %3024 = vtanh.f32 %v2298_v27 }
 0x280   : > { %3026 = vpow2.f32 %v2695_v63 }
 0x287   : > { %v3017_v28 = vpop.eup %3016 }
 0x288   : > { %v3019_v7 = vpop.eup %3018  ;;  %v2303_v53 = vadd.f32 1.0, %v3017_v28 }
 0x289   : > { %v3021_v54 = vpop.eup %3020 }
 0x28a   : > { %3028 = vrcp.f32 %v2303_v53  ;;  %v2309_v9 = vadd.f32 1.0, %v3021_v54 }
 0x28b   : > { %v3023_v0 = vpop.eup %3022 }
 0x28c   : > { %v2004_v25 = vmul.f32 %v3023_v0, %v3019_v7  ;;  %3030 = vrcp.f32 %v2309_v9  ;;  %v3025_v55 = vpop.eup %3024 }
 0x28d   : > { %v3027_v6 = vpop.eup %3026 }
 0x28e   : > { %2007 = vst [vmem:[%s2006_s12] sm:$0xff] %v2004_v25  ;;  %2008 = vst [vmem:[%s3958_s9] sm:$0xff] %v2004_v25  ;;  %v2316_v22 = vadd.f32 1.0, %v3027_v6 }
 0x290   : > { %3032 = vrcp.f32 %v2316_v22 }
 0x297   : > { %v3029_v57 = vpop.eup %3028 }
 0x298   : > { %v2322_v59 = vmul.f32 %v3029_v57, %v3025_v55 }
 0x299   : > { %v3031_v56 = vpop.eup %3030 }
 0x29a   : > { %v2321_v58 = vmul.f32 %v3031_v56, %v2696_v8 }
 0x29c   : > { %v2323_v10 = vadd.f32 %v2322_v59, %v2321_v58 }
 0x29d   : > { %v3033_v29 = vpop.eup %3032 }
 0x29e   : > { %3034 = vtanh.f32 %v2323_v10  ;;  %2699 = vst [vmem:[%s3959_s10 + $0x8] sm:$0xff] %v2323_v10 }
 0x2aa   :  { %1691 = sbr.rel (!%p1689_p5) target bundleno = 371 (0x173), region = 108 }
 0x2ab   : > { %v3035_v30 = vpop.eup %3034 }
 0x2ac   : > { %v2325_v44 = vmul.f32 %v3035_v30, %v3033_v29 }
 0x2ae   : > { %2328 = vst [vmem:[%s2327_s19] sm:$0xff] %v2325_v44  ;;  %2698 = vst [vmem:[%s3958_s9 + $0x8] sm:$0xff] %v2325_v44 }
 0x2af   :  { %2361 = vsyncpa [#allocation5], 1 }

</bundles_post_ra>
